<compile_context>
chip_gen: v6e
topology: v6e:2x2x1
jax: 0.10.0
libtpu: 0.0.40
codegen_flags: <defaults>
</compile_context>

<pallas_src>
import functools

import jax
import jax.numpy as jnp
from jax.experimental import pallas as pl
from jax.experimental.pallas import tpu as pltpu


def _round_up(x, m):
    return (x + m - 1) // m * m


# ---------------------------------------------------------------------------
# Pallas kernel: fused 3x3 conv (9 shifted matmuls) + BN shift + ReLU
# ---------------------------------------------------------------------------
def _conv_bn_relu_kernel(x_ref, w_ref, shift_ref, o_ref, *,
                         tile_m, row_offsets, n_m_tiles):
    # x_ref:     (R_tot, Kfull)        bf16  flattened padded image, resident
    #                                        in VMEM across all m-tiles of it
    # w_ref:     (9, Kfull, Cout_pad)  bf16  per-tap weights, BN scale folded
    # shift_ref: (1, Cout_pad)         f32   beta + (conv_bias - mean) * scale
    # o_ref:     (tile_m, Cout_pad)          lane-dense output tile
    if n_m_tiles == 1:
        base = 0  # static -> purely static tap slices at small shapes
    else:
        base = pl.multiple_of(pl.program_id(1) * tile_m, 8)

    acc = None
    for t, off in enumerate(row_offsets):            # unrolled, 9 taps
        xt = x_ref[pl.ds(base + off, tile_m), :]     # (tile_m, Kfull)  bf16
        wt = w_ref[t]                                # (Kfull, Cout_pad) bf16
        d = jnp.dot(xt, wt, preferred_element_type=jnp.float32)
        acc = d if acc is None else acc + d

    acc = acc + shift_ref[...]                       # f32 epilogue
    o_ref[...] = jnp.maximum(acc, 0.0).astype(o_ref.dtype)


# ---------------------------------------------------------------------------
# One pre_conv_i block: Conv3x3 + Dropout2d(eval) + BatchNorm(eval) + ReLU
# ---------------------------------------------------------------------------
def conv3x3_bn_relu(x_nhwc, w_oihw, bias, gamma, beta, r_mean, r_var, *,
                    stride, eps=1e-5, tile_m=512, out_dtype=jnp.bfloat16):
    n, h, w, cin = x_nhwc.shape
    cout = w_oihw.shape[0]
    s = stride
    ho = (h + 2 - 3) // s + 1
    wo = (w + 2 - 3) // s + 1
    a = ho + 2 // s                      # rows of the phase-split grid
    b = wo + 2 // s                      # cols of the phase-split grid
    kfull = s * s * cin                  # channels after space-to-depth

    # Zero-pad (pad=1 conv) up to exactly (s*a, s*b) so space-to-depth is a
    # plain reshape, then flatten the spatial grid.  A strided 3x3 conv then
    # becomes 9 matmuls over contiguous row-shifted slices of one flat array.
    xpad = jnp.pad(x_nhwc,
                   ((0, 0), (1, s * a - 1 - h), (1, s * b - 1 - w), (0, 0)))
    xp = xpad.reshape(n, a, s, b, s, cin).transpose(0, 1, 3, 2, 4, 5)
    xf = xp.reshape(n, a * b, kfull)

    # Tap table: flat-row offset and phase channel-block per (kh, kw).
    kkw = [(kh, kw) for kh in range(3) for kw in range(3)]
    row_offsets = tuple((kh // s) * b + (kw // s) for kh, kw in kkw)
    phases = tuple((kh % s) * s + (kw % s) for kh, kw in kkw)
    max_off = max(row_offsets)

    m = ho * b                                   # flat output rows computed
    tm = min(tile_m, _round_up(m, 16))           # biggest tile the image allows
    m_pad = _round_up(m, tm)
    n_m_tiles = m_pad // tm
    r_tot = _round_up(m_pad + max_off, 16)       # rows the taps may touch
    xf = jnp.pad(xf, ((0, 0), (0, r_tot - a * b), (0, 0))).astype(jnp.bfloat16)

    # Fold BN (eval) + conv bias: scale goes into the weights, shift is added
    # in the epilogue.  Pad Cout to 128 for lane-dense (unmasked) stores.
    scale = gamma / jnp.sqrt(r_var + eps)
    shift = beta + (bias - r_mean) * scale
    cout_pad = _round_up(cout, 128)

    wmat = jnp.zeros((9, kfull, cout_pad), jnp.float32)
    for t, (kh, kw) in enumerate(kkw):
        p = phases[t]
        blk = (w_oihw[:, :, kh, kw] * scale[:, None]).T      # (cin, cout)
        wmat = wmat.at[t, p * cin:(p + 1) * cin, :cout].set(blk)
    wmat = wmat.astype(jnp.bfloat16)
    shift_row = jnp.zeros((1, cout_pad), jnp.float32).at[0, :cout].set(shift)

    kernel = functools.partial(_conv_bn_relu_kernel, tile_m=tm,
                               row_offsets=row_offsets, n_m_tiles=n_m_tiles)
    out = pl.pallas_call(
        kernel,
        out_shape=jax.ShapeDtypeStruct((n, m_pad, cout_pad), out_dtype),
        grid=(n, n_m_tiles),
        in_specs=[
            # Whole (flattened) image: block index depends only on the image,
            # so it stays resident in VMEM across that image's m-tiles.
            pl.BlockSpec((None, r_tot, kfull), lambda ni, mi: (ni, 0, 0)),
            pl.BlockSpec((9, kfull, cout_pad), lambda ni, mi: (0, 0, 0)),
            pl.BlockSpec((1, cout_pad), lambda ni, mi: (0, 0)),
        ],
        out_specs=pl.BlockSpec((None, tm, cout_pad), lambda ni, mi: (ni, mi, 0)),
        compiler_params=pltpu.CompilerParams(
            dimension_semantics=("parallel", "parallel"),
            vmem_limit_bytes=32 * 1024 * 1024),
    )(xf, wmat, shift_row)

    # Drop padded rows / channels / garbage columns; back to NHWC.
    out = out[:, :m, :cout].reshape(n, ho, b, cout)[:, :, :wo, :]
    return out


# ---------------------------------------------------------------------------
# _PreConv forward (NCHW boundary, channel-last bf16 between blocks)
# ---------------------------------------------------------------------------
def pre_conv_forward(x_nchw, params, tile_m=512):
    x = jnp.transpose(x_nchw, (0, 2, 3, 1))      # NCHW -> NHWC (boundary only)
    strides = (2, 1, 1)
    last = len(params) - 1
    for i, (p, s) in enumerate(zip(params, strides)):
        x = conv3x3_bn_relu(
            x, p["w"], p["b"], p["gamma"], p["beta"], p["mean"], p["var"],
            stride=s, tile_m=tile_m,
            out_dtype=jnp.float32 if i == last else jnp.bfloat16)
    return jnp.transpose(x, (0, 3, 1, 2))        # NHWC -> NCHW


# ---------------------------------------------------------------------------
# Pure-JAX f32 reference (for validation)
# ---------------------------------------------------------------------------
def _reference_forward(x_nchw, params, eps=1e-5):
    strides = (2, 1, 1)
    x = x_nchw
    for p, s in zip(params, strides):
        y = jax.lax.conv_general_dilated(
            x, p["w"], window_strides=(s, s), padding=((1, 1), (1, 1)),
            dimension_numbers=("NCHW", "OIHW", "NCHW"))
        y = y + p["b"][None, :, None, None]
        # Dropout2d in eval mode: identity.
        y = (y - p["mean"][None, :, None, None]) / jnp.sqrt(
            p["var"][None, :, None, None] + eps)
        y = y * p["gamma"][None, :, None, None] + p["beta"][None, :, None, None]
        x = jnp.maximum(y, 0.0)
    return x


# ---------------------------------------------------------------------------
# Parameter init (deterministic, synthetic)
# ---------------------------------------------------------------------------
def make_params(key, in_channel, out_channel):
    params = []
    cins = (in_channel, out_channel, out_channel)
    for cin in cins:
        key, kw, kb, kg, kbe, km, kv = jax.random.split(key, 7)
        fan_in = cin * 9
        params.append(dict(
            w=jax.random.normal(kw, (out_channel, cin, 3, 3), jnp.float32)
              / jnp.sqrt(fan_in),
            b=jax.random.normal(kb, (out_channel,), jnp.float32) * 0.1,
            gamma=1.0 + 0.1 * jax.random.normal(kg, (out_channel,), jnp.float32),
            beta=0.1 * jax.random.normal(kbe, (out_channel,), jnp.float32),
            mean=0.1 * jax.random.normal(km, (out_channel,), jnp.float32),
            var=jnp.abs(jax.random.normal(kv, (out_channel,), jnp.float32)) + 0.5,
        ))
    return params


if __name__ == "__main__":
    key = jax.random.PRNGKey(0)
    k_x, k_p = jax.random.split(key)

    batch, in_channel, out_channel, spatial = 2, 4, 8, 16
    x = jax.random.normal(k_x, (batch, in_channel, spatial, spatial),
                          jnp.float32)
    params = make_params(k_p, in_channel, out_channel)

    fwd = jax.jit(functools.partial(pre_conv_forward, params=params))
    out = jax.block_until_ready(fwd(x))

    ref = _reference_forward(x, params)
    assert out.shape == (batch, out_channel, spatial // 2, spatial // 2), out.shape
    # bf16 matmul operands (f32 accumulate) across 3 stacked layers -> loosened
    # tolerance vs the f32 reference.
    assert jnp.allclose(out, ref, atol=7.5e-2, rtol=7.5e-2), \
        float(jnp.max(jnp.abs(out - ref)))

    print("KERNEL_OK")
</pallas_src>

<mosaic_0001>
module attributes {stable_mosaic.version = 11 : i64} {
  func.func @_conv_bn_relu_kernel(%arg0: i32, %arg1: i32, %arg2: memref<1x96x16xbf16, #tpu.memory_space<vmem>>, %arg3: memref<9x16x128xbf16, #tpu.memory_space<vmem>>, %arg4: memref<1x128xf32, #tpu.memory_space<vmem>>, %arg5: memref<1x80x128xbf16, #tpu.memory_space<vmem>>) attributes {dimension_semantics = [#tpu.dimension_semantics<parallel>, #tpu.dimension_semantics<parallel>], iteration_bounds = array<i64: 2, 1>, scalar_prefetch = 0 : i64, scratch_operands = 0 : i64, tpu.core_type = #tpu.core_type<tc>, window_params = [{transform_indices = @transform_0, window_bounds = array<i64: 1, 96, 16>}, {pipeline_mode = #tpu.pipeline_mode<synchronous>, transform_indices = @transform_1, window_bounds = array<i64: 9, 16, 128>}, {pipeline_mode = #tpu.pipeline_mode<synchronous>, transform_indices = @transform_2, window_bounds = array<i64: 1, 128>}, {transform_indices = @transform_3, window_bounds = array<i64: 1, 80, 128>}]} {
    %c0 = arith.constant 0 : index
    %c0_0 = arith.constant 0 : index
    %c0_1 = arith.constant 0 : index
    %0 = vector.load %arg2[%c0, %c0_0, %c0_1] : memref<1x96x16xbf16, #tpu.memory_space<vmem>>, vector<1x80x16xbf16>
    %1 = vector.shape_cast %0 : vector<1x80x16xbf16> to vector<80x16xbf16>
    %c0_2 = arith.constant 0 : index
    %c0_3 = arith.constant 0 : index
    %c0_4 = arith.constant 0 : index
    %2 = vector.load %arg3[%c0_2, %c0_3, %c0_4] : memref<9x16x128xbf16, #tpu.memory_space<vmem>>, vector<1x16x128xbf16>
    %3 = vector.shape_cast %2 : vector<1x16x128xbf16> to vector<16x128xbf16>
    %cst = arith.constant dense<0.000000e+00> : vector<80x128xf32>
    %4 = tpu.matmul %1, %3, %cst {dimension_numbers = #tpu.dot_dimension_numbers<[1], [0], [0], [1], [0, 0, 1, 1], [], []>} : vector<80x16xbf16>, vector<16x128xbf16>, vector<80x128xf32> -> vector<80x128xf32>
    %c0_5 = arith.constant 0 : index
    %c0_6 = arith.constant 0 : index
    %c0_7 = arith.constant 0 : index
    %5 = vector.load %arg2[%c0_5, %c0_6, %c0_7] : memref<1x96x16xbf16, #tpu.memory_space<vmem>>, vector<1x80x16xbf16>
    %6 = vector.shape_cast %5 : vector<1x80x16xbf16> to vector<80x16xbf16>
    %c1 = arith.constant 1 : index
    %c0_8 = arith.constant 0 : index
    %c0_9 = arith.constant 0 : index
    %7 = vector.load %arg3[%c1, %c0_8, %c0_9] : memref<9x16x128xbf16, #tpu.memory_space<vmem>>, vector<1x16x128xbf16>
    %8 = vector.shape_cast %7 : vector<1x16x128xbf16> to vector<16x128xbf16>
    %cst_10 = arith.constant dense<0.000000e+00> : vector<80x128xf32>
    %9 = tpu.matmul %6, %8, %cst_10 {dimension_numbers = #tpu.dot_dimension_numbers<[1], [0], [0], [1], [0, 0, 1, 1], [], []>} : vector<80x16xbf16>, vector<16x128xbf16>, vector<80x128xf32> -> vector<80x128xf32>
    %10 = arith.addf %4, %9 : vector<80x128xf32>
    %c0_11 = arith.constant 0 : index
    %c1_12 = arith.constant 1 : index
    %c0_13 = arith.constant 0 : index
    %11 = vector.load %arg2[%c0_11, %c1_12, %c0_13] : memref<1x96x16xbf16, #tpu.memory_space<vmem>>, vector<1x80x16xbf16>
    %12 = vector.shape_cast %11 : vector<1x80x16xbf16> to vector<80x16xbf16>
    %c2 = arith.constant 2 : index
    %c0_14 = arith.constant 0 : index
    %c0_15 = arith.constant 0 : index
    %13 = vector.load %arg3[%c2, %c0_14, %c0_15] : memref<9x16x128xbf16, #tpu.memory_space<vmem>>, vector<1x16x128xbf16>
    %14 = vector.shape_cast %13 : vector<1x16x128xbf16> to vector<16x128xbf16>
    %cst_16 = arith.constant dense<0.000000e+00> : vector<80x128xf32>
    %15 = tpu.matmul %12, %14, %cst_16 {dimension_numbers = #tpu.dot_dimension_numbers<[1], [0], [0], [1], [0, 0, 1, 1], [], []>} : vector<80x16xbf16>, vector<16x128xbf16>, vector<80x128xf32> -> vector<80x128xf32>
    %16 = arith.addf %10, %15 : vector<80x128xf32>
    %c0_17 = arith.constant 0 : index
    %c0_18 = arith.constant 0 : index
    %c0_19 = arith.constant 0 : index
    %17 = vector.load %arg2[%c0_17, %c0_18, %c0_19] : memref<1x96x16xbf16, #tpu.memory_space<vmem>>, vector<1x80x16xbf16>
    %18 = vector.shape_cast %17 : vector<1x80x16xbf16> to vector<80x16xbf16>
    %c3 = arith.constant 3 : index
    %c0_20 = arith.constant 0 : index
    %c0_21 = arith.constant 0 : index
    %19 = vector.load %arg3[%c3, %c0_20, %c0_21] : memref<9x16x128xbf16, #tpu.memory_space<vmem>>, vector<1x16x128xbf16>
    %20 = vector.shape_cast %19 : vector<1x16x128xbf16> to vector<16x128xbf16>
    %cst_22 = arith.constant dense<0.000000e+00> : vector<80x128xf32>
    %21 = tpu.matmul %18, %20, %cst_22 {dimension_numbers = #tpu.dot_dimension_numbers<[1], [0], [0], [1], [0, 0, 1, 1], [], []>} : vector<80x16xbf16>, vector<16x128xbf16>, vector<80x128xf32> -> vector<80x128xf32>
    %22 = arith.addf %16, %21 : vector<80x128xf32>
    %c0_23 = arith.constant 0 : index
    %c0_24 = arith.constant 0 : index
    %c0_25 = arith.constant 0 : index
    %23 = vector.load %arg2[%c0_23, %c0_24, %c0_25] : memref<1x96x16xbf16, #tpu.memory_space<vmem>>, vector<1x80x16xbf16>
    %24 = vector.shape_cast %23 : vector<1x80x16xbf16> to vector<80x16xbf16>
    %c4 = arith.constant 4 : index
    %c0_26 = arith.constant 0 : index
    %c0_27 = arith.constant 0 : index
    %25 = vector.load %arg3[%c4, %c0_26, %c0_27] : memref<9x16x128xbf16, #tpu.memory_space<vmem>>, vector<1x16x128xbf16>
    %26 = vector.shape_cast %25 : vector<1x16x128xbf16> to vector<16x128xbf16>
    %cst_28 = arith.constant dense<0.000000e+00> : vector<80x128xf32>
    %27 = tpu.matmul %24, %26, %cst_28 {dimension_numbers = #tpu.dot_dimension_numbers<[1], [0], [0], [1], [0, 0, 1, 1], [], []>} : vector<80x16xbf16>, vector<16x128xbf16>, vector<80x128xf32> -> vector<80x128xf32>
    %28 = arith.addf %22, %27 : vector<80x128xf32>
    %c0_29 = arith.constant 0 : index
    %c1_30 = arith.constant 1 : index
    %c0_31 = arith.constant 0 : index
    %29 = vector.load %arg2[%c0_29, %c1_30, %c0_31] : memref<1x96x16xbf16, #tpu.memory_space<vmem>>, vector<1x80x16xbf16>
    %30 = vector.shape_cast %29 : vector<1x80x16xbf16> to vector<80x16xbf16>
    %c5 = arith.constant 5 : index
    %c0_32 = arith.constant 0 : index
    %c0_33 = arith.constant 0 : index
    %31 = vector.load %arg3[%c5, %c0_32, %c0_33] : memref<9x16x128xbf16, #tpu.memory_space<vmem>>, vector<1x16x128xbf16>
    %32 = vector.shape_cast %31 : vector<1x16x128xbf16> to vector<16x128xbf16>
    %cst_34 = arith.constant dense<0.000000e+00> : vector<80x128xf32>
    %33 = tpu.matmul %30, %32, %cst_34 {dimension_numbers = #tpu.dot_dimension_numbers<[1], [0], [0], [1], [0, 0, 1, 1], [], []>} : vector<80x16xbf16>, vector<16x128xbf16>, vector<80x128xf32> -> vector<80x128xf32>
    %34 = arith.addf %28, %33 : vector<80x128xf32>
    %c0_35 = arith.constant 0 : index
    %c9 = arith.constant 9 : index
    %c0_36 = arith.constant 0 : index
    %35 = vector.load %arg2[%c0_35, %c9, %c0_36] : memref<1x96x16xbf16, #tpu.memory_space<vmem>>, vector<1x80x16xbf16>
    %36 = vector.shape_cast %35 : vector<1x80x16xbf16> to vector<80x16xbf16>
    %c6 = arith.constant 6 : index
    %c0_37 = arith.constant 0 : index
    %c0_38 = arith.constant 0 : index
    %37 = vector.load %arg3[%c6, %c0_37, %c0_38] : memref<9x16x128xbf16, #tpu.memory_space<vmem>>, vector<1x16x128xbf16>
    %38 = vector.shape_cast %37 : vector<1x16x128xbf16> to vector<16x128xbf16>
    %cst_39 = arith.constant dense<0.000000e+00> : vector<80x128xf32>
    %39 = tpu.matmul %36, %38, %cst_39 {dimension_numbers = #tpu.dot_dimension_numbers<[1], [0], [0], [1], [0, 0, 1, 1], [], []>} : vector<80x16xbf16>, vector<16x128xbf16>, vector<80x128xf32> -> vector<80x128xf32>
    %40 = arith.addf %34, %39 : vector<80x128xf32>
    %c0_40 = arith.constant 0 : index
    %c9_41 = arith.constant 9 : index
    %c0_42 = arith.constant 0 : index
    %41 = vector.load %arg2[%c0_40, %c9_41, %c0_42] : memref<1x96x16xbf16, #tpu.memory_space<vmem>>, vector<1x80x16xbf16>
    %42 = vector.shape_cast %41 : vector<1x80x16xbf16> to vector<80x16xbf16>
    %c7 = arith.constant 7 : index
    %c0_43 = arith.constant 0 : index
    %c0_44 = arith.constant 0 : index
    %43 = vector.load %arg3[%c7, %c0_43, %c0_44] : memref<9x16x128xbf16, #tpu.memory_space<vmem>>, vector<1x16x128xbf16>
    %44 = vector.shape_cast %43 : vector<1x16x128xbf16> to vector<16x128xbf16>
    %cst_45 = arith.constant dense<0.000000e+00> : vector<80x128xf32>
    %45 = tpu.matmul %42, %44, %cst_45 {dimension_numbers = #tpu.dot_dimension_numbers<[1], [0], [0], [1], [0, 0, 1, 1], [], []>} : vector<80x16xbf16>, vector<16x128xbf16>, vector<80x128xf32> -> vector<80x128xf32>
    %46 = arith.addf %40, %45 : vector<80x128xf32>
    %c0_46 = arith.constant 0 : index
    %c10 = arith.constant 10 : index
    %c0_47 = arith.constant 0 : index
    %47 = vector.load %arg2[%c0_46, %c10, %c0_47] : memref<1x96x16xbf16, #tpu.memory_space<vmem>>, vector<1x80x16xbf16>
    %48 = vector.shape_cast %47 : vector<1x80x16xbf16> to vector<80x16xbf16>
    %c8 = arith.constant 8 : index
    %c0_48 = arith.constant 0 : index
    %c0_49 = arith.constant 0 : index
    %49 = vector.load %arg3[%c8, %c0_48, %c0_49] : memref<9x16x128xbf16, #tpu.memory_space<vmem>>, vector<1x16x128xbf16>
    %50 = vector.shape_cast %49 : vector<1x16x128xbf16> to vector<16x128xbf16>
    %cst_50 = arith.constant dense<0.000000e+00> : vector<80x128xf32>
    %51 = tpu.matmul %48, %50, %cst_50 {dimension_numbers = #tpu.dot_dimension_numbers<[1], [0], [0], [1], [0, 0, 1, 1], [], []>} : vector<80x16xbf16>, vector<16x128xbf16>, vector<80x128xf32> -> vector<80x128xf32>
    %52 = arith.addf %46, %51 : vector<80x128xf32>
    %c0_51 = arith.constant 0 : index
    %c0_52 = arith.constant 0 : index
    %53 = vector.load %arg4[%c0_51, %c0_52] : memref<1x128xf32, #tpu.memory_space<vmem>>, vector<1x128xf32>
    %54 = vector.broadcast %53 : vector<1x128xf32> to vector<80x128xf32>
    %55 = arith.addf %52, %54 : vector<80x128xf32>
    %cst_53 = arith.constant 0.000000e+00 : f32
    %56 = vector.broadcast %cst_53 : f32 to vector<80x128xf32>
    %57 = arith.maximumf %55, %56 : vector<80x128xf32>
    %58 = arith.truncf %57 : vector<80x128xf32> to vector<80x128xbf16>
    %c0_54 = arith.constant 0 : index
    %c0_55 = arith.constant 0 : index
    %c0_56 = arith.constant 0 : index
    %59 = vector.load %arg5[%c0_54, %c0_55, %c0_56] : memref<1x80x128xbf16, #tpu.memory_space<vmem>>, vector<1x80x128xbf16>
    %60 = vector.shape_cast %59 : vector<1x80x128xbf16> to vector<80x128xbf16>
    %61 = vector.shape_cast %58 : vector<80x128xbf16> to vector<1x80x128xbf16>
    tpu.vector_store %arg5[%c0_54, %c0_55, %c0_56], %61 {strides = array<i32>} : memref<1x80x128xbf16, #tpu.memory_space<vmem>>, vector<1x80x128xbf16>,
    return
  }
  func.func @transform_0(%arg0: i32, %arg1: i32) -> (i32, i32, i32) {
    %c0_i32 = arith.constant 0 : i32
    %c0_i32_0 = arith.constant 0 : i32
    %c0_i32_1 = arith.constant 0 : i32
    return %arg0, %c0_i32, %c0_i32_0 : i32, i32, i32
  }
  func.func @transform_1(%arg0: i32, %arg1: i32) -> (i32, i32, i32) {
    %c0_i32 = arith.constant 0 : i32
    %c0_i32_0 = arith.constant 0 : i32
    %c0_i32_1 = arith.constant 0 : i32
    %c0_i32_2 = arith.constant 0 : i32
    return %c0_i32, %c0_i32_0, %c0_i32_1 : i32, i32, i32
  }
  func.func @transform_2(%arg0: i32, %arg1: i32) -> (i32, i32) {
    %c0_i32 = arith.constant 0 : i32
    %c0_i32_0 = arith.constant 0 : i32
    %c0_i32_1 = arith.constant 0 : i32
    return %c0_i32, %c0_i32_0 : i32, i32
  }
  func.func @transform_3(%arg0: i32, %arg1: i32) -> (i32, i32, i32) {
    %c0_i32 = arith.constant 0 : i32
    %c0_i32_0 = arith.constant 0 : i32
    return %arg0, %arg1, %c0_i32 : i32, i32, i32
  }
}

module attributes {stable_mosaic.version = 11 : i64} {
  func.func @_conv_bn_relu_kernel(%arg0: i32, %arg1: i32, %arg2: memref<1x112x8xbf16, #tpu.memory_space<vmem>>, %arg3: memref<9x8x128xbf16, #tpu.memory_space<vmem>>, %arg4: memref<1x128xf32, #tpu.memory_space<vmem>>, %arg5: memref<1x80x128xbf16, #tpu.memory_space<vmem>>) attributes {dimension_semantics = [#tpu.dimension_semantics<parallel>, #tpu.dimension_semantics<parallel>], iteration_bounds = array<i64: 2, 1>, scalar_prefetch = 0 : i64, scratch_operands = 0 : i64, tpu.core_type = #tpu.core_type<tc>, window_params = [{transform_indices = @transform_0, window_bounds = array<i64: 1, 112, 8>}, {pipeline_mode = #tpu.pipeline_mode<synchronous>, transform_indices = @transform_1, window_bounds = array<i64: 9, 8, 128>}, {pipeline_mode = #tpu.pipeline_mode<synchronous>, transform_indices = @transform_2, window_bounds = array<i64: 1, 128>}, {transform_indices = @transform_3, window_bounds = array<i64: 1, 80, 128>}]} {
    %c0 = arith.constant 0 : index
    %c0_0 = arith.constant 0 : index
    %c0_1 = arith.constant 0 : index
    %0 = vector.load %arg2[%c0, %c0_0, %c0_1] : memref<1x112x8xbf16, #tpu.memory_space<vmem>>, vector<1x80x8xbf16>
    %1 = vector.shape_cast %0 : vector<1x80x8xbf16> to vector<80x8xbf16>
    %c0_2 = arith.constant 0 : index
    %c0_3 = arith.constant 0 : index
    %c0_4 = arith.constant 0 : index
    %2 = vector.load %arg3[%c0_2, %c0_3, %c0_4] : memref<9x8x128xbf16, #tpu.memory_space<vmem>>, vector<1x8x128xbf16>
    %3 = vector.shape_cast %2 : vector<1x8x128xbf16> to vector<8x128xbf16>
    %cst = arith.constant dense<0.000000e+00> : vector<80x128xf32>
    %4 = tpu.matmul %1, %3, %cst {dimension_numbers = #tpu.dot_dimension_numbers<[1], [0], [0], [1], [0, 0, 1, 1], [], []>} : vector<80x8xbf16>, vector<8x128xbf16>, vector<80x128xf32> -> vector<80x128xf32>
    %c0_5 = arith.constant 0 : index
    %c1 = arith.constant 1 : index
    %c0_6 = arith.constant 0 : index
    %5 = vector.load %arg2[%c0_5, %c1, %c0_6] : memref<1x112x8xbf16, #tpu.memory_space<vmem>>, vector<1x80x8xbf16>
    %6 = vector.shape_cast %5 : vector<1x80x8xbf16> to vector<80x8xbf16>
    %c1_7 = arith.constant 1 : index
    %c0_8 = arith.constant 0 : index
    %c0_9 = arith.constant 0 : index
    %7 = vector.load %arg3[%c1_7, %c0_8, %c0_9] : memref<9x8x128xbf16, #tpu.memory_space<vmem>>, vector<1x8x128xbf16>
    %8 = vector.shape_cast %7 : vector<1x8x128xbf16> to vector<8x128xbf16>
    %cst_10 = arith.constant dense<0.000000e+00> : vector<80x128xf32>
    %9 = tpu.matmul %6, %8, %cst_10 {dimension_numbers = #tpu.dot_dimension_numbers<[1], [0], [0], [1], [0, 0, 1, 1], [], []>} : vector<80x8xbf16>, vector<8x128xbf16>, vector<80x128xf32> -> vector<80x128xf32>
    %10 = arith.addf %4, %9 : vector<80x128xf32>
    %c0_11 = arith.constant 0 : index
    %c2 = arith.constant 2 : index
    %c0_12 = arith.constant 0 : index
    %11 = vector.load %arg2[%c0_11, %c2, %c0_12] : memref<1x112x8xbf16, #tpu.memory_space<vmem>>, vector<1x80x8xbf16>
    %12 = vector.shape_cast %11 : vector<1x80x8xbf16> to vector<80x8xbf16>
    %c2_13 = arith.constant 2 : index
    %c0_14 = arith.constant 0 : index
    %c0_15 = arith.constant 0 : index
    %13 = vector.load %arg3[%c2_13, %c0_14, %c0_15] : memref<9x8x128xbf16, #tpu.memory_space<vmem>>, vector<1x8x128xbf16>
    %14 = vector.shape_cast %13 : vector<1x8x128xbf16> to vector<8x128xbf16>
    %cst_16 = arith.constant dense<0.000000e+00> : vector<80x128xf32>
    %15 = tpu.matmul %12, %14, %cst_16 {dimension_numbers = #tpu.dot_dimension_numbers<[1], [0], [0], [1], [0, 0, 1, 1], [], []>} : vector<80x8xbf16>, vector<8x128xbf16>, vector<80x128xf32> -> vector<80x128xf32>
    %16 = arith.addf %10, %15 : vector<80x128xf32>
    %c0_17 = arith.constant 0 : index
    %c10 = arith.constant 10 : index
    %c0_18 = arith.constant 0 : index
    %17 = vector.load %arg2[%c0_17, %c10, %c0_18] : memref<1x112x8xbf16, #tpu.memory_space<vmem>>, vector<1x80x8xbf16>
    %18 = vector.shape_cast %17 : vector<1x80x8xbf16> to vector<80x8xbf16>
    %c3 = arith.constant 3 : index
    %c0_19 = arith.constant 0 : index
    %c0_20 = arith.constant 0 : index
    %19 = vector.load %arg3[%c3, %c0_19, %c0_20] : memref<9x8x128xbf16, #tpu.memory_space<vmem>>, vector<1x8x128xbf16>
    %20 = vector.shape_cast %19 : vector<1x8x128xbf16> to vector<8x128xbf16>
    %cst_21 = arith.constant dense<0.000000e+00> : vector<80x128xf32>
    %21 = tpu.matmul %18, %20, %cst_21 {dimension_numbers = #tpu.dot_dimension_numbers<[1], [0], [0], [1], [0, 0, 1, 1], [], []>} : vector<80x8xbf16>, vector<8x128xbf16>, vector<80x128xf32> -> vector<80x128xf32>
    %22 = arith.addf %16, %21 : vector<80x128xf32>
    %c0_22 = arith.constant 0 : index
    %c11 = arith.constant 11 : index
    %c0_23 = arith.constant 0 : index
    %23 = vector.load %arg2[%c0_22, %c11, %c0_23] : memref<1x112x8xbf16, #tpu.memory_space<vmem>>, vector<1x80x8xbf16>
    %24 = vector.shape_cast %23 : vector<1x80x8xbf16> to vector<80x8xbf16>
    %c4 = arith.constant 4 : index
    %c0_24 = arith.constant 0 : index
    %c0_25 = arith.constant 0 : index
    %25 = vector.load %arg3[%c4, %c0_24, %c0_25] : memref<9x8x128xbf16, #tpu.memory_space<vmem>>, vector<1x8x128xbf16>
    %26 = vector.shape_cast %25 : vector<1x8x128xbf16> to vector<8x128xbf16>
    %cst_26 = arith.constant dense<0.000000e+00> : vector<80x128xf32>
    %27 = tpu.matmul %24, %26, %cst_26 {dimension_numbers = #tpu.dot_dimension_numbers<[1], [0], [0], [1], [0, 0, 1, 1], [], []>} : vector<80x8xbf16>, vector<8x128xbf16>, vector<80x128xf32> -> vector<80x128xf32>
    %28 = arith.addf %22, %27 : vector<80x128xf32>
    %c0_27 = arith.constant 0 : index
    %c12 = arith.constant 12 : index
    %c0_28 = arith.constant 0 : index
    %29 = vector.load %arg2[%c0_27, %c12, %c0_28] : memref<1x112x8xbf16, #tpu.memory_space<vmem>>, vector<1x80x8xbf16>
    %30 = vector.shape_cast %29 : vector<1x80x8xbf16> to vector<80x8xbf16>
    %c5 = arith.constant 5 : index
    %c0_29 = arith.constant 0 : index
    %c0_30 = arith.constant 0 : index
    %31 = vector.load %arg3[%c5, %c0_29, %c0_30] : memref<9x8x128xbf16, #tpu.memory_space<vmem>>, vector<1x8x128xbf16>
    %32 = vector.shape_cast %31 : vector<1x8x128xbf16> to vector<8x128xbf16>
    %cst_31 = arith.constant dense<0.000000e+00> : vector<80x128xf32>
    %33 = tpu.matmul %30, %32, %cst_31 {dimension_numbers = #tpu.dot_dimension_numbers<[1], [0], [0], [1], [0, 0, 1, 1], [], []>} : vector<80x8xbf16>, vector<8x128xbf16>, vector<80x128xf32> -> vector<80x128xf32>
    %34 = arith.addf %28, %33 : vector<80x128xf32>
    %c0_32 = arith.constant 0 : index
    %c20 = arith.constant 20 : index
    %c0_33 = arith.constant 0 : index
    %35 = vector.load %arg2[%c0_32, %c20, %c0_33] : memref<1x112x8xbf16, #tpu.memory_space<vmem>>, vector<1x80x8xbf16>
    %36 = vector.shape_cast %35 : vector<1x80x8xbf16> to vector<80x8xbf16>
    %c6 = arith.constant 6 : index
    %c0_34 = arith.constant 0 : index
    %c0_35 = arith.constant 0 : index
    %37 = vector.load %arg3[%c6, %c0_34, %c0_35] : memref<9x8x128xbf16, #tpu.memory_space<vmem>>, vector<1x8x128xbf16>
    %38 = vector.shape_cast %37 : vector<1x8x128xbf16> to vector<8x128xbf16>
    %cst_36 = arith.constant dense<0.000000e+00> : vector<80x128xf32>
    %39 = tpu.matmul %36, %38, %cst_36 {dimension_numbers = #tpu.dot_dimension_numbers<[1], [0], [0], [1], [0, 0, 1, 1], [], []>} : vector<80x8xbf16>, vector<8x128xbf16>, vector<80x128xf32> -> vector<80x128xf32>
    %40 = arith.addf %34, %39 : vector<80x128xf32>
    %c0_37 = arith.constant 0 : index
    %c21 = arith.constant 21 : index
    %c0_38 = arith.constant 0 : index
    %41 = vector.load %arg2[%c0_37, %c21, %c0_38] : memref<1x112x8xbf16, #tpu.memory_space<vmem>>, vector<1x80x8xbf16>
    %42 = vector.shape_cast %41 : vector<1x80x8xbf16> to vector<80x8xbf16>
    %c7 = arith.constant 7 : index
    %c0_39 = arith.constant 0 : index
    %c0_40 = arith.constant 0 : index
    %43 = vector.load %arg3[%c7, %c0_39, %c0_40] : memref<9x8x128xbf16, #tpu.memory_space<vmem>>, vector<1x8x128xbf16>
    %44 = vector.shape_cast %43 : vector<1x8x128xbf16> to vector<8x128xbf16>
    %cst_41 = arith.constant dense<0.000000e+00> : vector<80x128xf32>
    %45 = tpu.matmul %42, %44, %cst_41 {dimension_numbers = #tpu.dot_dimension_numbers<[1], [0], [0], [1], [0, 0, 1, 1], [], []>} : vector<80x8xbf16>, vector<8x128xbf16>, vector<80x128xf32> -> vector<80x128xf32>
    %46 = arith.addf %40, %45 : vector<80x128xf32>
    %c0_42 = arith.constant 0 : index
    %c22 = arith.constant 22 : index
    %c0_43 = arith.constant 0 : index
    %47 = vector.load %arg2[%c0_42, %c22, %c0_43] : memref<1x112x8xbf16, #tpu.memory_space<vmem>>, vector<1x80x8xbf16>
    %48 = vector.shape_cast %47 : vector<1x80x8xbf16> to vector<80x8xbf16>
    %c8 = arith.constant 8 : index
    %c0_44 = arith.constant 0 : index
    %c0_45 = arith.constant 0 : index
    %49 = vector.load %arg3[%c8, %c0_44, %c0_45] : memref<9x8x128xbf16, #tpu.memory_space<vmem>>, vector<1x8x128xbf16>
    %50 = vector.shape_cast %49 : vector<1x8x128xbf16> to vector<8x128xbf16>
    %cst_46 = arith.constant dense<0.000000e+00> : vector<80x128xf32>
    %51 = tpu.matmul %48, %50, %cst_46 {dimension_numbers = #tpu.dot_dimension_numbers<[1], [0], [0], [1], [0, 0, 1, 1], [], []>} : vector<80x8xbf16>, vector<8x128xbf16>, vector<80x128xf32> -> vector<80x128xf32>
    %52 = arith.addf %46, %51 : vector<80x128xf32>
    %c0_47 = arith.constant 0 : index
    %c0_48 = arith.constant 0 : index
    %53 = vector.load %arg4[%c0_47, %c0_48] : memref<1x128xf32, #tpu.memory_space<vmem>>, vector<1x128xf32>
    %54 = vector.broadcast %53 : vector<1x128xf32> to vector<80x128xf32>
    %55 = arith.addf %52, %54 : vector<80x128xf32>
    %cst_49 = arith.constant 0.000000e+00 : f32
    %56 = vector.broadcast %cst_49 : f32 to vector<80x128xf32>
    %57 = arith.maximumf %55, %56 : vector<80x128xf32>
    %58 = arith.truncf %57 : vector<80x128xf32> to vector<80x128xbf16>
    %c0_50 = arith.constant 0 : index
    %c0_51 = arith.constant 0 : index
    %c0_52 = arith.constant 0 : index
    %59 = vector.load %arg5[%c0_50, %c0_51, %c0_52] : memref<1x80x128xbf16, #tpu.memory_space<vmem>>, vector<1x80x128xbf16>
    %60 = vector.shape_cast %59 : vector<1x80x128xbf16> to vector<80x128xbf16>
    %61 = vector.shape_cast %58 : vector<80x128xbf16> to vector<1x80x128xbf16>
    tpu.vector_store %arg5[%c0_50, %c0_51, %c0_52], %61 {strides = array<i32>} : memref<1x80x128xbf16, #tpu.memory_space<vmem>>, vector<1x80x128xbf16>,
    return
  }
  func.func @transform_0(%arg0: i32, %arg1: i32) -> (i32, i32, i32) {
    %c0_i32 = arith.constant 0 : i32
    %c0_i32_0 = arith.constant 0 : i32
    %c0_i32_1 = arith.constant 0 : i32
    return %arg0, %c0_i32, %c0_i32_0 : i32, i32, i32
  }
  func.func @transform_1(%arg0: i32, %arg1: i32) -> (i32, i32, i32) {
    %c0_i32 = arith.constant 0 : i32
    %c0_i32_0 = arith.constant 0 : i32
    %c0_i32_1 = arith.constant 0 : i32
    %c0_i32_2 = arith.constant 0 : i32
    return %c0_i32, %c0_i32_0, %c0_i32_1 : i32, i32, i32
  }
  func.func @transform_2(%arg0: i32, %arg1: i32) -> (i32, i32) {
    %c0_i32 = arith.constant 0 : i32
    %c0_i32_0 = arith.constant 0 : i32
    %c0_i32_1 = arith.constant 0 : i32
    return %c0_i32, %c0_i32_0 : i32, i32
  }
  func.func @transform_3(%arg0: i32, %arg1: i32) -> (i32, i32, i32) {
    %c0_i32 = arith.constant 0 : i32
    %c0_i32_0 = arith.constant 0 : i32
    return %arg0, %arg1, %c0_i32 : i32, i32, i32
  }
}

module attributes {stable_mosaic.version = 11 : i64} {
  func.func @_conv_bn_relu_kernel(%arg0: i32, %arg1: i32, %arg2: memref<1x112x8xbf16, #tpu.memory_space<vmem>>, %arg3: memref<9x8x128xbf16, #tpu.memory_space<vmem>>, %arg4: memref<1x128xf32, #tpu.memory_space<vmem>>, %arg5: memref<1x80x128xf32, #tpu.memory_space<vmem>>) attributes {dimension_semantics = [#tpu.dimension_semantics<parallel>, #tpu.dimension_semantics<parallel>], iteration_bounds = array<i64: 2, 1>, scalar_prefetch = 0 : i64, scratch_operands = 0 : i64, tpu.core_type = #tpu.core_type<tc>, window_params = [{transform_indices = @transform_0, window_bounds = array<i64: 1, 112, 8>}, {pipeline_mode = #tpu.pipeline_mode<synchronous>, transform_indices = @transform_1, window_bounds = array<i64: 9, 8, 128>}, {pipeline_mode = #tpu.pipeline_mode<synchronous>, transform_indices = @transform_2, window_bounds = array<i64: 1, 128>}, {transform_indices = @transform_3, window_bounds = array<i64: 1, 80, 128>}]} {
    %c0 = arith.constant 0 : index
    %c0_0 = arith.constant 0 : index
    %c0_1 = arith.constant 0 : index
    %0 = vector.load %arg2[%c0, %c0_0, %c0_1] : memref<1x112x8xbf16, #tpu.memory_space<vmem>>, vector<1x80x8xbf16>
    %1 = vector.shape_cast %0 : vector<1x80x8xbf16> to vector<80x8xbf16>
    %c0_2 = arith.constant 0 : index
    %c0_3 = arith.constant 0 : index
    %c0_4 = arith.constant 0 : index
    %2 = vector.load %arg3[%c0_2, %c0_3, %c0_4] : memref<9x8x128xbf16, #tpu.memory_space<vmem>>, vector<1x8x128xbf16>
    %3 = vector.shape_cast %2 : vector<1x8x128xbf16> to vector<8x128xbf16>
    %cst = arith.constant dense<0.000000e+00> : vector<80x128xf32>
    %4 = tpu.matmul %1, %3, %cst {dimension_numbers = #tpu.dot_dimension_numbers<[1], [0], [0], [1], [0, 0, 1, 1], [], []>} : vector<80x8xbf16>, vector<8x128xbf16>, vector<80x128xf32> -> vector<80x128xf32>
    %c0_5 = arith.constant 0 : index
    %c1 = arith.constant 1 : index
    %c0_6 = arith.constant 0 : index
    %5 = vector.load %arg2[%c0_5, %c1, %c0_6] : memref<1x112x8xbf16, #tpu.memory_space<vmem>>, vector<1x80x8xbf16>
    %6 = vector.shape_cast %5 : vector<1x80x8xbf16> to vector<80x8xbf16>
    %c1_7 = arith.constant 1 : index
    %c0_8 = arith.constant 0 : index
    %c0_9 = arith.constant 0 : index
    %7 = vector.load %arg3[%c1_7, %c0_8, %c0_9] : memref<9x8x128xbf16, #tpu.memory_space<vmem>>, vector<1x8x128xbf16>
    %8 = vector.shape_cast %7 : vector<1x8x128xbf16> to vector<8x128xbf16>
    %cst_10 = arith.constant dense<0.000000e+00> : vector<80x128xf32>
    %9 = tpu.matmul %6, %8, %cst_10 {dimension_numbers = #tpu.dot_dimension_numbers<[1], [0], [0], [1], [0, 0, 1, 1], [], []>} : vector<80x8xbf16>, vector<8x128xbf16>, vector<80x128xf32> -> vector<80x128xf32>
    %10 = arith.addf %4, %9 : vector<80x128xf32>
    %c0_11 = arith.constant 0 : index
    %c2 = arith.constant 2 : index
    %c0_12 = arith.constant 0 : index
    %11 = vector.load %arg2[%c0_11, %c2, %c0_12] : memref<1x112x8xbf16, #tpu.memory_space<vmem>>, vector<1x80x8xbf16>
    %12 = vector.shape_cast %11 : vector<1x80x8xbf16> to vector<80x8xbf16>
    %c2_13 = arith.constant 2 : index
    %c0_14 = arith.constant 0 : index
    %c0_15 = arith.constant 0 : index
    %13 = vector.load %arg3[%c2_13, %c0_14, %c0_15] : memref<9x8x128xbf16, #tpu.memory_space<vmem>>, vector<1x8x128xbf16>
    %14 = vector.shape_cast %13 : vector<1x8x128xbf16> to vector<8x128xbf16>
    %cst_16 = arith.constant dense<0.000000e+00> : vector<80x128xf32>
    %15 = tpu.matmul %12, %14, %cst_16 {dimension_numbers = #tpu.dot_dimension_numbers<[1], [0], [0], [1], [0, 0, 1, 1], [], []>} : vector<80x8xbf16>, vector<8x128xbf16>, vector<80x128xf32> -> vector<80x128xf32>
    %16 = arith.addf %10, %15 : vector<80x128xf32>
    %c0_17 = arith.constant 0 : index
    %c10 = arith.constant 10 : index
    %c0_18 = arith.constant 0 : index
    %17 = vector.load %arg2[%c0_17, %c10, %c0_18] : memref<1x112x8xbf16, #tpu.memory_space<vmem>>, vector<1x80x8xbf16>
    %18 = vector.shape_cast %17 : vector<1x80x8xbf16> to vector<80x8xbf16>
    %c3 = arith.constant 3 : index
    %c0_19 = arith.constant 0 : index
    %c0_20 = arith.constant 0 : index
    %19 = vector.load %arg3[%c3, %c0_19, %c0_20] : memref<9x8x128xbf16, #tpu.memory_space<vmem>>, vector<1x8x128xbf16>
    %20 = vector.shape_cast %19 : vector<1x8x128xbf16> to vector<8x128xbf16>
    %cst_21 = arith.constant dense<0.000000e+00> : vector<80x128xf32>
    %21 = tpu.matmul %18, %20, %cst_21 {dimension_numbers = #tpu.dot_dimension_numbers<[1], [0], [0], [1], [0, 0, 1, 1], [], []>} : vector<80x8xbf16>, vector<8x128xbf16>, vector<80x128xf32> -> vector<80x128xf32>
    %22 = arith.addf %16, %21 : vector<80x128xf32>
    %c0_22 = arith.constant 0 : index
    %c11 = arith.constant 11 : index
    %c0_23 = arith.constant 0 : index
    %23 = vector.load %arg2[%c0_22, %c11, %c0_23] : memref<1x112x8xbf16, #tpu.memory_space<vmem>>, vector<1x80x8xbf16>
    %24 = vector.shape_cast %23 : vector<1x80x8xbf16> to vector<80x8xbf16>
    %c4 = arith.constant 4 : index
    %c0_24 = arith.constant 0 : index
    %c0_25 = arith.constant 0 : index
    %25 = vector.load %arg3[%c4, %c0_24, %c0_25] : memref<9x8x128xbf16, #tpu.memory_space<vmem>>, vector<1x8x128xbf16>
    %26 = vector.shape_cast %25 : vector<1x8x128xbf16> to vector<8x128xbf16>
    %cst_26 = arith.constant dense<0.000000e+00> : vector<80x128xf32>
    %27 = tpu.matmul %24, %26, %cst_26 {dimension_numbers = #tpu.dot_dimension_numbers<[1], [0], [0], [1], [0, 0, 1, 1], [], []>} : vector<80x8xbf16>, vector<8x128xbf16>, vector<80x128xf32> -> vector<80x128xf32>
    %28 = arith.addf %22, %27 : vector<80x128xf32>
    %c0_27 = arith.constant 0 : index
    %c12 = arith.constant 12 : index
    %c0_28 = arith.constant 0 : index
    %29 = vector.load %arg2[%c0_27, %c12, %c0_28] : memref<1x112x8xbf16, #tpu.memory_space<vmem>>, vector<1x80x8xbf16>
    %30 = vector.shape_cast %29 : vector<1x80x8xbf16> to vector<80x8xbf16>
    %c5 = arith.constant 5 : index
    %c0_29 = arith.constant 0 : index
    %c0_30 = arith.constant 0 : index
    %31 = vector.load %arg3[%c5, %c0_29, %c0_30] : memref<9x8x128xbf16, #tpu.memory_space<vmem>>, vector<1x8x128xbf16>
    %32 = vector.shape_cast %31 : vector<1x8x128xbf16> to vector<8x128xbf16>
    %cst_31 = arith.constant dense<0.000000e+00> : vector<80x128xf32>
    %33 = tpu.matmul %30, %32, %cst_31 {dimension_numbers = #tpu.dot_dimension_numbers<[1], [0], [0], [1], [0, 0, 1, 1], [], []>} : vector<80x8xbf16>, vector<8x128xbf16>, vector<80x128xf32> -> vector<80x128xf32>
    %34 = arith.addf %28, %33 : vector<80x128xf32>
    %c0_32 = arith.constant 0 : index
    %c20 = arith.constant 20 : index
    %c0_33 = arith.constant 0 : index
    %35 = vector.load %arg2[%c0_32, %c20, %c0_33] : memref<1x112x8xbf16, #tpu.memory_space<vmem>>, vector<1x80x8xbf16>
    %36 = vector.shape_cast %35 : vector<1x80x8xbf16> to vector<80x8xbf16>
    %c6 = arith.constant 6 : index
    %c0_34 = arith.constant 0 : index
    %c0_35 = arith.constant 0 : index
    %37 = vector.load %arg3[%c6, %c0_34, %c0_35] : memref<9x8x128xbf16, #tpu.memory_space<vmem>>, vector<1x8x128xbf16>
    %38 = vector.shape_cast %37 : vector<1x8x128xbf16> to vector<8x128xbf16>
    %cst_36 = arith.constant dense<0.000000e+00> : vector<80x128xf32>
    %39 = tpu.matmul %36, %38, %cst_36 {dimension_numbers = #tpu.dot_dimension_numbers<[1], [0], [0], [1], [0, 0, 1, 1], [], []>} : vector<80x8xbf16>, vector<8x128xbf16>, vector<80x128xf32> -> vector<80x128xf32>
    %40 = arith.addf %34, %39 : vector<80x128xf32>
    %c0_37 = arith.constant 0 : index
    %c21 = arith.constant 21 : index
    %c0_38 = arith.constant 0 : index
    %41 = vector.load %arg2[%c0_37, %c21, %c0_38] : memref<1x112x8xbf16, #tpu.memory_space<vmem>>, vector<1x80x8xbf16>
    %42 = vector.shape_cast %41 : vector<1x80x8xbf16> to vector<80x8xbf16>
    %c7 = arith.constant 7 : index
    %c0_39 = arith.constant 0 : index
    %c0_40 = arith.constant 0 : index
    %43 = vector.load %arg3[%c7, %c0_39, %c0_40] : memref<9x8x128xbf16, #tpu.memory_space<vmem>>, vector<1x8x128xbf16>
    %44 = vector.shape_cast %43 : vector<1x8x128xbf16> to vector<8x128xbf16>
    %cst_41 = arith.constant dense<0.000000e+00> : vector<80x128xf32>
    %45 = tpu.matmul %42, %44, %cst_41 {dimension_numbers = #tpu.dot_dimension_numbers<[1], [0], [0], [1], [0, 0, 1, 1], [], []>} : vector<80x8xbf16>, vector<8x128xbf16>, vector<80x128xf32> -> vector<80x128xf32>
    %46 = arith.addf %40, %45 : vector<80x128xf32>
    %c0_42 = arith.constant 0 : index
    %c22 = arith.constant 22 : index
    %c0_43 = arith.constant 0 : index
    %47 = vector.load %arg2[%c0_42, %c22, %c0_43] : memref<1x112x8xbf16, #tpu.memory_space<vmem>>, vector<1x80x8xbf16>
    %48 = vector.shape_cast %47 : vector<1x80x8xbf16> to vector<80x8xbf16>
    %c8 = arith.constant 8 : index
    %c0_44 = arith.constant 0 : index
    %c0_45 = arith.constant 0 : index
    %49 = vector.load %arg3[%c8, %c0_44, %c0_45] : memref<9x8x128xbf16, #tpu.memory_space<vmem>>, vector<1x8x128xbf16>
    %50 = vector.shape_cast %49 : vector<1x8x128xbf16> to vector<8x128xbf16>
    %cst_46 = arith.constant dense<0.000000e+00> : vector<80x128xf32>
    %51 = tpu.matmul %48, %50, %cst_46 {dimension_numbers = #tpu.dot_dimension_numbers<[1], [0], [0], [1], [0, 0, 1, 1], [], []>} : vector<80x8xbf16>, vector<8x128xbf16>, vector<80x128xf32> -> vector<80x128xf32>
    %52 = arith.addf %46, %51 : vector<80x128xf32>
    %c0_47 = arith.constant 0 : index
    %c0_48 = arith.constant 0 : index
    %53 = vector.load %arg4[%c0_47, %c0_48] : memref<1x128xf32, #tpu.memory_space<vmem>>, vector<1x128xf32>
    %54 = vector.broadcast %53 : vector<1x128xf32> to vector<80x128xf32>
    %55 = arith.addf %52, %54 : vector<80x128xf32>
    %cst_49 = arith.constant 0.000000e+00 : f32
    %56 = vector.broadcast %cst_49 : f32 to vector<80x128xf32>
    %57 = arith.maximumf %55, %56 : vector<80x128xf32>
    %c0_50 = arith.constant 0 : index
    %c0_51 = arith.constant 0 : index
    %c0_52 = arith.constant 0 : index
    %58 = vector.load %arg5[%c0_50, %c0_51, %c0_52] : memref<1x80x128xf32, #tpu.memory_space<vmem>>, vector<1x80x128xf32>
    %59 = vector.shape_cast %58 : vector<1x80x128xf32> to vector<80x128xf32>
    %60 = vector.shape_cast %57 : vector<80x128xf32> to vector<1x80x128xf32>
    tpu.vector_store %arg5[%c0_50, %c0_51, %c0_52], %60 {strides = array<i32>} : memref<1x80x128xf32, #tpu.memory_space<vmem>>, vector<1x80x128xf32>,
    return
  }
  func.func @transform_0(%arg0: i32, %arg1: i32) -> (i32, i32, i32) {
    %c0_i32 = arith.constant 0 : i32
    %c0_i32_0 = arith.constant 0 : i32
    %c0_i32_1 = arith.constant 0 : i32
    return %arg0, %c0_i32, %c0_i32_0 : i32, i32, i32
  }
  func.func @transform_1(%arg0: i32, %arg1: i32) -> (i32, i32, i32) {
    %c0_i32 = arith.constant 0 : i32
    %c0_i32_0 = arith.constant 0 : i32
    %c0_i32_1 = arith.constant 0 : i32
    %c0_i32_2 = arith.constant 0 : i32
    return %c0_i32, %c0_i32_0, %c0_i32_1 : i32, i32, i32
  }
  func.func @transform_2(%arg0: i32, %arg1: i32) -> (i32, i32) {
    %c0_i32 = arith.constant 0 : i32
    %c0_i32_0 = arith.constant 0 : i32
    %c0_i32_1 = arith.constant 0 : i32
    return %c0_i32, %c0_i32_0 : i32, i32
  }
  func.func @transform_3(%arg0: i32, %arg1: i32) -> (i32, i32, i32) {
    %c0_i32 = arith.constant 0 : i32
    %c0_i32_0 = arith.constant 0 : i32
    return %arg0, %arg1, %c0_i32 : i32, i32, i32
  }
}

</mosaic_0001>

<bundles_post_ra>
// kernel: pre_conv_forward.3
= control target key start
LH: loop header
LB: loop body
LE: loop exit
PB: predicated region body
PF: predicated region fallthrough
CT: control target
= control target key end

     0   :  { %s1941_s12 = smov 0   ;;  %s1943_s13 = smov 0   ;;  %s2357_s0 = inlined_call_operand.vmem [shape: bf16[2,96,16], index: 0, kind: input, shape index: {}]   ;;  %s2358_s1 = inlined_call_operand.vmem [shape: bf16[9,16,128], index: 1, kind: input, shape index: {}]   ;;  %s2359_s2 = inlined_call_operand.vmem [shape: f32[1,128], index: 2, kind: input, shape index: {}]   ;;  %s2360_s3 = inlined_call_operand.vmem [shape: bf16[2,80,128], index: 3, kind: output, shape index: {}]  }
   0x1   :  { %s1945_s14 = smov 0  }
   0x2 LB: > { %s25_s15 = sadd.s32 1, %s1913_s13  ;;  %p1443_p0 = scmp.ge.s32.totalorder %s1917_s14, 1  ;;  %s1917_s14 = sphi %s1945_s14, %s13_s14   ;;  %s1913_s13 = sphi %s1943_s13, %s2362_s13   ;;  %s1909_s12 = sphi %s1941_s12, %s2361_s12  }
   0x3   : > { %p27_p1 = scmp.ge.s32.totalorder %s25_s15, 2  ;;  %p151_p2 = scmp.lt.s32.totalorder %s1917_s14, 3 }
   0x5   : > { %s2364_s15 = smov (%p27_p1, %s25_s15), 0  ;;  %p152_p3 = pnand %p1443_p0, %p151_p2 }
   0x6   : > { %p179_p4 = scmp.lt.s32.totalorder (!%p152_p3), %s1909_s12, 1 }
   0x7   : > { %155 = sbr.rel (%p152_p3) target bundleno = 399 (0x18f), region = 32 }
   0xc   : > { %v1868_v0 = vld [vmem:[%s2358_s1 + $0x8] sm:$0xff]   ;;  %v1919_v1 = vmov 0.0   ;;  %vm1920_vm0 = vmmov 0   ;;  %s2366_s12 = smov (!%p179_p4, %s1909_s12), 1  ;;  %v1871_v2 = vld [vmem:[%s2358_s1 + $0x10] sm:$0xff]   ;;  %vm241_vm1 = vcmask 130048  }
   0xd   : > { %1640 = vmatprep.subr.bf16.mxu0 %v1919_v1  ;;  %1838 = vmatprep.subr.bf16.mxu1 %v1919_v1  ;;  %s1840_s18 = smul.u32 48, %s2366_s12  ;;  %v1872_v3 = vld [vmem:[%s2358_s1] sm:$0xff]   ;;  %vm451_vm2 = vsmask.f32 7424  ;;  %v1876_v21 = vld [vmem:[%s2358_s1 + $0x18] sm:$0xff]   ;;  %vm1165_vm3 = vcmask 1046528  }
   0xe   : > { %1641 = vmatpush3.bf16.msra.mxu0 %v1868_v0  ;;  %1839 = vmatpush3.bf16.msra.mxu1 %v1868_v0  ;;  %v1879_v48 = vld [vmem:[%s2358_s1 + $0x20] sm:$0xff]   ;;  %s1841_s17 = smul.u32 40, %s2366_s12 }
   0xf   : > { %1642 = vmatprep.mubr.msk.bf16.mxu0 %vm1920_vm0, %v1919_v1  ;;  %1654 = vmatprep.mubr.msk.bf16.mxu1 %vm1920_vm0, %v1919_v1  ;;  %s1979_s23 = scalar_lea.vmem %s2357_s0, %s1840_s18 }
  0x10   : > { %1684 = vmatprep.subr.bf16.mxu0 %v1919_v1  ;;  %1662 = vmatprep.subr.bf16.mxu1 %v1919_v1  ;;  %v1985_v4 = vld [vmem:[%s1979_s23] sm:$0xff]   ;;  %v1988_v5 = vld [vmem:[%s1979_s23 + $0x18] sm:$0xff]   ;;  %v2000_v6 = vld [vmem:[%s1979_s23 + $0x8] sm:$0xff]   ;;  %s2316_s20 = scalar_lea.vmem %s2360_s3, %s1841_s17 }
  0x11   : > { %1643 = vmatmul.mubr.msk.bf16.vlgmr.msra.gmra.mxu0 %vm241_vm1, %v1985_v4  ;;  %1655 = vmatmul.mubr.msk.bf16.vlgmr.msra.gmra.mxu1 %vm241_vm1, %v1988_v5  ;;  %v1877_v7 = vld [vmem:[%s1979_s23] sm:$0xff]   ;;  %v1878_v9 = vld [vmem:[%s1979_s23 + $0x8] sm:$0xff]   ;;  %v2020_v12 = vld [vmem:[%s1979_s23 + $0x10] sm:$0xff]  }
  0x12   : > { %1685 = vmatpush3.bf16.msra.mxu0 %v1871_v2  ;;  %1663 = vmatpush3.bf16.msra.mxu1 %v1872_v3  ;;  %v2005_v8 = vld [vmem:[%s1979_s23 + $0x20] sm:$0xff]   ;;  %v455_v10 = vshll.u32 %v1877_v7, 16  ;;  %v2017_v11 = vld [vmem:[%s1979_s23 + $0xc] sm:$0xff]   ;;  %v453_v13 = vshrl.u32 %v1877_v7, 16  ;;  %v2024_v15 = vld [vmem:[%s1979_s23 + $0x8] sm:$0xf] }
  0x13   : > { %1646 = vmatprep.mubr.msk.bf16.mxu0 %vm1920_vm0, %v1919_v1  ;;  %1658 = vmatprep.mubr.msk.bf16.mxu1 %vm1920_vm0, %v1919_v1  ;;  %v876_v14 = vld [vmem:[%s1979_s23 + $0x4] sm:$0xf]  ;;  %v460_v17 = vshll.u32 %v1878_v9, 16  ;;  %v926_v19 = vshll.u32 %v2017_v11, 16  ;;  %v2029_v20 = vld [vmem:[%s1979_s23 + $0x14] sm:$0xff]   ;;  %v930_v24 = vshrl.u32 %v2017_v11, 16 }
  0x14   : > { %1706 = vmatprep.subr.bf16.mxu1 %v1919_v1  ;;  %1728 = vmatprep.subr.bf16.mxu0 %v1919_v1  ;;  %v457_v16 = vrot.slane %v455_v10, 1  ;;  %v1505_v18 = vcombine.low %v876_v14, %v2024_v15  ;;  %v1880_v25 = vld [vmem:[%s1979_s23 + $0x10] sm:$0xff]   ;;  %v934_v27 = vshll.u32 %v2029_v20, 16  ;;  %v2040_v29 = vld [vmem:[%s1979_s23 + $0x1c] sm:$0xff]   ;;  %v938_v30 = vshrl.u32 %v2029_v20, 16  ;;  %v2044_v31 = vld [vmem:[%s1979_s23 + $0x24] sm:$0xff]  }
  0x15   : > { %v928_v26 = vrot.slane %v926_v19, 1  ;;  %v462_v33 = vrot.slane %v460_v17, 1  ;;  %v942_v37 = vshll.u32 %v2040_v29, 16  ;;  %v946_v38 = vshrl.u32 %v2040_v29, 16  ;;  %v1881_v59 = vld [vmem:[%s1979_s23 + $0x18] sm:$0xff]   ;;  %v1882_v3 = vld [vmem:[%s1979_s23 + $0x20] sm:$0xff]  }
  0x16   : > { %v919_v22 = vshrl.u32 %v1505_v18, 16  ;;  %v921_v23 = vshll.u32 %v1505_v18, 16  ;;  %v458_v32 = vor.u32 %v457_v16, %v453_v13  ;;  %v936_v35 = vrot.slane %v934_v27, 1  ;;  %v2060_v42 = vld [vmem:[%s1979_s23 + $0x2c] ss:$0 sps:$4 sm:$0x11]  }
  0x17   : > { %v932_v34 = vor.u32 %v930_v24, %v928_v26  ;;  %v950_v39 = vshll.u32 %v2044_v31, 16  ;;  %v954_v43 = vshrl.u32 %v2044_v31, 16  ;;  %v944_v45 = vrot.slane %v942_v37, 1  ;;  %v1883_v16 = vld [vmem:[%s1979_s23 + $0x28] ss:$0 sps:$4 sm:$0x11]  }
  0x18   : > { %v923_v28 = vrot.slane %v921_v23, 1  ;;  %v940_v41 = vor.u32 %v938_v30, %v936_v35  ;;  %v2067_v47 = vsel %vm451_vm2, %v458_v32, %v462_v33  ;;  %v464_v49 = vshrl.u32 %v1878_v9, 16  ;;  %v1884_v24 = vld [vmem:[%s2358_s1 + $0x28] sm:$0xff]  }
  0x19   : > { %1647 = vmatmul.mubr.msk.bf16.gmra.mxu0 %vm241_vm1, %v2000_v6  ;;  %1659 = vmatmul.mubr.msk.bf16.gmra.mxu1 %vm241_vm1, %v2005_v8  ;;  %v2057_v40 = vsel %vm451_vm2, %v932_v34, %v936_v35  ;;  %v952_v46 = vrot.slane %v950_v39, 1  ;;  %v468_v50 = vshll.u32 %v1880_v25, 16  ;;  %v958_v51 = vshll.u32 %v2060_v42, 16 }
  0x1a   : > { %1650 = vmatprep.mubr.msk.bf16.mxu0 %vm1920_vm0, %v1919_v1  ;;  %1664 = vmatprep.mubr.msk.bf16.mxu1 %vm1920_vm0, %v1919_v1  ;;  %v924_v36 = vor.u32 %v923_v28, %v919_v22  ;;  %v2074_v52 = vsel %vm451_vm2, %v940_v41, %v944_v45  ;;  %v948_v53 = vor.u32 %v946_v38, %v944_v45  ;;  %v472_v62 = vshrl.u32 %v1880_v25, 16  ;;  %v1885_v25 = vld [vmem:[%s2358_s1 + $0x30] sm:$0xff]  }
  0x1b   : > { %v956_v54 = vor.u32 %v954_v43, %v952_v46  ;;  %v960_v55 = vrot.slane %v958_v51, 1  ;;  %v466_v57 = vor.u32 %v464_v49, %v462_v33  ;;  %v470_v58 = vrot.slane %v468_v50, 1 }
  0x1c   : > { %v2064_v44 = vsel %vm451_vm2, %v924_v36, %v928_v26  ;;  %v2079_v56 = vsel %vm451_vm2, %v948_v53, %v952_v46  ;;  %v476_v63 = vshll.u32 %v1881_v59, 16  ;;  %v480_v9 = vshrl.u32 %v1881_v59, 16 }
  0x1d   : > { %v2085_v60 = vsel %vm451_vm2, %v956_v54, %v960_v55  ;;  %v2093_v61 = vsel %vm451_vm2, %v466_v57, %v470_v58  ;;  %v474_v0 = vor.u32 %v472_v62, %v470_v58  ;;  %v484_v10 = vshll.u32 %v1882_v3, 16 }
  0x1e   : > { %v478_v2 = vrot.slane %v476_v63, 1  ;;  %v488_v18 = vshrl.u32 %v1882_v3, 16  ;;  %v492_v19 = vshll.u32 %v1883_v16, 16  ;;  %v1167_v26 = vrot.slane %v2017_v11, 1 }
  0x1f   : > { %v486_v14 = vrot.slane %v484_v10, 1  ;;  %v1171_v28 = vrot.slane %v2040_v29, 1  ;;  %v1173_v30 = vrot.slane %v2044_v31, 1  ;;  %v1175_v32 = vrot.slane %v2060_v42, 1 }
  0x20   : > { %v479_v7 = vsel %vm451_vm2, %v474_v0, %v478_v2  ;;  %v482_v13 = vor.u32 %v480_v9, %v478_v2  ;;  %v494_v22 = vrot.slane %v492_v19, 1 }
  0x21   : > { %1651 = vmatmul.mubr.msk.bf16.gmra.mxu0 %vm241_vm1, %v2020_v12  ;;  %1665 = vmatmul.mubr.msk.bf16.vlgmr.msra.gmra.mxu1 %vm241_vm1, %v1985_v4  ;;  %v1174_v29 = vsel %vm1165_vm3, %v1171_v28, %v1173_v30  ;;  %v1176_v33 = vsel %vm1165_vm3, %v1173_v30, %v1175_v32 }
  0x22   : > { %1686 = vmatprep.mubr.msk.bf16.mxu0 %vm1920_vm0, %v1919_v1  ;;  %1707 = vmatpush3.bf16.msra.mxu1 %v1876_v21  ;;  %v487_v17 = vsel %vm451_vm2, %v482_v13, %v486_v14  ;;  %v490_v21 = vor.u32 %v488_v18, %v486_v14 }
  0x23   : > { %1668 = vmatprep.mubr.msk.bf16.mxu1 %vm1920_vm0, %v1919_v1  ;;  %1750 = vmatprep.subr.bf16.mxu1 %v1919_v1 }
  0x24   : > { %v495_v23 = vsel %vm451_vm2, %v490_v21, %v494_v22 }
  0x29   : > { %1687 = vmatmul.mubr.msk.bf16.vlgmr.msra.gmra.mxu0 %vm241_vm1, %v2067_v47  ;;  %1669 = vmatmul.mubr.msk.bf16.gmra.mxu1 %vm241_vm1, %v2000_v6 }
  0x2a   : > { %1729 = vmatpush3.bf16.msra.mxu0 %v1879_v48  ;;  %1672 = vmatprep.mubr.msk.bf16.mxu1 %vm1920_vm0, %v1919_v1 }
  0x2b   : > { %1690 = vmatprep.mubr.msk.bf16.mxu0 %vm1920_vm0, %v1919_v1  ;;  %1772 = vmatprep.subr.bf16.mxu0 %v1919_v1 }
  0x31   : > { %1691 = vmatmul.mubr.msk.bf16.gmra.mxu0 %vm241_vm1, %v2093_v61  ;;  %1673 = vmatmul.mubr.msk.bf16.gmra.mxu1 %vm241_vm1, %v2020_v12 }
  0x32   : > { %1694 = vmatprep.mubr.msk.bf16.mxu0 %vm1920_vm0, %v1919_v1  ;;  %1676 = vmatprep.mubr.msk.bf16.mxu1 %vm1920_vm0, %v1919_v1 }
  0x39   : > { %1695 = vmatmul.mubr.msk.bf16.gmra.mxu0 %vm241_vm1, %v479_v7  ;;  %1677 = vmatmul.mubr.msk.bf16.gmra.mxu1 %vm241_vm1, %v1988_v5 }
  0x3a   : > { %1698 = vmatprep.mubr.msk.bf16.mxu0 %vm1920_vm0, %v1919_v1  ;;  %1680 = vmatprep.mubr.msk.bf16.mxu1 %vm1920_vm0, %v1919_v1 }
  0x41   : > { %1699 = vmatmul.mubr.msk.bf16.gmra.mxu0 %vm241_vm1, %v487_v17  ;;  %1681 = vmatmul.mubr.msk.bf16.gmra.mxu1 %vm241_vm1, %v2005_v8 }
  0x42   : > { %1702 = vmatprep.mubr.msk.bf16.mxu0 %vm1920_vm0, %v1919_v1  ;;  %1708 = vmatprep.mubr.msk.bf16.mxu1 %vm1920_vm0, %v1919_v1 }
  0x49   : > { %1703 = vmatmul.mubr.msk.bf16.gmra.mxu0 %vm241_vm1, %v495_v23  ;;  %1709 = vmatmul.mubr.msk.bf16.vlgmr.msra.gmra.mxu1 %vm241_vm1, %v1985_v4 }
  0x4a   : > { %1730 = vmatprep.mubr.msk.bf16.mxu0 %vm1920_vm0, %v1919_v1  ;;  %1751 = vmatpush3.bf16.msra.mxu1 %v1884_v24 }
  0x4b   : > { %1712 = vmatprep.mubr.msk.bf16.mxu1 %vm1920_vm0, %v1919_v1  ;;  %1794 = vmatprep.subr.bf16.mxu1 %v1919_v1 }
  0x51   : > { %1731 = vmatmul.mubr.msk.bf16.vlgmr.msra.gmra.mxu0 %vm241_vm1, %v1985_v4  ;;  %1713 = vmatmul.mubr.msk.bf16.gmra.mxu1 %vm241_vm1, %v2000_v6  ;;  %v1886_v4 = vld [vmem:[%s2358_s1 + $0x38] sm:$0xff]  }
  0x52   : > { %1773 = vmatpush3.bf16.msra.mxu0 %v1885_v25  ;;  %1716 = vmatprep.mubr.msk.bf16.mxu1 %vm1920_vm0, %v1919_v1 }
  0x53   : > { %1734 = vmatprep.mubr.msk.bf16.mxu0 %vm1920_vm0, %v1919_v1  ;;  %1816 = vmatprep.subr.bf16.mxu0 %v1919_v1 }
  0x59   : > { %1735 = vmatmul.mubr.msk.bf16.gmra.mxu0 %vm241_vm1, %v2000_v6  ;;  %1717 = vmatmul.mubr.msk.bf16.gmra.mxu1 %vm241_vm1, %v2020_v12  ;;  %v1158_v6 = vld [vmem:[%s1979_s23 + $0x4] sm:$0xe] }
  0x5a   : > { %1738 = vmatprep.mubr.msk.bf16.mxu0 %vm1920_vm0, %v1919_v1  ;;  %1720 = vmatprep.mubr.msk.bf16.mxu1 %vm1920_vm0, %v1919_v1 }
  0x61   : > { %1739 = vmatmul.mubr.msk.bf16.gmra.mxu0 %vm241_vm1, %v2020_v12  ;;  %1721 = vmatmul.mubr.msk.bf16.gmra.mxu1 %vm241_vm1, %v1988_v5 }
  0x62   : > { %1742 = vmatprep.mubr.msk.bf16.mxu0 %vm1920_vm0, %v1919_v1  ;;  %1724 = vmatprep.mubr.msk.bf16.mxu1 %vm1920_vm0, %v1919_v1 }
  0x69   : > { %1743 = vmatmul.mubr.msk.bf16.gmra.mxu0 %vm241_vm1, %v1988_v5  ;;  %1725 = vmatmul.mubr.msk.bf16.gmra.mxu1 %vm241_vm1, %v2005_v8  ;;  %v1889_v5 = vld [vmem:[%s2358_s1 + $0x40] sm:$0xff]  }
  0x6a   : > { %1746 = vmatprep.mubr.msk.bf16.mxu0 %vm1920_vm0, %v1919_v1  ;;  %1752 = vmatprep.mubr.msk.bf16.mxu1 %vm1920_vm0, %v1919_v1 }
  0x71   : > { %1747 = vmatmul.mubr.msk.bf16.gmra.mxu0 %vm241_vm1, %v2005_v8  ;;  %1753 = vmatmul.mubr.msk.bf16.vlgmr.msra.gmra.mxu1 %vm241_vm1, %v2067_v47  ;;  %v1527_v8 = vcombine.low %v1158_v6, %v2024_v15  ;;  %v1169_v15 = vrot.slane %v2029_v20, 1 }
  0x72   : > { %1774 = vmatprep.mubr.msk.bf16.mxu0 %vm1920_vm0, %v1919_v1  ;;  %1795 = vmatpush3.bf16.msra.mxu1 %v1886_v4 }
  0x73   : > { %1756 = vmatprep.mubr.msk.bf16.mxu1 %vm1920_vm0, %v1919_v1  ;;  %v1166_v12 = vrot.slane %v1527_v8, 1  ;;  %v1170_v11 = vsel %vm1165_vm3, %v1167_v26, %v1169_v15  ;;  %v1172_v20 = vsel %vm1165_vm3, %v1169_v15, %v1171_v28 }
  0x75   : > { %v1168_v27 = vsel %vm1165_vm3, %v1166_v12, %v1167_v26 }
  0x79   : > { %1775 = vmatmul.mubr.msk.bf16.vlgmr.msra.gmra.mxu0 %vm241_vm1, %v2064_v44  ;;  %1757 = vmatmul.mubr.msk.bf16.gmra.mxu1 %vm241_vm1, %v2093_v61 }
  0x7a   : > { %1817 = vmatpush3.bf16.msra.mxu0 %v1889_v5  ;;  %1760 = vmatprep.mubr.msk.bf16.mxu1 %vm1920_vm0, %v1919_v1 }
  0x7b   : > { %1778 = vmatprep.mubr.msk.bf16.mxu0 %vm1920_vm0, %v1919_v1 }
  0x81   : > { %1779 = vmatmul.mubr.msk.bf16.gmra.mxu0 %vm241_vm1, %v2057_v40  ;;  %1761 = vmatmul.mubr.msk.bf16.gmra.mxu1 %vm241_vm1, %v479_v7 }
  0x82   : > { %1782 = vmatprep.mubr.msk.bf16.mxu0 %vm1920_vm0, %v1919_v1  ;;  %1764 = vmatprep.mubr.msk.bf16.mxu1 %vm1920_vm0, %v1919_v1 }
  0x89   : > { %1783 = vmatmul.mubr.msk.bf16.gmra.mxu0 %vm241_vm1, %v2074_v52  ;;  %1765 = vmatmul.mubr.msk.bf16.gmra.mxu1 %vm241_vm1, %v487_v17 }
  0x8a   : > { %1786 = vmatprep.mubr.msk.bf16.mxu0 %vm1920_vm0, %v1919_v1  ;;  %1768 = vmatprep.mubr.msk.bf16.mxu1 %vm1920_vm0, %v1919_v1 }
  0x91   : > { %1787 = vmatmul.mubr.msk.bf16.gmra.mxu0 %vm241_vm1, %v2079_v56  ;;  %1769 = vmatmul.mubr.msk.bf16.gmra.mxu1 %vm241_vm1, %v495_v23 }
  0x92   : > { %1790 = vmatprep.mubr.msk.bf16.mxu0 %vm1920_vm0, %v1919_v1  ;;  %1796 = vmatprep.mubr.msk.bf16.mxu1 %vm1920_vm0, %v1919_v1 }
  0x99   : > { %1791 = vmatmul.mubr.msk.bf16.gmra.mxu0 %vm241_vm1, %v2085_v60  ;;  %1797 = vmatmul.mubr.msk.bf16.vlgmr.msra.gmra.mxu1 %vm241_vm1, %v2064_v44 }
  0x9a   : > { %1818 = vmatprep.mubr.msk.bf16.mxu0 %vm1920_vm0, %v1919_v1  ;;  %1800 = vmatprep.mubr.msk.bf16.mxu1 %vm1920_vm0, %v1919_v1 }
  0xa1   : > { %1819 = vmatmul.mubr.msk.bf16.vlgmr.msra.gmra.mxu0 %vm241_vm1, %v1168_v27  ;;  %1801 = vmatmul.mubr.msk.bf16.gmra.mxu1 %vm241_vm1, %v2057_v40 }
  0xa2   : > { %1822 = vmatprep.mubr.msk.bf16.mxu0 %vm1920_vm0, %v1919_v1  ;;  %1804 = vmatprep.mubr.msk.bf16.mxu1 %vm1920_vm0, %v1919_v1 }
  0xa9   : > { %1823 = vmatmul.mubr.msk.bf16.gmra.mxu0 %vm241_vm1, %v1170_v11  ;;  %1805 = vmatmul.mubr.msk.bf16.gmra.mxu1 %vm241_vm1, %v2074_v52 }
  0xaa   : > { %1826 = vmatprep.mubr.msk.bf16.mxu0 %vm1920_vm0, %v1919_v1  ;;  %1808 = vmatprep.mubr.msk.bf16.mxu1 %vm1920_vm0, %v1919_v1 }
  0xb1   : > { %1827 = vmatmul.mubr.msk.bf16.gmra.mxu0 %vm241_vm1, %v1172_v20  ;;  %1809 = vmatmul.mubr.msk.bf16.gmra.mxu1 %vm241_vm1, %v2079_v56 }
  0xb2   : > { %1830 = vmatprep.mubr.msk.bf16.mxu0 %vm1920_vm0, %v1919_v1  ;;  %1812 = vmatprep.mubr.msk.bf16.mxu1 %vm1920_vm0, %v1919_v1 }
  0xb9   : > { %1831 = vmatmul.mubr.msk.bf16.gmra.mxu0 %vm241_vm1, %v1174_v29  ;;  %1813 = vmatmul.mubr.msk.bf16.gmra.mxu1 %vm241_vm1, %v2085_v60 }
  0xba   : > { %1834 = vmatprep.mubr.msk.bf16.mxu0 %vm1920_vm0, %v1919_v1 }
  0xc1   : > { %1835 = vmatmul.mubr.msk.bf16.gmra.mxu0 %vm241_vm1, %v1176_v33 }
  0xd1   : > { %v291_v31 = vpop.f32.mrf.mxu0  ;;  %v315_v34 = vpop.f32.mrf.mxu1 }
  0xd3   : > { %v1644_v35 = vpop.f32.mrf.mxu0  ;;  %v1656_v36 = vpop.f32.mrf.mxu1 }
  0xd5   : > { %v294_v37 = vpop.f32.mrf.mxu0  ;;  %v318_v38 = vpop.f32.mrf.mxu1 }
  0xd7   : > { %v1645_v39 = vpop.f32.mrf.mxu0  ;;  %v1657_v40 = vpop.f32.mrf.mxu1 }
  0xd9   : > { %v299_v41 = vpop.f32.mrf.mxu0  ;;  %v323_v43 = vpop.f32.mrf.mxu1 }
  0xdb   : > { %v1648_v44 = vpop.f32.mrf.mxu0  ;;  %v1660_v45 = vpop.f32.mrf.mxu1 }
  0xdd   : > { %v302_v46 = vpop.f32.mrf.mxu0  ;;  %v326_v1 = vpop.f32.mrf.mxu1 }
  0xdf   : > { %v1649_v47 = vpop.f32.mrf.mxu0  ;;  %v1661_v42 = vpop.f32.mrf.mxu1 }
  0xe1   : > { %v307_v48 = vpop.f32.mrf.mxu0  ;;  %v370_v49 = vpop.f32.mrf.mxu1 }
  0xe2   : > { %v371_v50 = vadd.f32 %v370_v49, %v291_v31 }
  0xe3   : > { %v1652_v51 = vpop.f32.mrf.mxu0  ;;  %v1666_v52 = vpop.f32.mrf.mxu1 }
  0xe5   : > { %v310_v53 = vpop.f32.mrf.mxu0  ;;  %v373_v54 = vpop.f32.mrf.mxu1 }
  0xe6   : > { %v374_v55 = vadd.f32 %v373_v54, %v294_v37 }
  0xe7   : > { %v1653_v56 = vpop.f32.mrf.mxu0  ;;  %v1667_v57 = vpop.f32.mrf.mxu1 }
  0xe9   : > { %v551_v58 = vpop.f32.mrf.mxu0  ;;  %v378_v59 = vpop.f32.mrf.mxu1 }
  0xea   : > { %v590_v60 = vadd.f32 %v551_v58, %v371_v50  ;;  %v379_v61 = vadd.f32 %v378_v59, %v299_v41 }
  0xeb   : > { %v1688_v62 = vpop.f32.mrf.mxu0  ;;  %v1670_v63 = vpop.f32.mrf.mxu1 }
  0xed   : > { %v554_v0 = vpop.f32.mrf.mxu0  ;;  %v381_v2 = vpop.f32.mrf.mxu1 }
  0xee   : > { %v591_v3 = vadd.f32 %v554_v0, %v374_v55  ;;  %v382_v7 = vadd.f32 %v381_v2, %v302_v46 }
  0xef   : > { %v1689_v9 = vpop.f32.mrf.mxu0  ;;  %v1671_v10 = vpop.f32.mrf.mxu1 }
  0xf1   : > { %v559_v13 = vpop.f32.mrf.mxu0  ;;  %v386_v14 = vpop.f32.mrf.mxu1 }
  0xf2   : > { %v592_v16 = vadd.f32 %v559_v13, %v379_v61  ;;  %v387_v17 = vadd.f32 %v386_v14, %v307_v48 }
  0xf3   : > { %v1692_v18 = vpop.f32.mrf.mxu0  ;;  %v1674_v19 = vpop.f32.mrf.mxu1 }
  0xf5   : > { %v562_v21 = vpop.f32.mrf.mxu0  ;;  %v389_v22 = vpop.f32.mrf.mxu1 }
  0xf6   : > { %v593_v23 = vadd.f32 %v562_v21, %v382_v7  ;;  %v390_v24 = vadd.f32 %v389_v22, %v310_v53 }
  0xf7   : > { %v1693_v25 = vpop.f32.mrf.mxu0  ;;  %v1675_v4 = vpop.f32.mrf.mxu1 }
  0xf9   : > { %v567_v5 = vpop.f32.mrf.mxu0  ;;  %v394_v6 = vpop.f32.mrf.mxu1 }
  0xfa   : > { %v594_v8 = vadd.f32 %v567_v5, %v387_v17  ;;  %v395_v12 = vadd.f32 %v394_v6, %v315_v34 }
  0xfb   : > { %v1696_v26 = vpop.f32.mrf.mxu0  ;;  %v1678_v27 = vpop.f32.mrf.mxu1 }
  0xfd   : > { %v570_v15 = vpop.f32.mrf.mxu0  ;;  %v397_v11 = vpop.f32.mrf.mxu1 }
  0xfe   : > { %v595_v28 = vadd.f32 %v570_v15, %v390_v24  ;;  %v398_v20 = vadd.f32 %v397_v11, %v318_v38 }
  0xff   : > { %v1697_v30 = vpop.f32.mrf.mxu0  ;;  %v1679_v29 = vpop.f32.mrf.mxu1 }
 0x101   : > { %v575_v32 = vpop.f32.mrf.mxu0  ;;  %v402_v33 = vpop.f32.mrf.mxu1 }
 0x102   : > { %v596_v31 = vadd.f32 %v575_v32, %v395_v12  ;;  %v403_v35 = vadd.f32 %v402_v33, %v323_v43 }
 0x103   : > { %v1700_v36 = vpop.f32.mrf.mxu0  ;;  %v1682_v37 = vpop.f32.mrf.mxu1 }
 0x105   : > { %v578_v39 = vpop.f32.mrf.mxu0  ;;  %v405_v40 = vpop.f32.mrf.mxu1 }
 0x106   : > { %v597_v41 = vadd.f32 %v578_v39, %v398_v20  ;;  %v406_v44 = vadd.f32 %v405_v40, %v326_v1 }
 0x107   : > { %v1701_v45 = vpop.f32.mrf.mxu0  ;;  %v1683_v34 = vpop.f32.mrf.mxu1 }
 0x109   : > { %v583_v46 = vpop.f32.mrf.mxu0  ;;  %v643_v42 = vpop.f32.mrf.mxu1 }
 0x10a   : > { %v598_v47 = vadd.f32 %v583_v46, %v403_v35  ;;  %v682_v48 = vadd.f32 %v643_v42, %v590_v60 }
 0x10b   : > { %v1704_v49 = vpop.f32.mrf.mxu0  ;;  %v1710_v38 = vpop.f32.mrf.mxu1 }
 0x10d   : > { %v586_v50 = vpop.f32.mrf.mxu0  ;;  %v646_v52 = vpop.f32.mrf.mxu1 }
 0x10e   : > { %v599_v51 = vadd.f32 %v586_v50, %v406_v44  ;;  %v683_v53 = vadd.f32 %v646_v52, %v591_v3 }
 0x10f   : > { %v1705_v54 = vpop.f32.mrf.mxu0  ;;  %v1711_v43 = vpop.f32.mrf.mxu1 }
 0x111   : > { %v735_v55 = vpop.f32.mrf.mxu0  ;;  %v651_v56 = vpop.f32.mrf.mxu1 }
 0x112   : > { %v2259_v57 = vadd.f32 %v735_v55, %v682_v48  ;;  %v684_v58 = vadd.f32 %v651_v56, %v592_v16 }
 0x113   : > { %v1732_v1 = vpop.f32.mrf.mxu0  ;;  %v1714_v59 = vpop.f32.mrf.mxu1 }
 0x115   : > { %v738_v61 = vpop.f32.mrf.mxu0  ;;  %v654_v62 = vpop.f32.mrf.mxu1 }
 0x116   : > { %v2261_v63 = vadd.f32 %v738_v61, %v683_v53  ;;  %v685_v60 = vadd.f32 %v654_v62, %v593_v23 }
 0x117   : > { %v1733_v0 = vpop.f32.mrf.mxu0  ;;  %v1715_v2 = vpop.f32.mrf.mxu1 }
 0x119   : > { %v743_v7 = vpop.f32.mrf.mxu0  ;;  %v659_v9 = vpop.f32.mrf.mxu1 }
 0x11a   : > { %v2263_v10 = vadd.f32 %v743_v7, %v684_v58  ;;  %v686_v3 = vadd.f32 %v659_v9, %v594_v8 }
 0x11b   : > { %v1736_v13 = vpop.f32.mrf.mxu0  ;;  %v1718_v14 = vpop.f32.mrf.mxu1 }
 0x11d   : > { %v746_v17 = vpop.f32.mrf.mxu0  ;;  %v662_v18 = vpop.f32.mrf.mxu1 }
 0x11e   : > { %v2265_v19 = vadd.f32 %v746_v17, %v685_v60  ;;  %v687_v16 = vadd.f32 %v662_v18, %v595_v28 }
 0x11f   : > { %v1737_v21 = vpop.f32.mrf.mxu0  ;;  %v1719_v22 = vpop.f32.mrf.mxu1 }
 0x121   : > { %v751_v24 = vpop.f32.mrf.mxu0  ;;  %v667_v25 = vpop.f32.mrf.mxu1 }
 0x122   : > { %v2267_v4 = vadd.f32 %v751_v24, %v686_v3  ;;  %v688_v23 = vadd.f32 %v667_v25, %v596_v31 }
 0x123   : > { %v1740_v5 = vpop.f32.mrf.mxu0  ;;  %v1722_v6 = vpop.f32.mrf.mxu1 }
 0x125   : > { %v754_v12 = vpop.f32.mrf.mxu0  ;;  %v670_v26 = vpop.f32.mrf.mxu1 }
 0x126   : > { %v2269_v27 = vadd.f32 %v754_v12, %v687_v16  ;;  %v689_v8 = vadd.f32 %v670_v26, %v597_v41 }
 0x127   : > { %v1741_v15 = vpop.f32.mrf.mxu0  ;;  %v1723_v11 = vpop.f32.mrf.mxu1 }
 0x129   : > { %v759_v20 = vpop.f32.mrf.mxu0  ;;  %v675_v30 = vpop.f32.mrf.mxu1 }
 0x12a   : > { %v2271_v29 = vadd.f32 %v759_v20, %v688_v23  ;;  %v690_v28 = vadd.f32 %v675_v30, %v598_v47 }
 0x12b   : > { %v1744_v32 = vpop.f32.mrf.mxu0  ;;  %v1726_v33 = vpop.f32.mrf.mxu1 }
 0x12d   : > { %v762_v35 = vpop.f32.mrf.mxu0  ;;  %v678_v36 = vpop.f32.mrf.mxu1 }
 0x12e   : > { %v2273_v37 = vadd.f32 %v762_v35, %v689_v8  ;;  %v691_v31 = vadd.f32 %v678_v36, %v599_v51 }
 0x12f   : > { %v1745_v39 = vpop.f32.mrf.mxu0  ;;  %v1727_v40 = vpop.f32.mrf.mxu1 }
 0x131   : > { %v767_v44 = vpop.f32.mrf.mxu0  ;;  %v827_v41 = vpop.f32.mrf.mxu1 }
 0x132   : > { %v2275_v45 = vadd.f32 %v767_v44, %v690_v28  ;;  %v866_v11 = vadd.f32 %v827_v41, %v2259_v57 }
 0x133   : > { %v1748_v34 = vpop.f32.mrf.mxu0  ;;  %v1754_v46 = vpop.f32.mrf.mxu1 }
 0x134   : > { %v2306_v46 = vld [vmem:[%s2359_s2] ss:$0 sm:$0xff] }
 0x135   : > { %v770_v42 = vpop.f32.mrf.mxu0  ;;  %v830_v49 = vpop.f32.mrf.mxu1 }
 0x136   : > { %v2277_v48 = vadd.f32 %v770_v42, %v691_v31  ;;  %v867_v35 = vadd.f32 %v830_v49, %v2261_v63 }
 0x137   : > { %v1749_v47 = vpop.f32.mrf.mxu0  ;;  %v1755_v38 = vpop.f32.mrf.mxu1 }
 0x139   : > { %v1017_v50 = vpop.f32.mrf.mxu0  ;;  %v835_v52 = vpop.f32.mrf.mxu1 }
 0x13a   : > { %v1056_v28 = vadd.f32 %v1017_v50, %v866_v11  ;;  %v868_v41 = vadd.f32 %v835_v52, %v2263_v10 }
 0x13b   : > { %v1776_v53 = vpop.f32.mrf.mxu0  ;;  %v1758_v54 = vpop.f32.mrf.mxu1 }
 0x13d   : > { %v1020_v43 = vpop.f32.mrf.mxu0  ;;  %v838_v51 = vpop.f32.mrf.mxu1 }
 0x13e   : > { %v1057_v40 = vadd.f32 %v1020_v43, %v867_v35  ;;  %v869_v43 = vadd.f32 %v838_v51, %v2265_v19 }
 0x13f   : > { %v1777_v55 = vpop.f32.mrf.mxu0  ;;  %v1759_v56 = vpop.f32.mrf.mxu1 }
 0x141   : > { %v1025_v58 = vpop.f32.mrf.mxu0  ;;  %v2279_v1 = vpop.f32.mrf.mxu1 }
 0x142   : > { %v1058_v50 = vadd.f32 %v1025_v58, %v868_v41  ;;  %v870_v19 = vadd.f32 %v2279_v1, %v2267_v4 }
 0x143   : > { %v1780_v59 = vpop.f32.mrf.mxu0  ;;  %v1762_v61 = vpop.f32.mrf.mxu1 }
 0x145   : > { %v1028_v62 = vpop.f32.mrf.mxu0  ;;  %v2281_v60 = vpop.f32.mrf.mxu1 }
 0x147   : > { %v1781_v0 = vpop.f32.mrf.mxu0  ;;  %v1763_v2 = vpop.f32.mrf.mxu1 }
 0x148   : > { %v1059_v0 = vadd.f32 %v1028_v62, %v869_v43 }
 0x149   : > { %v1033_v7 = vpop.f32.mrf.mxu0  ;;  %v2283_v9 = vpop.f32.mrf.mxu1 }
 0x14b   : > { %v1784_v3 = vpop.f32.mrf.mxu0  ;;  %v1766_v13 = vpop.f32.mrf.mxu1 }
 0x14d   : > { %v2285_v14 = vpop.f32.mrf.mxu0  ;;  %v2287_v17 = vpop.f32.mrf.mxu1 }
 0x14e   : > { %v873_v41 = vadd.f32 %v2287_v17, %v2273_v37 }
 0x14f   : > { %v1785_v18 = vpop.f32.mrf.mxu0  ;;  %v1767_v16 = vpop.f32.mrf.mxu1 }
 0x151   : > { %v2289_v21 = vpop.f32.mrf.mxu0  ;;  %v2291_v22 = vpop.f32.mrf.mxu1 }
 0x153   : > { %v1788_v24 = vpop.f32.mrf.mxu0  ;;  %v1770_v25 = vpop.f32.mrf.mxu1 }
 0x154   : > { %v1060_v24 = vadd.f32 %v1033_v7, %v870_v19 }
 0x155   : > { %v2293_v23 = vpop.f32.mrf.mxu0  ;;  %v2295_v5 = vpop.f32.mrf.mxu1 }
 0x157   : > { %v1789_v6 = vpop.f32.mrf.mxu0  ;;  %v1771_v12 = vpop.f32.mrf.mxu1 }
 0x159   : > { %v2297_v26 = vpop.f32.mrf.mxu0  ;;  %v1109_v8 = vpop.f32.mrf.mxu1 }
 0x15a   : > { %v1148_v36 = vadd.f32 %v1109_v8, %v1056_v28  ;;  %v871_v8 = vadd.f32 %v2281_v60, %v2269_v27 }
 0x15b   : > { %v1792_v15 = vpop.f32.mrf.mxu0  ;;  %v1798_v20 = vpop.f32.mrf.mxu1 }
 0x15c   : > { %v1061_v1 = vadd.f32 %v2285_v14, %v871_v8 }
 0x15d   : > { %v2300_v30 = vpop.f32.mrf.mxu0  ;;  %v1112_v32 = vpop.f32.mrf.mxu1 }
 0x15e   : > { %v1149_v42 = vadd.f32 %v1112_v32, %v1057_v40 }
 0x15f   : > { %v1793_v33 = vpop.f32.mrf.mxu0  ;;  %v1799_v31 = vpop.f32.mrf.mxu1 }
 0x161   : > { %v1232_v39 = vpop.f32.mrf.mxu0  ;;  %v1117_v44 = vpop.f32.mrf.mxu1 }
 0x162   : > { %v1271_v34 = vadd.f32 %v1232_v39, %v1148_v36  ;;  %v1150_v55 = vadd.f32 %v1117_v44, %v1058_v50  ;;  %v872_v36 = vadd.f32 %v2283_v9, %v2271_v29 }
 0x163   : > { %v1820_v57 = vpop.f32.mrf.mxu0  ;;  %v1802_v47 = vpop.f32.mrf.mxu1 }
 0x164   : > { %v1288_v63 = vadd.f32 %v2306_v46, %v1271_v34  ;;  %v1062_v60 = vadd.f32 %v2289_v21, %v872_v36 }
 0x165   : > { %v1235_v38 = vpop.f32.mrf.mxu0  ;;  %v1120_v49 = vpop.f32.mrf.mxu1 }
 0x166   : > { %v1272_v53 = vadd.f32 %v1235_v38, %v1149_v42  ;;  %v1298_v2 = vmax.f32 %v1288_v63, 0.0  ;;  %v1151_v51 = vadd.f32 %v1120_v49, %v1059_v0  ;;  %v1063_v38 = vadd.f32 %v2293_v23, %v873_v41 }
 0x167   : > { %v1821_v54 = vpop.f32.mrf.mxu0  ;;  %v1803_v59 = vpop.f32.mrf.mxu1 }
 0x168   : > { %v1289_v56 = vadd.f32 %v2306_v46, %v1272_v53  ;;  %v874_v54 = vadd.f32 %v2291_v22, %v2275_v45 }
 0x169   : > { %v1240_v61 = vpop.f32.mrf.mxu0  ;;  %v1125_v52 = vpop.f32.mrf.mxu1 }
 0x16a   : > { %v1299_v10 = vmax.f32 %v1289_v56, 0.0  ;;  %v1273_v3 = vadd.f32 %v1240_v61, %v1150_v55  ;;  %v1152_v15 = vadd.f32 %v1125_v52, %v1060_v24  ;;  %v1064_v17 = vadd.f32 %v2297_v26, %v874_v54 }
 0x16b   : > { %v1824_v58 = vpop.f32.mrf.mxu0  ;;  %v1806_v18 = vpop.f32.mrf.mxu1 }
 0x16c   : > { %v1560_v13 = vpack.c.bf16 %v1299_v10, %v1298_v2  ;;  %v1290_v62 = vadd.f32 %v2306_v46, %v1273_v3  ;;  %v875_v2 = vadd.f32 %v2295_v5, %v2277_v48 }
 0x16d   : > { %v1243_v16 = vpop.f32.mrf.mxu0  ;;  %v1128_v25 = vpop.f32.mrf.mxu1 }
 0x16e   : > { %1561 = vst [vmem:[%s2316_s20] sm:$0xff] %v1560_v13   ;;  %v1274_v6 = vadd.f32 %v1243_v16, %v1151_v51  ;;  %v1300_v28 = vmax.f32 %v1290_v62, 0.0  ;;  %v1153_v31 = vadd.f32 %v1128_v25, %v1061_v1  ;;  %v1065_v3 = vadd.f32 %v2300_v30, %v875_v2 }
 0x16f   : > { %v1825_v12 = vpop.f32.mrf.mxu0  ;;  %v1807_v20 = vpop.f32.mrf.mxu1 }
 0x170   : > { %v1291_v11 = vadd.f32 %v2306_v46, %v1274_v6 }
 0x171   : > { %v1248_v4 = vpop.f32.mrf.mxu0  ;;  %v1133_v7 = vpop.f32.mrf.mxu1 }
 0x172   : > { %v1301_v32 = vmax.f32 %v1291_v11, 0.0  ;;  %v1275_v33 = vadd.f32 %v1248_v4, %v1152_v15  ;;  %v1154_v42 = vadd.f32 %v1133_v7, %v1062_v60 }
 0x173   : > { %v1828_v35 = vpop.f32.mrf.mxu0  ;;  %v1810_v40 = vpop.f32.mrf.mxu1 }
 0x174   : > { %v1565_v39 = vpack.c.bf16 %v1301_v32, %v1300_v28  ;;  %v1292_v44 = vadd.f32 %v2306_v46, %v1275_v33 }
 0x175   : > { %v1251_v27 = vpop.f32.mrf.mxu0  ;;  %v1136_v34 = vpop.f32.mrf.mxu1 }
 0x176   : > { %1582 = vst [vmem:[%s2316_s20 + $0x8] sm:$0xff] %v1565_v39   ;;  %v1276_v57 = vadd.f32 %v1251_v27, %v1153_v31  ;;  %v1302_v50 = vmax.f32 %v1292_v44, 0.0  ;;  %v1155_v43 = vadd.f32 %v1136_v34, %v1063_v38 }
 0x177   : > { %v1829_v14 = vpop.f32.mrf.mxu0  ;;  %v1811_v29 = vpop.f32.mrf.mxu1 }
 0x178   : > { %v1293_v47 = vadd.f32 %v2306_v46, %v1276_v57 }
 0x179   : > { %v1256_v9 = vpop.f32.mrf.mxu0  ;;  %v1141_v21 = vpop.f32.mrf.mxu1 }
 0x17a   : > { %v1303_v63 = vmax.f32 %v1293_v47, 0.0  ;;  %v1277_v49 = vadd.f32 %v1256_v9, %v1154_v42  ;;  %v1156_v10 = vadd.f32 %v1141_v21, %v1064_v17 }
 0x17b   : > { %v1832_v53 = vpop.f32.mrf.mxu0  ;;  %v1814_v56 = vpop.f32.mrf.mxu1 }
 0x17c   : > { %v1570_v55 = vpack.c.bf16 %v1303_v63, %v1302_v50  ;;  %v1294_v59 = vadd.f32 %v2306_v46, %v1277_v49 }
 0x17d   : > { %v1259_v37 = vpop.f32.mrf.mxu0  ;;  %v1144_v61 = vpop.f32.mrf.mxu1 }
 0x17e   : > { %1583 = vst [vmem:[%s2316_s20 + $0x10] sm:$0xff] %v1570_v55   ;;  %v1278_v23 = vadd.f32 %v1259_v37, %v1155_v43  ;;  %v1304_v58 = vmax.f32 %v1294_v59, 0.0  ;;  %v1157_v13 = vadd.f32 %v1144_v61, %v1065_v3 }
 0x17f   : > { %v1833_v0 = vpop.f32.mrf.mxu0  ;;  %v1815_v45 = vpop.f32.mrf.mxu1 }
 0x180   : > { %v1295_v52 = vadd.f32 %v2306_v46, %v1278_v23 }
 0x181   : > { %v1264_v22 = vpop.f32.mrf.mxu0 }
 0x182   : > { %v1305_v26 = vmax.f32 %v1295_v52, 0.0  ;;  %v1279_v19 = vadd.f32 %v1264_v22, %v1156_v10 }
 0x183   : > { %v1836_v51 = vpop.f32.mrf.mxu0 }
 0x184   : > { %v1575_v18 = vpack.c.bf16 %v1305_v26, %v1304_v58  ;;  %v1296_v24 = vadd.f32 %v2306_v46, %v1279_v19 }
 0x185   : > { %v1267_v16 = vpop.f32.mrf.mxu0 }
 0x186   : > { %1584 = vst [vmem:[%s2316_s20 + $0x18] sm:$0xff] %v1575_v18   ;;  %v1280_v62 = vadd.f32 %v1267_v16, %v1157_v13  ;;  %v1306_v25 = vmax.f32 %v1296_v24, 0.0 }
 0x187   : > { %v1837_v48 = vpop.f32.mrf.mxu0 }
 0x188   : > { %v1297_v5 = vadd.f32 %v2306_v46, %v1280_v62 }
 0x18a   : > { %v1307_v6 = vmax.f32 %v1297_v5, 0.0 }
 0x18c   : > { %v1580_v12 = vpack.c.bf16 %v1307_v6, %v1306_v25 }
 0x18e   : > { %1585 = vst [vmem:[%s2316_s20 + $0x20] sm:$0xff] %v1580_v12  }
 0x18f PF: > { %s13_s14 = sadd.s32 1, %s1917_s14   ;;  %s2361_s12 = smov %s1913_s13 }
 0x190   : > { %p10_p5 = scmp.ge.s32.totalorder %s13_s14, 4   ;;  %s2362_s13 = smov %s2364_s15 }
 0x192   :  { %12 = sbr.rel (!%p10_p5) target bundleno = 2 (0x2), region = 70 }

// kernel: pre_conv_forward.5
= control target key start
LH: loop header
LB: loop body
LE: loop exit
PB: predicated region body
PF: predicated region fallthrough
CT: control target
= control target key end

     0   :  { %s2001_s12 = smov 0   ;;  %s2003_s13 = smov 0   ;;  %s2485_s0 = inlined_call_operand.vmem [shape: bf16[2,112,8], index: 0, kind: input, shape index: {}]   ;;  %s2486_s1 = inlined_call_operand.vmem [shape: bf16[9,8,128], index: 1, kind: input, shape index: {}]   ;;  %s2487_s2 = inlined_call_operand.vmem [shape: f32[1,128], index: 2, kind: input, shape index: {}]   ;;  %s2488_s3 = inlined_call_operand.vmem [shape: f32[2,80,128], index: 3, kind: output, shape index: {}]  }
   0x1   :  { %s2005_s14 = smov 0  }
   0x2 LB: > { %s25_s15 = sadd.s32 1, %s1973_s13  ;;  %p1568_p0 = scmp.ge.s32.totalorder %s1977_s14, 1  ;;  %s1977_s14 = sphi %s2005_s14, %s13_s14   ;;  %s1973_s13 = sphi %s2003_s13, %s2490_s13   ;;  %s1969_s12 = sphi %s2001_s12, %s2489_s12  }
   0x3   : > { %p27_p1 = scmp.ge.s32.totalorder %s25_s15, 2  ;;  %p151_p2 = scmp.lt.s32.totalorder %s1977_s14, 3 }
   0x5   : > { %s2492_s15 = smov (%p27_p1, %s25_s15), 0  ;;  %p152_p3 = pnand %p1568_p0, %p151_p2 }
   0x6   : > { %p179_p4 = scmp.lt.s32.totalorder (!%p152_p3), %s1969_s12, 1 }
   0x7   : > { %155 = sbr.rel (%p152_p3) target bundleno = 406 (0x196), region = 32 }
   0xc   : > { %v1571_v0 = vld [vmem:[%s2486_s1 + $0x4] sm:$0xf]  ;;  %vm298_vm0 = vcmask 1043456   ;;  %v1979_v1 = vmov 0.0   ;;  %s2494_s12 = smov (!%p179_p4, %s1969_s12), 1  ;;  %vm1980_vm1 = vmmov 0  }
   0xd   : > { %1704 = vmatprep.subr.bf16.mxu0 %v1979_v1  ;;  %1902 = vmatprep.subr.bf16.mxu1 %v1979_v1  ;;  %v300_v2 = vsel %vm298_vm0, %v1571_v0, 0  ;;  %s1904_s18 = smul.u32 56, %s2494_s12  ;;  %vm237_vm2 = vsmask.f32 7424  ;;  %v1588_v13 = vld [vmem:[%s2486_s1 + $0x8] sm:$0xf] }
   0xe   : > { %1705 = vmatpush3.bf16.msra.mxu0 %v300_v2  ;;  %1903 = vmatpush3.bf16.msra.mxu1 %v300_v2  ;;  %vm282_vm3 = vcmask 64512   ;;  %v205_v22 = vld [vmem:[%s2486_s1] sm:$0xf]  ;;  %v495_v26 = vsel %vm298_vm0, %v1588_v13, 0  ;;  %vm467_vm4 = vcmask 1046528   ;;  %vm900_vm6 = vcmask 1045504  }
   0xf   : > { %1706 = vmatprep.mubr.msk.bf16.mxu0 %vm1980_vm1, %v1979_v1  ;;  %1718 = vmatprep.mubr.msk.bf16.mxu1 %vm1980_vm1, %v1979_v1  ;;  %s2037_s21 = scalar_lea.vmem %s2485_s0, %s1904_s18  ;;  %v386_v31 = vsel %vm298_vm0, %v205_v22, 0  ;;  %v1595_v48 = vld [vmem:[%s2486_s1 + $0xc] sm:$0xf]  ;;  %v1607_v53 = vld [vmem:[%s2486_s1 + $0x10] sm:$0xf]  ;;  %vm1333_vm8 = vcmask 1044480  }
  0x10   : > { %1748 = vmatprep.subr.bf16.mxu0 %v1979_v1  ;;  %1726 = vmatprep.subr.bf16.mxu1 %v1979_v1  ;;  %v195_v3 = vld [vmem:[%s2037_s21] sm:$0xf]  ;;  %v2041_v4 = vld [vmem:[%s2037_s21 + $0x4] sm:$0xf]  ;;  %v2047_v6 = vld [vmem:[%s2037_s21 + $0x8] sm:$0xff]   ;;  %v648_v50 = vsel %vm298_vm0, %v1595_v48, 0 }
  0x11   : > { %v2044_v5 = vcombine.low %v195_v3, %v2041_v4  ;;  %v246_v9 = vshll.u32 %v2047_v6, 16  ;;  %v2053_v10 = vld [vmem:[%s2037_s21 + $0x18] sm:$0xff]   ;;  %v2056_v11 = vld [vmem:[%s2037_s21 + $0x20] sm:$0xff]   ;;  %v2059_v12 = vld [vmem:[%s2037_s21 + $0x10] sm:$0xff]   ;;  %v250_v23 = vshrl.u32 %v2047_v6, 16  ;;  %v469_v52 = vrot.slane %v2047_v6, 1 }
  0x12   : > { %v262_v16 = vshll.u32 %v2053_v10, 16  ;;  %v266_v17 = vshrl.u32 %v2053_v10, 16  ;;  %v270_v18 = vshll.u32 %v2056_v11, 16  ;;  %v2068_v19 = vld [vmem:[%s2037_s21 + $0x28] ss:$0 sps:$4 sm:$0x11]  }
  0x13   : > { %v239_v7 = vshrl.u32 %v2044_v5, 16  ;;  %v241_v8 = vshll.u32 %v2044_v5, 16  ;;  %v248_v15 = vrot.slane %v246_v9, 1  ;;  %v254_v24 = vshll.u32 %v2059_v12, 16  ;;  %v2092_v39 = vld [vmem:[%s2037_s21 + $0x24] sm:$0xff]   ;;  %v2163_v2 = vld [vmem:[%s2037_s21 + $0xc] sm:$0xff]  }
  0x14   : > { %v264_v21 = vrot.slane %v262_v16, 1  ;;  %v272_v25 = vrot.slane %v270_v18, 1  ;;  %v274_v29 = vshrl.u32 %v2056_v11, 16  ;;  %v278_v30 = vshll.u32 %v2068_v19, 16  ;;  %v461_v43 = vld [vmem:[%s2037_s21] sm:$0xe] }
  0x15   : > { %v243_v14 = vrot.slane %v241_v8, 1  ;;  %v252_v33 = vor.u32 %v250_v23, %v248_v15  ;;  %v256_v34 = vrot.slane %v254_v24, 1  ;;  %v258_v38 = vshrl.u32 %v2059_v12, 16  ;;  %v1944_v40 = vld [vmem:[%s2037_s21 + $0x2c] ss:$0 sps:$4 sm:$0x11]  }
  0x16   : > { %v268_v28 = vor.u32 %v266_v17, %v264_v21  ;;  %v276_v35 = vor.u32 %v274_v29, %v272_v25  ;;  %v280_v36 = vrot.slane %v278_v30, 1  ;;  %v628_v44 = vrot.slane %v2092_v39, 1  ;;  %v580_v61 = vld [vmem:[%s2037_s21 + $0x4] sm:$0xe]  ;;  %v2158_v62 = vld [vmem:[%s2037_s21 + $0x8] sm:$0xf] }
  0x17   : > { %v244_v20 = vor.u32 %v243_v14, %v239_v7  ;;  %v257_v37 = vsel %vm237_vm2, %v252_v33, %v256_v34  ;;  %v260_v42 = vor.u32 %v258_v38, %v256_v34  ;;  %v630_v45 = vrot.slane %v1944_v40, 1  ;;  %v2182_v18 = vld [vmem:[%s2037_s21 + $0x14] sm:$0xff]   ;;  %v2202_v30 = vld [vmem:[%s2037_s21 + $0x1c] sm:$0xff]   ;;  %v2226_v48 = vld [vmem:[%s2037_s21 + $0x2c] ss:$0 sps:$4 sm:$0x33]  }
  0x18   : > { %v273_v32 = vsel %vm237_vm2, %v268_v28, %v272_v25  ;;  %v281_v41 = vsel %vm237_vm2, %v276_v35, %v280_v36  ;;  %v1589_v49 = vcombine.low %v461_v43, %v2041_v4  ;;  %v809_v55 = vsel %vm298_vm0, %v1607_v53, 0  ;;  %v1621_v24 = vld [vmem:[%s2486_s1 + $0x18] sm:$0xf]  ;;  %v894_v53 = vld [vmem:[%s2037_s21 + $0x4] sm:$0xc]  ;;  %s1905_s11 = smul.u32 80, %s2494_s12 }
  0x19   : > { %v249_v27 = vsel %vm237_vm2, %v244_v20, %v248_v15  ;;  %1719 = vmatmul.mubr.msk.bf16.vlgmr.msra.gmra.mxu1 %vm282_vm3, %v273_v32  ;;  %v2107_v46 = vsel %vm467_vm4, %v628_v44, %v630_v45  ;;  %v265_v47 = vsel %vm237_vm2, %v260_v42, %v264_v21  ;;  %v471_v56 = vrot.slane %v2059_v12, 1 }
  0x1a   : > { %1707 = vmatmul.mubr.msk.bf16.vlgmr.msra.gmra.mxu0 %vm282_vm3, %v249_v27  ;;  %1727 = vmatpush3.bf16.msra.mxu1 %v386_v31  ;;  %v468_v51 = vrot.slane %v1589_v49, 1  ;;  %v473_v58 = vrot.slane %v2053_v10, 1  ;;  %v475_v60 = vrot.slane %v2056_v11, 1  ;;  %v1596_v0 = vcombine.low %v580_v61, %v2158_v62  ;;  %s2436_s20 = scalar_lea.vmem %s2488_s3, %s1905_s11 }
  0x1b   : > { %1749 = vmatpush3.bf16.msra.mxu0 %v495_v26  ;;  %1710 = vmatprep.mubr.msk.bf16.mxu0 %vm1980_vm1, %v1979_v1  ;;  %v472_v57 = vsel %vm467_vm4, %v469_v52, %v471_v56  ;;  %v477_v3 = vrot.slane %v2068_v19, 1  ;;  %v752_v7 = vshll.u32 %v2163_v2, 16  ;;  %v622_v9 = vrot.slane %v2163_v2, 1 }
  0x1c   : > { %1792 = vmatprep.subr.bf16.mxu0 %v1979_v1  ;;  %1722 = vmatprep.mubr.msk.bf16.mxu1 %vm1980_vm1, %v1979_v1  ;;  %v470_v54 = vsel %vm467_vm4, %v468_v51, %v469_v52  ;;  %v474_v59 = vsel %vm467_vm4, %v471_v56, %v473_v58  ;;  %v476_v63 = vsel %vm467_vm4, %v473_v58, %v475_v60  ;;  %v741_v4 = vshrl.u32 %v1596_v0, 16  ;;  %v1013_v58 = vld [vmem:[%s2037_s21 + $0x8] sm:$0xc] }
  0x1d   : > { %1770 = vmatprep.subr.bf16.mxu1 %v1979_v1  ;;  %v621_v8 = vrot.slane %v1596_v0, 1  ;;  %v754_v16 = vrot.slane %v752_v7, 2  ;;  %v758_v21 = vshrl.u32 %v2182_v18, 16  ;;  %v761_v22 = vshll.u32 %v2182_v18, 16  ;;  %v1640_v7 = vld [vmem:[%s2486_s1 + $0x20] sm:$0xf] }
  0x1e   : > { %v743_v13 = vrot.slane %v741_v4, 1  ;;  %vm739_vm5 = vsmask.f32 6400  ;;  %v624_v23 = vrot.slane %v2182_v18, 1  ;;  %v1081_v28 = vsel %vm298_vm0, %v1621_v24, 0 }
  0x1f   : > { %v623_v17 = vsel %vm467_vm4, %v621_v8, %v622_v9  ;;  %v760_v26 = vrot.slane %v758_v21, 1  ;;  %v763_v27 = vrot.slane %v761_v22, 2  ;;  %v767_v32 = vshrl.u32 %v2202_v30, 16 }
  0x20   : > { %v625_v29 = vsel %vm467_vm4, %v622_v9, %v624_v23  ;;  %v770_v33 = vshll.u32 %v2202_v30, 16  ;;  %v626_v34 = vrot.slane %v2202_v30, 1  ;;  %v779_v42 = vshll.u32 %v2092_v39, 16  ;;  %v2277_v9 = vld [vmem:[%s2037_s21 + $0x18] sm:$0xff]  }
  0x21   : > { %1723 = vmatmul.mubr.msk.bf16.gmra.mxu1 %vm282_vm3, %v281_v41  ;;  %v764_v31 = vor.u32 %v763_v27, %v760_v26  ;;  %v769_v36 = vrot.slane %v767_v32, 1  ;;  %v776_v41 = vshrl.u32 %v2092_v39, 16  ;;  %v785_v51 = vshrl.u32 %v2226_v48, 16 }
  0x22   : > { %1711 = vmatmul.mubr.msk.bf16.gmra.mxu0 %vm282_vm3, %v257_v37  ;;  %1728 = vmatprep.mubr.msk.bf16.mxu1 %vm1980_vm1, %v1979_v1  ;;  %v772_v37 = vrot.slane %v770_v33, 2  ;;  %v627_v38 = vsel %vm467_vm4, %v624_v23, %v626_v34  ;;  %v629_v49 = vsel %vm467_vm4, %v626_v34, %v628_v44  ;;  %v788_v52 = vshll.u32 %v2226_v48, 16 }
  0x23   : > { %1714 = vmatprep.mubr.msk.bf16.mxu0 %vm1980_vm1, %v1979_v1  ;;  %v778_v45 = vrot.slane %v776_v41, 1  ;;  %v1615_v56 = vcombine.low %v894_v53, %v2158_v62  ;;  %v902_v61 = vrot.slane %v2163_v2, 2  ;;  %v910_v23 = vrot.slane %v2226_v48, 2 }
  0x24   : > { %v773_v40 = vor.u32 %v772_v37, %v769_v36  ;;  %vm1172_vm7 = vsmask.f32 5376 }
  0x26   : > { %v774_v43 = vsel %vm739_vm5, %v764_v31, %v773_v40 }
  0x29   : > { %1729 = vmatmul.mubr.msk.bf16.vlgmr.msra.gmra.mxu1 %vm282_vm3, %v2044_v5  ;;  %v744_v5 = vshll.u32 %v1596_v0, 16 }
  0x2a   : > { %1715 = vmatmul.mubr.msk.bf16.gmra.mxu0 %vm282_vm3, %v265_v47  ;;  %1771 = vmatpush3.bf16.msra.mxu1 %v648_v50  ;;  %v781_v47 = vrot.slane %v779_v42, 2 }
  0x2b   : > { %1750 = vmatprep.mubr.msk.bf16.mxu0 %vm1980_vm1, %v1979_v1  ;;  %1732 = vmatprep.mubr.msk.bf16.mxu1 %vm1980_vm1, %v1979_v1  ;;  %v746_v14 = vrot.slane %v744_v5, 2 }
  0x2c   : > { %1814 = vmatprep.subr.bf16.mxu1 %v1979_v1  ;;  %v782_v50 = vor.u32 %v781_v47, %v778_v45 }
  0x2d   : > { %v747_v19 = vor.u32 %v746_v14, %v743_v13  ;;  %v1057_v13 = vrot.slane %v2277_v9, 2  ;;  %v906_v14 = vrot.slane %v2202_v30, 2 }
  0x2e   : > { %v783_v44 = vsel %vm739_vm5, %v773_v40, %v782_v50  ;;  %v1194_v40 = vshll.u32 %v2277_v9, 16 }
  0x30   : > { %v1196_v47 = vrot.slane %v1194_v40, 3 }
  0x31   : > { %1733 = vmatmul.mubr.msk.bf16.gmra.mxu1 %vm282_vm3, %v2047_v6  ;;  %v749_v6 = vshrl.u32 %v2163_v2, 16 }
  0x32   : > { %1751 = vmatmul.mubr.msk.bf16.vlgmr.msra.gmra.mxu0 %vm282_vm3, %v470_v54  ;;  %1736 = vmatprep.mubr.msk.bf16.mxu1 %vm1980_vm1, %v1979_v1  ;;  %v787_v54 = vrot.slane %v785_v51, 1 }
  0x33   : > { %1793 = vmatpush3.bf16.msra.mxu0 %v809_v55  ;;  %1754 = vmatprep.mubr.msk.bf16.mxu0 %vm1980_vm1, %v1979_v1  ;;  %v751_v15 = vrot.slane %v749_v6, 1  ;;  %v790_v55 = vrot.slane %v788_v52, 2  ;;  %v904_v6 = vrot.slane %v2182_v18, 2 }
  0x34   : > { %1836 = vmatprep.subr.bf16.mxu0 %v1979_v1 }
  0x35   : > { %v755_v20 = vor.u32 %v754_v16, %v751_v15  ;;  %v2291_v16 = vld [vmem:[%s2037_s21 + $0x20] sm:$0xff]  }
  0x36   : > { %v1059_v18 = vrot.slane %v2291_v16, 2  ;;  %v1200_v51 = vshrl.u32 %v2291_v16, 16  ;;  %v1203_v52 = vshll.u32 %v2291_v16, 16 }
  0x37   : > { %v756_v25 = vsel %vm739_vm5, %v747_v19, %v755_v20  ;;  %v765_v35 = vsel %vm739_vm5, %v755_v20, %v764_v31  ;;  %v2304_v20 = vld [vmem:[%s2037_s21 + $0x28] sm:$0xff]  }
  0x38   : > { %v1060_v19 = vsel %vm900_vm6, %v1057_v13, %v1059_v18  ;;  %v1061_v22 = vrot.slane %v2304_v20, 2 }
  0x39   : > { %1737 = vmatmul.mubr.msk.bf16.gmra.mxu1 %vm282_vm3, %v2059_v12  ;;  %v1614_v12 = vld [vmem:[%s2486_s1 + $0x14] sm:$0xf] }
  0x3a   : > { %1755 = vmatmul.mubr.msk.bf16.gmra.mxu0 %vm282_vm3, %v472_v57  ;;  %1740 = vmatprep.mubr.msk.bf16.mxu1 %vm1980_vm1, %v1979_v1  ;;  %v791_v57 = vor.u32 %v790_v55, %v787_v54  ;;  %v1062_v27 = vsel %vm900_vm6, %v1059_v18, %v1061_v22  ;;  %v1202_v54 = vrot.slane %v1200_v51, 2  ;;  %v1205_v55 = vrot.slane %v1203_v52, 3 }
  0x3b   : > { %1758 = vmatprep.mubr.msk.bf16.mxu0 %vm1980_vm1, %v1979_v1 }
  0x3c   : > { %v792_v62 = vsel %vm739_vm5, %v782_v50, %v791_v57  ;;  %v1206_v57 = vor.u32 %v1205_v55, %v1202_v54 }
  0x41   : > { %1741 = vmatmul.mubr.msk.bf16.gmra.mxu1 %vm282_vm3, %v2053_v10  ;;  %v478_v10 = vsel %vm467_vm4, %v475_v60, %v477_v3  ;;  %v901_v60 = vrot.slane %v1615_v56, 2  ;;  %v1337_v56 = vrot.slane %v2277_v9, 3 }
  0x42   : > { %1759 = vmatmul.mubr.msk.bf16.gmra.mxu0 %vm282_vm3, %v474_v59  ;;  %1744 = vmatprep.mubr.msk.bf16.mxu1 %vm1980_vm1, %v1979_v1  ;;  %v2249_v59 = vld [vmem:[%s2037_s21 + $0xc] sm:$0xf] }
  0x43   : > { %1762 = vmatprep.mubr.msk.bf16.mxu0 %vm1980_vm1, %v1979_v1  ;;  %v1622_v0 = vcombine.low %v1013_v58, %v2249_v59  ;;  %v903_v3 = vsel %vm900_vm6, %v901_v60, %v902_v61  ;;  %v1209_v58 = vshrl.u32 %v2304_v20, 16 }
  0x45   : > { %v1054_v2 = vrot.slane %v1622_v0, 2  ;;  %v1177_v24 = vshll.u32 %v1622_v0, 16 }
  0x47   : > { %v1179_v31 = vrot.slane %v1177_v24, 3 }
  0x49   : > { %1745 = vmatmul.mubr.msk.bf16.gmra.mxu1 %vm282_vm3, %v2056_v11  ;;  %v928_v11 = vsel %vm298_vm0, %v1614_v12, 0  ;;  %v905_v12 = vsel %vm900_vm6, %v902_v61, %v904_v6 }
  0x4a   : > { %1763 = vmatmul.mubr.msk.bf16.gmra.mxu0 %vm282_vm3, %v476_v63  ;;  %1772 = vmatprep.mubr.msk.bf16.mxu1 %vm1980_vm1, %v1979_v1  ;;  %v1633_v63 = vld [vmem:[%s2486_s1 + $0x1c] sm:$0xf] }
  0x4b   : > { %1766 = vmatprep.mubr.msk.bf16.mxu0 %vm1980_vm1, %v1979_v1  ;;  %v1242_v4 = vsel %vm298_vm0, %v1633_v63, 0 }
  0x51   : > { %1773 = vmatmul.mubr.msk.bf16.vlgmr.msra.gmra.mxu1 %vm282_vm3, %v623_v17  ;;  %v907_v17 = vsel %vm900_vm6, %v904_v6, %v906_v14 }
  0x52   : > { %1767 = vmatmul.mubr.msk.bf16.gmra.mxu0 %vm282_vm3, %v478_v10  ;;  %1815 = vmatpush3.bf16.msra.mxu1 %v928_v11  ;;  %v1361_v10 = vsel %vm298_vm0, %v1640_v7, 0  ;;  %v908_v11 = vrot.slane %v2092_v39, 2  ;;  %v1174_v39 = vshrl.u32 %v1622_v0, 16  ;;  %v1954_v0 = vld [vmem:[%s2037_s21 + $0x30] ss:$0 sps:$4 sm:$0x77]  }
  0x53   : > { %1794 = vmatprep.mubr.msk.bf16.mxu0 %vm1980_vm1, %v1979_v1  ;;  %1776 = vmatprep.mubr.msk.bf16.mxu1 %vm1980_vm1, %v1979_v1 }
  0x54   : > { %1858 = vmatprep.subr.bf16.mxu1 %v1979_v1  ;;  %v909_v21 = vsel %vm900_vm6, %v906_v14, %v908_v11  ;;  %v1176_v30 = vrot.slane %v1174_v39, 2  ;;  %v1343_v14 = vrot.slane %v1954_v0, 3 }
  0x56   : > { %v1180_v36 = vor.u32 %v1179_v31, %v1176_v30 }
  0x59   : > { %1777 = vmatmul.mubr.msk.bf16.gmra.mxu1 %vm282_vm3, %v625_v29  ;;  %v911_v29 = vsel %vm900_vm6, %v908_v11, %v910_v23 }
  0x5a   : > { %1795 = vmatmul.mubr.msk.bf16.vlgmr.msra.gmra.mxu0 %vm282_vm3, %v756_v25  ;;  %1780 = vmatprep.mubr.msk.bf16.mxu1 %vm1980_vm1, %v1979_v1 }
  0x5b   : > { %1837 = vmatpush3.bf16.msra.mxu0 %v1081_v28  ;;  %1798 = vmatprep.mubr.msk.bf16.mxu0 %vm1980_vm1, %v1979_v1  ;;  %v1952_v28 = vld [vmem:[%s2037_s21 + $0x30] ss:$0 sps:$4 sm:$0x33]  }
  0x5c   : > { %1880 = vmatprep.subr.bf16.mxu0 %v1979_v1  ;;  %v1063_v34 = vrot.slane %v1952_v28, 2 }
  0x5e   : > { %v1064_v41 = vsel %vm900_vm6, %v1061_v22, %v1063_v34 }
  0x61   : > { %1781 = vmatmul.mubr.msk.bf16.gmra.mxu1 %vm282_vm3, %v627_v38  ;;  %v1191_v38 = vshrl.u32 %v2277_v9, 16  ;;  %v1341_v9 = vrot.slane %v2304_v20, 3 }
  0x62   : > { %1799 = vmatmul.mubr.msk.bf16.gmra.mxu0 %vm282_vm3, %v765_v35  ;;  %1784 = vmatprep.mubr.msk.bf16.mxu1 %vm1980_vm1, %v1979_v1  ;;  %v1327_v35 = vld [vmem:[%s2037_s21 + $0x8] sm:$0x8] }
  0x63   : > { %1802 = vmatprep.mubr.msk.bf16.mxu0 %vm1980_vm1, %v1979_v1  ;;  %v1641_v42 = vcombine.low %v1327_v35, %v2249_v59  ;;  %v1193_v45 = vrot.slane %v1191_v38, 2  ;;  %v1212_v59 = vshll.u32 %v2304_v20, 16 }
  0x65   : > { %v1334_v48 = vrot.slane %v1641_v42, 3  ;;  %v1197_v50 = vor.u32 %v1196_v47, %v1193_v45  ;;  %v1214_v63 = vrot.slane %v1212_v59, 3 }
  0x67   : > { %v1207_v61 = vsel %vm1172_vm7, %v1197_v50, %v1206_v57 }
  0x69   : > { %1785 = vmatmul.mubr.msk.bf16.gmra.mxu1 %vm282_vm3, %v629_v49 }
  0x6a   : > { %1803 = vmatmul.mubr.msk.bf16.gmra.mxu0 %vm282_vm3, %v774_v43  ;;  %1788 = vmatprep.mubr.msk.bf16.mxu1 %vm1980_vm1, %v1979_v1 }
  0x6b   : > { %1806 = vmatprep.mubr.msk.bf16.mxu0 %vm1980_vm1, %v1979_v1 }
  0x71   : > { %1789 = vmatmul.mubr.msk.bf16.gmra.mxu1 %vm282_vm3, %v2107_v46  ;;  %v2260_v46 = vld [vmem:[%s2037_s21 + $0x10] sm:$0xff]  }
  0x72   : > { %1807 = vmatmul.mubr.msk.bf16.gmra.mxu0 %vm282_vm3, %v783_v44  ;;  %1816 = vmatprep.mubr.msk.bf16.mxu1 %vm1980_vm1, %v1979_v1  ;;  %v1055_v5 = vrot.slane %v2260_v46, 2  ;;  %v1182_v25 = vshrl.u32 %v2260_v46, 16  ;;  %v1185_v26 = vshll.u32 %v2260_v46, 16  ;;  %v1335_v49 = vrot.slane %v2260_v46, 3 }
  0x73   : > { %1810 = vmatprep.mubr.msk.bf16.mxu0 %vm1980_vm1, %v1979_v1  ;;  %v1339_v46 = vrot.slane %v2291_v16, 3 }
  0x74   : > { %v1056_v8 = vsel %vm900_vm6, %v1054_v2, %v1055_v5  ;;  %v1058_v15 = vsel %vm900_vm6, %v1055_v5, %v1057_v13  ;;  %v1184_v32 = vrot.slane %v1182_v25, 2  ;;  %v1187_v33 = vrot.slane %v1185_v26, 3 }
  0x75   : > { %v1336_v53 = vsel %vm1333_vm8, %v1334_v48, %v1335_v49  ;;  %v1338_v60 = vsel %vm1333_vm8, %v1335_v49, %v1337_v56  ;;  %v1221_v2 = vshll.u32 %v1954_v0, 16  ;;  %v1340_v5 = vsel %vm1333_vm8, %v1337_v56, %v1339_v46 }
  0x76   : > { %v1188_v37 = vor.u32 %v1187_v33, %v1184_v32 }
  0x78   : > { %v1189_v43 = vsel %vm1172_vm7, %v1180_v36, %v1188_v37  ;;  %v1198_v44 = vsel %vm1172_vm7, %v1188_v37, %v1197_v50 }
  0x79   : > { %1817 = vmatmul.mubr.msk.bf16.vlgmr.msra.gmra.mxu1 %vm282_vm3, %v903_v3 }
  0x7a   : > { %1811 = vmatmul.mubr.msk.bf16.gmra.mxu0 %vm282_vm3, %v792_v62  ;;  %1859 = vmatpush3.bf16.msra.mxu1 %v1242_v4  ;;  %v1211_v62 = vrot.slane %v1209_v58, 2  ;;  %v1218_v4 = vshrl.u32 %v1954_v0, 16 }
  0x7b   : > { %1838 = vmatprep.mubr.msk.bf16.mxu0 %vm1980_vm1, %v1979_v1  ;;  %1820 = vmatprep.mubr.msk.bf16.mxu1 %vm1980_vm1, %v1979_v1 }
  0x7c   : > { %v1215_v3 = vor.u32 %v1214_v63, %v1211_v62  ;;  %v1220_v7 = vrot.slane %v1218_v4, 2 }
  0x7e   : > { %v1216_v6 = vsel %vm1172_vm7, %v1206_v57, %v1215_v3 }
  0x81   : > { %1821 = vmatmul.mubr.msk.bf16.gmra.mxu1 %vm282_vm3, %v905_v12  ;;  %v1342_v12 = vsel %vm1333_vm8, %v1339_v46, %v1341_v9 }
  0x82   : > { %1839 = vmatmul.mubr.msk.bf16.vlgmr.msra.gmra.mxu0 %vm282_vm3, %v1056_v8  ;;  %1824 = vmatprep.mubr.msk.bf16.mxu1 %vm1980_vm1, %v1979_v1  ;;  %v1223_v8 = vrot.slane %v1221_v2, 3 }
  0x83   : > { %1881 = vmatpush3.bf16.msra.mxu0 %v1361_v10  ;;  %1842 = vmatprep.mubr.msk.bf16.mxu0 %vm1980_vm1, %v1979_v1 }
  0x84   : > { %v1224_v10 = vor.u32 %v1223_v8, %v1220_v7 }
  0x86   : > { %v1225_v13 = vsel %vm1172_vm7, %v1215_v3, %v1224_v10 }
  0x89   : > { %1825 = vmatmul.mubr.msk.bf16.gmra.mxu1 %vm282_vm3, %v907_v17 }
  0x8a   : > { %1843 = vmatmul.mubr.msk.bf16.gmra.mxu0 %vm282_vm3, %v1058_v15  ;;  %1828 = vmatprep.mubr.msk.bf16.mxu1 %vm1980_vm1, %v1979_v1  ;;  %v1344_v15 = vsel %vm1333_vm8, %v1341_v9, %v1343_v14 }
  0x8b   : > { %1846 = vmatprep.mubr.msk.bf16.mxu0 %vm1980_vm1, %v1979_v1 }
  0x91   : > { %1829 = vmatmul.mubr.msk.bf16.gmra.mxu1 %vm282_vm3, %v909_v21 }
  0x92   : > { %1847 = vmatmul.mubr.msk.bf16.gmra.mxu0 %vm282_vm3, %v1060_v19  ;;  %1832 = vmatprep.mubr.msk.bf16.mxu1 %vm1980_vm1, %v1979_v1 }
  0x93   : > { %1850 = vmatprep.mubr.msk.bf16.mxu0 %vm1980_vm1, %v1979_v1 }
  0x99   : > { %1833 = vmatmul.mubr.msk.bf16.gmra.mxu1 %vm282_vm3, %v911_v29 }
  0x9a   : > { %1851 = vmatmul.mubr.msk.bf16.gmra.mxu0 %vm282_vm3, %v1062_v27  ;;  %1860 = vmatprep.mubr.msk.bf16.mxu1 %vm1980_vm1, %v1979_v1 }
  0x9b   : > { %1854 = vmatprep.mubr.msk.bf16.mxu0 %vm1980_vm1, %v1979_v1 }
  0xa1   : > { %1861 = vmatmul.mubr.msk.bf16.vlgmr.msra.gmra.mxu1 %vm282_vm3, %v1189_v43 }
  0xa2   : > { %1855 = vmatmul.mubr.msk.bf16.gmra.mxu0 %vm282_vm3, %v1064_v41  ;;  %1864 = vmatprep.mubr.msk.bf16.mxu1 %vm1980_vm1, %v1979_v1 }
  0xa3   : > { %1882 = vmatprep.mubr.msk.bf16.mxu0 %vm1980_vm1, %v1979_v1 }
  0xa9   : > { %1865 = vmatmul.mubr.msk.bf16.gmra.mxu1 %vm282_vm3, %v1198_v44 }
  0xaa   : > { %1883 = vmatmul.mubr.msk.bf16.vlgmr.msra.gmra.mxu0 %vm282_vm3, %v1336_v53  ;;  %1868 = vmatprep.mubr.msk.bf16.mxu1 %vm1980_vm1, %v1979_v1 }
  0xab   : > { %1886 = vmatprep.mubr.msk.bf16.mxu0 %vm1980_vm1, %v1979_v1 }
  0xb1   : > { %1869 = vmatmul.mubr.msk.bf16.gmra.mxu1 %vm282_vm3, %v1207_v61 }
  0xb2   : > { %1887 = vmatmul.mubr.msk.bf16.gmra.mxu0 %vm282_vm3, %v1338_v60  ;;  %1872 = vmatprep.mubr.msk.bf16.mxu1 %vm1980_vm1, %v1979_v1 }
  0xb3   : > { %1890 = vmatprep.mubr.msk.bf16.mxu0 %vm1980_vm1, %v1979_v1 }
  0xb9   : > { %1873 = vmatmul.mubr.msk.bf16.gmra.mxu1 %vm282_vm3, %v1216_v6 }
  0xba   : > { %1891 = vmatmul.mubr.msk.bf16.gmra.mxu0 %vm282_vm3, %v1340_v5  ;;  %1876 = vmatprep.mubr.msk.bf16.mxu1 %vm1980_vm1, %v1979_v1 }
  0xbb   : > { %1894 = vmatprep.mubr.msk.bf16.mxu0 %vm1980_vm1, %v1979_v1 }
  0xc1   : > { %1877 = vmatmul.mubr.msk.bf16.gmra.mxu1 %vm282_vm3, %v1225_v13 }
  0xc2   : > { %1895 = vmatmul.mubr.msk.bf16.gmra.mxu0 %vm282_vm3, %v1342_v12 }
  0xc3   : > { %1898 = vmatprep.mubr.msk.bf16.mxu0 %vm1980_vm1, %v1979_v1 }
  0xca   : > { %1899 = vmatmul.mubr.msk.bf16.gmra.mxu0 %vm282_vm3, %v1344_v15 }
  0xd9   : > { %v360_v17 = vpop.f32.mrf.mxu1 }
  0xda   : > { %v336_v16 = vpop.f32.mrf.mxu0 }
  0xdb   : > { %v1720_v11 = vpop.f32.mrf.mxu1 }
  0xdc   : > { %v1708_v18 = vpop.f32.mrf.mxu0 }
  0xdd   : > { %v363_v20 = vpop.f32.mrf.mxu1 }
  0xde   : > { %v339_v19 = vpop.f32.mrf.mxu0 }
  0xdf   : > { %v1721_v22 = vpop.f32.mrf.mxu1 }
  0xe0   : > { %v1709_v21 = vpop.f32.mrf.mxu0 }
  0xe1   : > { %v368_v39 = vpop.f32.mrf.mxu1 }
  0xe2   : > { %v344_v23 = vpop.f32.mrf.mxu0 }
  0xe3   : > { %v1724_v25 = vpop.f32.mrf.mxu1 }
  0xe4   : > { %v1712_v24 = vpop.f32.mrf.mxu0 }
  0xe5   : > { %v371_v26 = vpop.f32.mrf.mxu1 }
  0xe6   : > { %v347_v1 = vpop.f32.mrf.mxu0 }
  0xe7   : > { %v1725_v28 = vpop.f32.mrf.mxu1 }
  0xe8   : > { %v1713_v27 = vpop.f32.mrf.mxu0 }
  0xe9   : > { %v422_v30 = vpop.f32.mrf.mxu1 }
  0xea   : > { %v352_v29 = vpop.f32.mrf.mxu0  ;;  %v423_v32 = vadd.f32 %v422_v30, %v336_v16 }
  0xeb   : > { %v1730_v33 = vpop.f32.mrf.mxu1 }
  0xec   : > { %v1716_v31 = vpop.f32.mrf.mxu0 }
  0xed   : > { %v425_v35 = vpop.f32.mrf.mxu1 }
  0xee   : > { %v355_v34 = vpop.f32.mrf.mxu0  ;;  %v426_v37 = vadd.f32 %v425_v35, %v339_v19 }
  0xef   : > { %v1731_v38 = vpop.f32.mrf.mxu1 }
  0xf0   : > { %v1717_v36 = vpop.f32.mrf.mxu0 }
  0xf1   : > { %v430_v42 = vpop.f32.mrf.mxu1 }
  0xf2   : > { %v531_v40 = vpop.f32.mrf.mxu0  ;;  %v431_v45 = vadd.f32 %v430_v42, %v344_v23 }
  0xf3   : > { %v570_v41 = vadd.f32 %v531_v40, %v423_v32  ;;  %v1734_v47 = vpop.f32.mrf.mxu1 }
  0xf4   : > { %v1752_v43 = vpop.f32.mrf.mxu0 }
  0xf5   : > { %v433_v50 = vpop.f32.mrf.mxu1 }
  0xf6   : > { %v534_v48 = vpop.f32.mrf.mxu0  ;;  %v434_v52 = vadd.f32 %v433_v50, %v347_v1 }
  0xf7   : > { %v571_v49 = vadd.f32 %v534_v48, %v426_v37  ;;  %v1735_v53 = vpop.f32.mrf.mxu1 }
  0xf8   : > { %v1753_v51 = vpop.f32.mrf.mxu0 }
  0xf9   : > { %v438_v55 = vpop.f32.mrf.mxu1 }
  0xfa   : > { %v539_v44 = vpop.f32.mrf.mxu0  ;;  %v439_v57 = vadd.f32 %v438_v55, %v352_v29 }
  0xfb   : > { %v572_v54 = vadd.f32 %v539_v44, %v431_v45  ;;  %v1738_v58 = vpop.f32.mrf.mxu1 }
  0xfc   : > { %v1756_v56 = vpop.f32.mrf.mxu0 }
  0xfd   : > { %v441_v61 = vpop.f32.mrf.mxu1 }
  0xfe   : > { %v542_v59 = vpop.f32.mrf.mxu0  ;;  %v442_v63 = vadd.f32 %v441_v61, %v355_v34 }
  0xff   : > { %v573_v60 = vadd.f32 %v542_v59, %v434_v52  ;;  %v1739_v0 = vpop.f32.mrf.mxu1 }
 0x100   : > { %v1757_v62 = vpop.f32.mrf.mxu0 }
 0x101   : > { %v446_v4 = vpop.f32.mrf.mxu1 }
 0x102   : > { %v547_v46 = vpop.f32.mrf.mxu0  ;;  %v447_v5 = vadd.f32 %v446_v4, %v360_v17 }
 0x103   : > { %v574_v3 = vadd.f32 %v547_v46, %v439_v57  ;;  %v1742_v6 = vpop.f32.mrf.mxu1 }
 0x104   : > { %v1760_v2 = vpop.f32.mrf.mxu0 }
 0x105   : > { %v449_v9 = vpop.f32.mrf.mxu1 }
 0x106   : > { %v550_v7 = vpop.f32.mrf.mxu0  ;;  %v450_v12 = vadd.f32 %v449_v9, %v363_v20 }
 0x107   : > { %v575_v8 = vadd.f32 %v550_v7, %v442_v63  ;;  %v1743_v13 = vpop.f32.mrf.mxu1 }
 0x108   : > { %v1761_v10 = vpop.f32.mrf.mxu0 }
 0x109   : > { %v454_v16 = vpop.f32.mrf.mxu1 }
 0x10a   : > { %v555_v14 = vpop.f32.mrf.mxu0  ;;  %v455_v11 = vadd.f32 %v454_v16, %v368_v39 }
 0x10b   : > { %v576_v15 = vadd.f32 %v555_v14, %v447_v5  ;;  %v1746_v19 = vpop.f32.mrf.mxu1 }
 0x10c   : > { %v1764_v18 = vpop.f32.mrf.mxu0 }
 0x10d   : > { %v457_v23 = vpop.f32.mrf.mxu1 }
 0x10e   : > { %v558_v21 = vpop.f32.mrf.mxu0  ;;  %v458_v25 = vadd.f32 %v457_v23, %v371_v26 }
 0x10f   : > { %v577_v22 = vadd.f32 %v558_v21, %v450_v12  ;;  %v1747_v1 = vpop.f32.mrf.mxu1 }
 0x110   : > { %v1765_v24 = vpop.f32.mrf.mxu0 }
 0x111   : > { %v684_v28 = vpop.f32.mrf.mxu1 }
 0x112   : > { %v563_v17 = vpop.f32.mrf.mxu0  ;;  %v723_v30 = vadd.f32 %v684_v28, %v570_v41 }
 0x113   : > { %v578_v27 = vadd.f32 %v563_v17, %v455_v11  ;;  %v1774_v31 = vpop.f32.mrf.mxu1 }
 0x114   : > { %v1768_v29 = vpop.f32.mrf.mxu0 }
 0x115   : > { %v687_v33 = vpop.f32.mrf.mxu1 }
 0x116   : > { %v566_v20 = vpop.f32.mrf.mxu0  ;;  %v724_v35 = vadd.f32 %v687_v33, %v571_v49 }
 0x117   : > { %v579_v32 = vadd.f32 %v566_v20, %v458_v25  ;;  %v1775_v36 = vpop.f32.mrf.mxu1 }
 0x118   : > { %v1769_v34 = vpop.f32.mrf.mxu0 }
 0x119   : > { %v692_v38 = vpop.f32.mrf.mxu1 }
 0x11a   : > { %v845_v39 = vpop.f32.mrf.mxu0  ;;  %v725_v42 = vadd.f32 %v692_v38, %v572_v54 }
 0x11b   : > { %v2379_v37 = vadd.f32 %v845_v39, %v723_v30  ;;  %v1778_v26 = vpop.f32.mrf.mxu1 }
 0x11c   : > { %v1796_v40 = vpop.f32.mrf.mxu0 }
 0x11d   : > { %v695_v47 = vpop.f32.mrf.mxu1 }
 0x11e   : > { %v848_v43 = vpop.f32.mrf.mxu0  ;;  %v726_v41 = vadd.f32 %v695_v47, %v573_v60 }
 0x11f   : > { %v2381_v45 = vadd.f32 %v848_v43, %v724_v35  ;;  %v1779_v50 = vpop.f32.mrf.mxu1 }
 0x120   : > { %v1797_v48 = vpop.f32.mrf.mxu0 }
 0x121   : > { %v700_v53 = vpop.f32.mrf.mxu1 }
 0x122   : > { %v853_v51 = vpop.f32.mrf.mxu0  ;;  %v727_v44 = vadd.f32 %v700_v53, %v574_v3 }
 0x123   : > { %v2383_v52 = vadd.f32 %v853_v51, %v725_v42  ;;  %v1782_v55 = vpop.f32.mrf.mxu1 }
 0x124   : > { %v1800_v49 = vpop.f32.mrf.mxu0 }
 0x125   : > { %v703_v58 = vpop.f32.mrf.mxu1 }
 0x126   : > { %v856_v56 = vpop.f32.mrf.mxu0  ;;  %v728_v59 = vadd.f32 %v703_v58, %v575_v8 }
 0x127   : > { %v2385_v57 = vadd.f32 %v856_v56, %v726_v41  ;;  %v1783_v61 = vpop.f32.mrf.mxu1 }
 0x128   : > { %v1801_v54 = vpop.f32.mrf.mxu0 }
 0x129   : > { %v708_v0 = vpop.f32.mrf.mxu1 }
 0x12a   : > { %v861_v62 = vpop.f32.mrf.mxu0  ;;  %v729_v46 = vadd.f32 %v708_v0, %v576_v15 }
 0x12b   : > { %v2387_v63 = vadd.f32 %v861_v62, %v727_v44  ;;  %v1786_v4 = vpop.f32.mrf.mxu1 }
 0x12c   : > { %v1804_v60 = vpop.f32.mrf.mxu0 }
 0x12d   : > { %v711_v6 = vpop.f32.mrf.mxu1 }
 0x12e   : > { %v864_v2 = vpop.f32.mrf.mxu0  ;;  %v730_v7 = vadd.f32 %v711_v6, %v577_v22 }
 0x12f   : > { %v2389_v5 = vadd.f32 %v864_v2, %v728_v59  ;;  %v1787_v9 = vpop.f32.mrf.mxu1 }
 0x130   : > { %v1805_v3 = vpop.f32.mrf.mxu0 }
 0x131   : > { %v716_v13 = vpop.f32.mrf.mxu1 }
 0x132   : > { %v869_v10 = vpop.f32.mrf.mxu0  ;;  %v731_v14 = vadd.f32 %v716_v13, %v578_v27 }
 0x133   : > { %v2391_v12 = vadd.f32 %v869_v10, %v729_v46  ;;  %v1790_v16 = vpop.f32.mrf.mxu1 }
 0x134   : > { %v1808_v8 = vpop.f32.mrf.mxu0 }
 0x135   : > { %v719_v19 = vpop.f32.mrf.mxu1 }
 0x136   : > { %v872_v18 = vpop.f32.mrf.mxu0  ;;  %v732_v21 = vadd.f32 %v719_v19, %v579_v32 }
 0x137   : > { %v2393_v11 = vadd.f32 %v872_v18, %v730_v7  ;;  %v1791_v23 = vpop.f32.mrf.mxu1 }
 0x138   : > { %v1809_v15 = vpop.f32.mrf.mxu0  ;;  %v2429_v23 = vld [vmem:[%s2487_s2] ss:$0 sm:$0xff] }
 0x139   : > { %v964_v1 = vpop.f32.mrf.mxu1 }
 0x13a   : > { %v877_v24 = vpop.f32.mrf.mxu0  ;;  %v1003_v9 = vadd.f32 %v964_v1, %v2379_v37 }
 0x13b   : > { %v2395_v25 = vadd.f32 %v877_v24, %v731_v14  ;;  %v1818_v17 = vpop.f32.mrf.mxu1 }
 0x13c   : > { %v1812_v22 = vpop.f32.mrf.mxu0 }
 0x13d   : > { %v967_v30 = vpop.f32.mrf.mxu1 }
 0x13e   : > { %v880_v28 = vpop.f32.mrf.mxu0  ;;  %v1004_v18 = vadd.f32 %v967_v30, %v2381_v45 }
 0x13f   : > { %v2397_v29 = vadd.f32 %v880_v28, %v732_v21  ;;  %v1819_v27 = vpop.f32.mrf.mxu1 }
 0x140   : > { %v1813_v31 = vpop.f32.mrf.mxu0 }
 0x141   : > { %v972_v33 = vpop.f32.mrf.mxu1 }
 0x142   : > { %v1117_v20 = vpop.f32.mrf.mxu0  ;;  %v1005_v17 = vadd.f32 %v972_v33, %v2383_v52 }
 0x143   : > { %v1822_v35 = vpop.f32.mrf.mxu1  ;;  %v1156_v8 = vadd.f32 %v1117_v20, %v1003_v9 }
 0x144   : > { %v1840_v34 = vpop.f32.mrf.mxu0 }
 0x145   : > { %v975_v39 = vpop.f32.mrf.mxu1 }
 0x146   : > { %v1120_v36 = vpop.f32.mrf.mxu0 }
 0x147   : > { %v1823_v38 = vpop.f32.mrf.mxu1  ;;  %v1157_v24 = vadd.f32 %v1120_v36, %v1004_v18 }
 0x148   : > { %v1841_v32 = vpop.f32.mrf.mxu0 }
 0x149   : > { %v2399_v42 = vpop.f32.mrf.mxu1  ;;  %v1006_v32 = vadd.f32 %v975_v39, %v2385_v57 }
 0x14a   : > { %v1125_v40 = vpop.f32.mrf.mxu0 }
 0x14b   : > { %v1826_v43 = vpop.f32.mrf.mxu1  ;;  %v1158_v27 = vadd.f32 %v1125_v40, %v1005_v17  ;;  %v1007_v40 = vadd.f32 %v2399_v42, %v2387_v63 }
 0x14c   : > { %v1844_v26 = vpop.f32.mrf.mxu0 }
 0x14d   : > { %v2401_v48 = vpop.f32.mrf.mxu1 }
 0x14e   : > { %v1128_v47 = vpop.f32.mrf.mxu0 }
 0x14f   : > { %v1827_v50 = vpop.f32.mrf.mxu1  ;;  %v1159_v43 = vadd.f32 %v1128_v47, %v1006_v32 }
 0x150   : > { %v1845_v41 = vpop.f32.mrf.mxu0 }
 0x151   : > { %v2405_v53 = vpop.f32.mrf.mxu1 }
 0x152   : > { %v2403_v51 = vpop.f32.mrf.mxu0  ;;  %v1009_v18 = vadd.f32 %v2405_v53, %v2391_v12 }
 0x153   : > { %v1830_v44 = vpop.f32.mrf.mxu1 }
 0x154   : > { %v1848_v49 = vpop.f32.mrf.mxu0 }
 0x155   : > { %v2409_v56 = vpop.f32.mrf.mxu1 }
 0x156   : > { %v2407_v55 = vpop.f32.mrf.mxu0 }
 0x157   : > { %v1831_v54 = vpop.f32.mrf.mxu1 }
 0x158   : > { %v1849_v58 = vpop.f32.mrf.mxu0 }
 0x159   : > { %v2413_v61 = vpop.f32.mrf.mxu1 }
 0x15a   : > { %v2411_v59 = vpop.f32.mrf.mxu0 }
 0x15b   : > { %v1834_v0 = vpop.f32.mrf.mxu1 }
 0x15c   : > { %v1852_v62 = vpop.f32.mrf.mxu0 }
 0x15d   : > { %v2417_v46 = vpop.f32.mrf.mxu1  ;;  %v1160_v62 = vadd.f32 %v2403_v51, %v1007_v40 }
 0x15e   : > { %v2415_v60 = vpop.f32.mrf.mxu0 }
 0x15f   : > { %v1835_v2 = vpop.f32.mrf.mxu1 }
 0x160   : > { %v1853_v4 = vpop.f32.mrf.mxu0 }
 0x161   : > { %v1278_v3 = vpop.f32.mrf.mxu1 }
 0x162   : > { %v2419_v6 = vpop.f32.mrf.mxu0  ;;  %v1317_v19 = vadd.f32 %v1278_v3, %v1156_v8  ;;  %v1008_v3 = vadd.f32 %v2401_v48, %v2389_v5 }
 0x163   : > { %v1862_v10 = vpop.f32.mrf.mxu1 }
 0x164   : > { %v1856_v7 = vpop.f32.mrf.mxu0  ;;  %v1161_v10 = vadd.f32 %v2407_v55, %v1008_v3 }
 0x165   : > { %v1281_v14 = vpop.f32.mrf.mxu1 }
 0x166   : > { %v2422_v13 = vpop.f32.mrf.mxu0  ;;  %v1318_v28 = vadd.f32 %v1281_v14, %v1157_v24 }
 0x167   : > { %v1863_v15 = vpop.f32.mrf.mxu1 }
 0x168   : > { %v1857_v16 = vpop.f32.mrf.mxu0 }
 0x169   : > { %v1286_v37 = vpop.f32.mrf.mxu1 }
 0x16a   : > { %v1397_v21 = vpop.f32.mrf.mxu0  ;;  %v1319_v52 = vadd.f32 %v1286_v37, %v1158_v27 }
 0x16b   : > { %v1436_v22 = vadd.f32 %v1397_v21, %v1317_v19  ;;  %v1866_v45 = vpop.f32.mrf.mxu1  ;;  %v1162_v21 = vadd.f32 %v2411_v59, %v1009_v18 }
 0x16c   : > { %v1884_v1 = vpop.f32.mrf.mxu0 }
 0x16d   : > { %v1453_v31 = vadd.f32 %v2429_v23, %v1436_v22  ;;  %v1289_v35 = vpop.f32.mrf.mxu1  ;;  %v1010_v1 = vadd.f32 %v2409_v56, %v2393_v11 }
 0x16e   : > { %v1400_v30 = vpop.f32.mrf.mxu0  ;;  %v1320_v58 = vadd.f32 %v1289_v35, %v1159_v43 }
 0x16f   : > { %v1463_v20 = vmax.f32 %v1453_v31, 0.0  ;;  %v1437_v34 = vadd.f32 %v1400_v30, %v1318_v28  ;;  %v1867_v38 = vpop.f32.mrf.mxu1  ;;  %v1163_v31 = vadd.f32 %v2415_v60, %v1010_v1 }
 0x170   : > { %v1885_v36 = vpop.f32.mrf.mxu0  ;;  %v1012_v38 = vadd.f32 %v2417_v46, %v2397_v29 }
 0x171   : > { %1473 = vst [vmem:[%s2436_s20] sm:$0xff] %v1463_v20  ;;  %v1454_v33 = vadd.f32 %v2429_v23, %v1437_v34  ;;  %v1294_v49 = vpop.f32.mrf.mxu1  ;;  %v1011_v20 = vadd.f32 %v2413_v61, %v2395_v25 }
 0x172   : > { %v1405_v26 = vpop.f32.mrf.mxu0  ;;  %v1321_v7 = vadd.f32 %v1294_v49, %v1160_v62 }
 0x173   : > { %v1464_v41 = vmax.f32 %v1454_v33, 0.0  ;;  %v1438_v50 = vadd.f32 %v1405_v26, %v1319_v52  ;;  %v1870_v57 = vpop.f32.mrf.mxu1  ;;  %v1164_v36 = vadd.f32 %v2419_v6, %v1011_v20 }
 0x174   : > { %v1888_v44 = vpop.f32.mrf.mxu0 }
 0x175   : > { %1474 = vst [vmem:[%s2436_s20 + $0x8] sm:$0xff] %v1464_v41  ;;  %v1455_v54 = vadd.f32 %v2429_v23, %v1438_v50  ;;  %v1297_v47 = vpop.f32.mrf.mxu1  ;;  %v1165_v41 = vadd.f32 %v2422_v13, %v1012_v38 }
 0x176   : > { %v1408_v39 = vpop.f32.mrf.mxu0  ;;  %v1322_v19 = vadd.f32 %v1297_v47, %v1161_v10 }
 0x177   : > { %v1465_v0 = vmax.f32 %v1455_v54, 0.0  ;;  %v1439_v4 = vadd.f32 %v1408_v39, %v1320_v58  ;;  %v1871_v42 = vpop.f32.mrf.mxu1 }
 0x178   : > { %v1889_v2 = vpop.f32.mrf.mxu0 }
 0x179   : > { %1475 = vst [vmem:[%s2436_s20 + $0x10] sm:$0xff] %v1465_v0  ;;  %v1456_v63 = vadd.f32 %v2429_v23, %v1439_v4  ;;  %v1302_v51 = vpop.f32.mrf.mxu1 }
 0x17a   : > { %v1413_v9 = vpop.f32.mrf.mxu0  ;;  %v1323_v17 = vadd.f32 %v1302_v51, %v1162_v21 }
 0x17b   : > { %v1466_v8 = vmax.f32 %v1456_v63, 0.0  ;;  %v1440_v14 = vadd.f32 %v1413_v9, %v1321_v7  ;;  %v1874_v48 = vpop.f32.mrf.mxu1 }
 0x17c   : > { %v1892_v16 = vpop.f32.mrf.mxu0 }
 0x17d   : > { %1476 = vst [vmem:[%s2436_s20 + $0x18] sm:$0xff] %v1466_v8  ;;  %v1457_v5 = vadd.f32 %v2429_v23, %v1440_v14  ;;  %v1305_v55 = vpop.f32.mrf.mxu1 }
 0x17e   : > { %v1416_v15 = vpop.f32.mrf.mxu0  ;;  %v1324_v34 = vadd.f32 %v1305_v55, %v1163_v31 }
 0x17f   : > { %v1467_v24 = vmax.f32 %v1457_v5, 0.0  ;;  %v1441_v22 = vadd.f32 %v1416_v15, %v1322_v19  ;;  %v1875_v53 = vpop.f32.mrf.mxu1 }
 0x180   : > { %v1893_v37 = vpop.f32.mrf.mxu0 }
 0x181   : > { %1477 = vst [vmem:[%s2436_s20 + $0x20] sm:$0xff] %v1467_v24  ;;  %v1458_v12 = vadd.f32 %v2429_v23, %v1441_v22  ;;  %v1310_v59 = vpop.f32.mrf.mxu1 }
 0x182   : > { %v1421_v28 = vpop.f32.mrf.mxu0  ;;  %v1325_v26 = vadd.f32 %v1310_v59, %v1164_v36 }
 0x183   : > { %v1468_v45 = vmax.f32 %v1458_v12, 0.0  ;;  %v1442_v30 = vadd.f32 %v1421_v28, %v1323_v17  ;;  %v1878_v56 = vpop.f32.mrf.mxu1 }
 0x184   : > { %v1896_v27 = vpop.f32.mrf.mxu0 }
 0x185   : > { %1478 = vst [vmem:[%s2436_s20 + $0x28] sm:$0xff] %v1468_v45  ;;  %v1459_v11 = vadd.f32 %v2429_v23, %v1442_v30  ;;  %v1313_v60 = vpop.f32.mrf.mxu1 }
 0x186   : > { %v1424_v35 = vpop.f32.mrf.mxu0  ;;  %v1326_v44 = vadd.f32 %v1313_v60, %v1165_v41 }
 0x187   : > { %v1469_v32 = vmax.f32 %v1459_v11, 0.0  ;;  %v1443_v52 = vadd.f32 %v1424_v35, %v1324_v34  ;;  %v1879_v61 = vpop.f32.mrf.mxu1 }
 0x188   : > { %v1897_v33 = vpop.f32.mrf.mxu0 }
 0x189   : > { %1479 = vst [vmem:[%s2436_s20 + $0x30] sm:$0xff] %v1469_v32  ;;  %v1460_v25 = vadd.f32 %v2429_v23, %v1443_v52 }
 0x18a   : > { %v1429_v43 = vpop.f32.mrf.mxu0 }
 0x18b   : > { %v1470_v50 = vmax.f32 %v1460_v25, 0.0  ;;  %v1444_v6 = vadd.f32 %v1429_v43, %v1325_v26 }
 0x18c   : > { %v1900_v49 = vpop.f32.mrf.mxu0 }
 0x18d   : > { %1480 = vst [vmem:[%s2436_s20 + $0x38] sm:$0xff] %v1470_v50  ;;  %v1461_v40 = vadd.f32 %v2429_v23, %v1444_v6 }
 0x18e   : > { %v1432_v58 = vpop.f32.mrf.mxu0 }
 0x18f   : > { %v1471_v54 = vmax.f32 %v1461_v40, 0.0  ;;  %v1445_v29 = vadd.f32 %v1432_v58, %v1326_v44 }
 0x190   : > { %v1901_v46 = vpop.f32.mrf.mxu0 }
 0x191   : > { %1481 = vst [vmem:[%s2436_s20 + $0x40] sm:$0xff] %v1471_v54  ;;  %v1462_v57 = vadd.f32 %v2429_v23, %v1445_v29 }
 0x193   : > { %v1472_v39 = vmax.f32 %v1462_v57, 0.0 }
 0x195   : > { %1482 = vst [vmem:[%s2436_s20 + $0x48] sm:$0xff] %v1472_v39 }
 0x196 PF: > { %s13_s14 = sadd.s32 1, %s1977_s14   ;;  %s2489_s12 = smov %s1973_s13 }
 0x197   : > { %p10_p5 = scmp.ge.s32.totalorder %s13_s14, 4   ;;  %s2490_s13 = smov %s2492_s15 }
 0x199   :  { %12 = sbr.rel (!%p10_p5) target bundleno = 2 (0x2), region = 70 }

// kernel: pre_conv_forward.4
= control target key start
LH: loop header
LB: loop body
LE: loop exit
PB: predicated region body
PF: predicated region fallthrough
CT: control target
= control target key end

     0   :  { %s2090_s12 = smov 0   ;;  %s2092_s13 = smov 0   ;;  %s2566_s0 = inlined_call_operand.vmem [shape: bf16[2,112,8], index: 0, kind: input, shape index: {}]   ;;  %s2567_s1 = inlined_call_operand.vmem [shape: bf16[9,8,128], index: 1, kind: input, shape index: {}]   ;;  %s2568_s2 = inlined_call_operand.vmem [shape: f32[1,128], index: 2, kind: input, shape index: {}]   ;;  %s2569_s3 = inlined_call_operand.vmem [shape: bf16[2,80,128], index: 3, kind: output, shape index: {}]  }
   0x1   :  { %s2094_s14 = smov 0  }
   0x2 LB: > { %s25_s15 = sadd.s32 1, %s2062_s13  ;;  %p1608_p0 = scmp.ge.s32.totalorder %s2066_s14, 1  ;;  %s2066_s14 = sphi %s2094_s14, %s13_s14   ;;  %s2062_s13 = sphi %s2092_s13, %s2571_s13   ;;  %s2058_s12 = sphi %s2090_s12, %s2570_s12  }
   0x3   : > { %p27_p1 = scmp.ge.s32.totalorder %s25_s15, 2  ;;  %p151_p2 = scmp.lt.s32.totalorder %s2066_s14, 3 }
   0x5   : > { %s2573_s15 = smov (%p27_p1, %s25_s15), 0  ;;  %p152_p3 = pnand %p1608_p0, %p151_p2 }
   0x6   : > { %p179_p4 = scmp.lt.s32.totalorder (!%p152_p3), %s2058_s12, 1 }
   0x7   : > { %155 = sbr.rel (%p152_p3) target bundleno = 408 (0x198), region = 32 }
   0xc   : > { %v1611_v0 = vld [vmem:[%s2567_s1 + $0x4] sm:$0xf]  ;;  %vm298_vm0 = vcmask 1043456   ;;  %v2068_v1 = vmov 0.0   ;;  %s2575_s12 = smov (!%p179_p4, %s2058_s12), 1  ;;  %vm2069_vm1 = vmmov 0  }
   0xd   : > { %1793 = vmatprep.subr.bf16.mxu0 %v2068_v1  ;;  %1991 = vmatprep.subr.bf16.mxu1 %v2068_v1  ;;  %v300_v2 = vsel %vm298_vm0, %v1611_v0, 0  ;;  %s1993_s18 = smul.u32 56, %s2575_s12  ;;  %vm237_vm2 = vsmask.f32 7424  ;;  %v1628_v13 = vld [vmem:[%s2567_s1 + $0x8] sm:$0xf] }
   0xe   : > { %1794 = vmatpush3.bf16.msra.mxu0 %v300_v2  ;;  %1992 = vmatpush3.bf16.msra.mxu1 %v300_v2  ;;  %vm282_vm3 = vcmask 64512   ;;  %v205_v22 = vld [vmem:[%s2567_s1] sm:$0xf]  ;;  %v495_v26 = vsel %vm298_vm0, %v1628_v13, 0  ;;  %vm467_vm4 = vcmask 1046528   ;;  %vm900_vm6 = vcmask 1045504  }
   0xf   : > { %1795 = vmatprep.mubr.msk.bf16.mxu0 %vm2069_vm1, %v2068_v1  ;;  %1807 = vmatprep.mubr.msk.bf16.mxu1 %vm2069_vm1, %v2068_v1  ;;  %s2126_s21 = scalar_lea.vmem %s2566_s0, %s1993_s18  ;;  %v386_v31 = vsel %vm298_vm0, %v205_v22, 0  ;;  %v1635_v48 = vld [vmem:[%s2567_s1 + $0xc] sm:$0xf]  ;;  %v1647_v53 = vld [vmem:[%s2567_s1 + $0x10] sm:$0xf]  ;;  %vm1333_vm8 = vcmask 1044480  }
  0x10   : > { %1837 = vmatprep.subr.bf16.mxu0 %v2068_v1  ;;  %1815 = vmatprep.subr.bf16.mxu1 %v2068_v1  ;;  %v195_v3 = vld [vmem:[%s2126_s21] sm:$0xf]  ;;  %v2130_v4 = vld [vmem:[%s2126_s21 + $0x4] sm:$0xf]  ;;  %v2136_v6 = vld [vmem:[%s2126_s21 + $0x8] sm:$0xff]   ;;  %v648_v50 = vsel %vm298_vm0, %v1635_v48, 0 }
  0x11   : > { %v2133_v5 = vcombine.low %v195_v3, %v2130_v4  ;;  %v246_v9 = vshll.u32 %v2136_v6, 16  ;;  %v2142_v10 = vld [vmem:[%s2126_s21 + $0x18] sm:$0xff]   ;;  %v2145_v11 = vld [vmem:[%s2126_s21 + $0x20] sm:$0xff]   ;;  %v2148_v12 = vld [vmem:[%s2126_s21 + $0x10] sm:$0xff]   ;;  %v250_v23 = vshrl.u32 %v2136_v6, 16  ;;  %v469_v52 = vrot.slane %v2136_v6, 1 }
  0x12   : > { %v262_v16 = vshll.u32 %v2142_v10, 16  ;;  %v266_v17 = vshrl.u32 %v2142_v10, 16  ;;  %v270_v18 = vshll.u32 %v2145_v11, 16  ;;  %v2157_v19 = vld [vmem:[%s2126_s21 + $0x28] ss:$0 sps:$4 sm:$0x11]  }
  0x13   : > { %v239_v7 = vshrl.u32 %v2133_v5, 16  ;;  %v241_v8 = vshll.u32 %v2133_v5, 16  ;;  %v248_v15 = vrot.slane %v246_v9, 1  ;;  %v254_v24 = vshll.u32 %v2148_v12, 16  ;;  %v2181_v39 = vld [vmem:[%s2126_s21 + $0x24] sm:$0xff]   ;;  %v2252_v2 = vld [vmem:[%s2126_s21 + $0xc] sm:$0xff]  }
  0x14   : > { %v264_v21 = vrot.slane %v262_v16, 1  ;;  %v272_v25 = vrot.slane %v270_v18, 1  ;;  %v274_v29 = vshrl.u32 %v2145_v11, 16  ;;  %v278_v30 = vshll.u32 %v2157_v19, 16  ;;  %v461_v43 = vld [vmem:[%s2126_s21] sm:$0xe] }
  0x15   : > { %v243_v14 = vrot.slane %v241_v8, 1  ;;  %v252_v33 = vor.u32 %v250_v23, %v248_v15  ;;  %v256_v34 = vrot.slane %v254_v24, 1  ;;  %v258_v38 = vshrl.u32 %v2148_v12, 16  ;;  %v2033_v40 = vld [vmem:[%s2126_s21 + $0x2c] ss:$0 sps:$4 sm:$0x11]  }
  0x16   : > { %v268_v28 = vor.u32 %v266_v17, %v264_v21  ;;  %v276_v35 = vor.u32 %v274_v29, %v272_v25  ;;  %v280_v36 = vrot.slane %v278_v30, 1  ;;  %v628_v44 = vrot.slane %v2181_v39, 1  ;;  %v580_v61 = vld [vmem:[%s2126_s21 + $0x4] sm:$0xe]  ;;  %v2247_v62 = vld [vmem:[%s2126_s21 + $0x8] sm:$0xf] }
  0x17   : > { %v244_v20 = vor.u32 %v243_v14, %v239_v7  ;;  %v257_v37 = vsel %vm237_vm2, %v252_v33, %v256_v34  ;;  %v260_v42 = vor.u32 %v258_v38, %v256_v34  ;;  %v630_v45 = vrot.slane %v2033_v40, 1  ;;  %v2271_v18 = vld [vmem:[%s2126_s21 + $0x14] sm:$0xff]   ;;  %v2291_v30 = vld [vmem:[%s2126_s21 + $0x1c] sm:$0xff]   ;;  %v2315_v48 = vld [vmem:[%s2126_s21 + $0x2c] ss:$0 sps:$4 sm:$0x33]  }
  0x18   : > { %v273_v32 = vsel %vm237_vm2, %v268_v28, %v272_v25  ;;  %v281_v41 = vsel %vm237_vm2, %v276_v35, %v280_v36  ;;  %v1629_v49 = vcombine.low %v461_v43, %v2130_v4  ;;  %v809_v55 = vsel %vm298_vm0, %v1647_v53, 0  ;;  %v1661_v24 = vld [vmem:[%s2567_s1 + $0x18] sm:$0xf]  ;;  %v894_v53 = vld [vmem:[%s2126_s21 + $0x4] sm:$0xc]  ;;  %s1994_s17 = smul.u32 40, %s2575_s12 }
  0x19   : > { %v249_v27 = vsel %vm237_vm2, %v244_v20, %v248_v15  ;;  %1808 = vmatmul.mubr.msk.bf16.vlgmr.msra.gmra.mxu1 %vm282_vm3, %v273_v32  ;;  %v2196_v46 = vsel %vm467_vm4, %v628_v44, %v630_v45  ;;  %v265_v47 = vsel %vm237_vm2, %v260_v42, %v264_v21  ;;  %v471_v56 = vrot.slane %v2148_v12, 1 }
  0x1a   : > { %1796 = vmatmul.mubr.msk.bf16.vlgmr.msra.gmra.mxu0 %vm282_vm3, %v249_v27  ;;  %1816 = vmatpush3.bf16.msra.mxu1 %v386_v31  ;;  %v468_v51 = vrot.slane %v1629_v49, 1  ;;  %v473_v58 = vrot.slane %v2142_v10, 1  ;;  %v475_v60 = vrot.slane %v2145_v11, 1  ;;  %v1636_v0 = vcombine.low %v580_v61, %v2247_v62  ;;  %s2525_s20 = scalar_lea.vmem %s2569_s3, %s1994_s17 }
  0x1b   : > { %1838 = vmatpush3.bf16.msra.mxu0 %v495_v26  ;;  %1799 = vmatprep.mubr.msk.bf16.mxu0 %vm2069_vm1, %v2068_v1  ;;  %v472_v57 = vsel %vm467_vm4, %v469_v52, %v471_v56  ;;  %v477_v3 = vrot.slane %v2157_v19, 1  ;;  %v752_v7 = vshll.u32 %v2252_v2, 16  ;;  %v622_v9 = vrot.slane %v2252_v2, 1 }
  0x1c   : > { %1881 = vmatprep.subr.bf16.mxu0 %v2068_v1  ;;  %1811 = vmatprep.mubr.msk.bf16.mxu1 %vm2069_vm1, %v2068_v1  ;;  %v470_v54 = vsel %vm467_vm4, %v468_v51, %v469_v52  ;;  %v474_v59 = vsel %vm467_vm4, %v471_v56, %v473_v58  ;;  %v476_v63 = vsel %vm467_vm4, %v473_v58, %v475_v60  ;;  %v741_v4 = vshrl.u32 %v1636_v0, 16  ;;  %v1013_v58 = vld [vmem:[%s2126_s21 + $0x8] sm:$0xc] }
  0x1d   : > { %1859 = vmatprep.subr.bf16.mxu1 %v2068_v1  ;;  %v621_v8 = vrot.slane %v1636_v0, 1  ;;  %v754_v16 = vrot.slane %v752_v7, 2  ;;  %v758_v21 = vshrl.u32 %v2271_v18, 16  ;;  %v761_v22 = vshll.u32 %v2271_v18, 16  ;;  %v1680_v7 = vld [vmem:[%s2567_s1 + $0x20] sm:$0xf] }
  0x1e   : > { %v743_v13 = vrot.slane %v741_v4, 1  ;;  %vm739_vm5 = vsmask.f32 6400  ;;  %v624_v23 = vrot.slane %v2271_v18, 1  ;;  %v1081_v28 = vsel %vm298_vm0, %v1661_v24, 0 }
  0x1f   : > { %v623_v17 = vsel %vm467_vm4, %v621_v8, %v622_v9  ;;  %v760_v26 = vrot.slane %v758_v21, 1  ;;  %v763_v27 = vrot.slane %v761_v22, 2  ;;  %v767_v32 = vshrl.u32 %v2291_v30, 16 }
  0x20   : > { %v625_v29 = vsel %vm467_vm4, %v622_v9, %v624_v23  ;;  %v770_v33 = vshll.u32 %v2291_v30, 16  ;;  %v626_v34 = vrot.slane %v2291_v30, 1  ;;  %v779_v42 = vshll.u32 %v2181_v39, 16  ;;  %v2366_v9 = vld [vmem:[%s2126_s21 + $0x18] sm:$0xff]  }
  0x21   : > { %1812 = vmatmul.mubr.msk.bf16.gmra.mxu1 %vm282_vm3, %v281_v41  ;;  %v764_v31 = vor.u32 %v763_v27, %v760_v26  ;;  %v769_v36 = vrot.slane %v767_v32, 1  ;;  %v776_v41 = vshrl.u32 %v2181_v39, 16  ;;  %v785_v51 = vshrl.u32 %v2315_v48, 16 }
  0x22   : > { %1800 = vmatmul.mubr.msk.bf16.gmra.mxu0 %vm282_vm3, %v257_v37  ;;  %1817 = vmatprep.mubr.msk.bf16.mxu1 %vm2069_vm1, %v2068_v1  ;;  %v772_v37 = vrot.slane %v770_v33, 2  ;;  %v627_v38 = vsel %vm467_vm4, %v624_v23, %v626_v34  ;;  %v629_v49 = vsel %vm467_vm4, %v626_v34, %v628_v44  ;;  %v788_v52 = vshll.u32 %v2315_v48, 16 }
  0x23   : > { %1803 = vmatprep.mubr.msk.bf16.mxu0 %vm2069_vm1, %v2068_v1  ;;  %v778_v45 = vrot.slane %v776_v41, 1  ;;  %v1655_v56 = vcombine.low %v894_v53, %v2247_v62  ;;  %v902_v61 = vrot.slane %v2252_v2, 2  ;;  %v910_v23 = vrot.slane %v2315_v48, 2 }
  0x24   : > { %v773_v40 = vor.u32 %v772_v37, %v769_v36  ;;  %vm1172_vm7 = vsmask.f32 5376 }
  0x26   : > { %v774_v43 = vsel %vm739_vm5, %v764_v31, %v773_v40 }
  0x29   : > { %1818 = vmatmul.mubr.msk.bf16.vlgmr.msra.gmra.mxu1 %vm282_vm3, %v2133_v5  ;;  %v744_v5 = vshll.u32 %v1636_v0, 16 }
  0x2a   : > { %1804 = vmatmul.mubr.msk.bf16.gmra.mxu0 %vm282_vm3, %v265_v47  ;;  %1860 = vmatpush3.bf16.msra.mxu1 %v648_v50  ;;  %v781_v47 = vrot.slane %v779_v42, 2 }
  0x2b   : > { %1839 = vmatprep.mubr.msk.bf16.mxu0 %vm2069_vm1, %v2068_v1  ;;  %1821 = vmatprep.mubr.msk.bf16.mxu1 %vm2069_vm1, %v2068_v1  ;;  %v746_v14 = vrot.slane %v744_v5, 2 }
  0x2c   : > { %1903 = vmatprep.subr.bf16.mxu1 %v2068_v1  ;;  %v782_v50 = vor.u32 %v781_v47, %v778_v45 }
  0x2d   : > { %v747_v19 = vor.u32 %v746_v14, %v743_v13  ;;  %v1057_v13 = vrot.slane %v2366_v9, 2  ;;  %v906_v14 = vrot.slane %v2291_v30, 2 }
  0x2e   : > { %v783_v44 = vsel %vm739_vm5, %v773_v40, %v782_v50  ;;  %v1194_v40 = vshll.u32 %v2366_v9, 16 }
  0x30   : > { %v1196_v47 = vrot.slane %v1194_v40, 3 }
  0x31   : > { %1822 = vmatmul.mubr.msk.bf16.gmra.mxu1 %vm282_vm3, %v2136_v6  ;;  %v749_v6 = vshrl.u32 %v2252_v2, 16 }
  0x32   : > { %1840 = vmatmul.mubr.msk.bf16.vlgmr.msra.gmra.mxu0 %vm282_vm3, %v470_v54  ;;  %1825 = vmatprep.mubr.msk.bf16.mxu1 %vm2069_vm1, %v2068_v1  ;;  %v787_v54 = vrot.slane %v785_v51, 1 }
  0x33   : > { %1882 = vmatpush3.bf16.msra.mxu0 %v809_v55  ;;  %1843 = vmatprep.mubr.msk.bf16.mxu0 %vm2069_vm1, %v2068_v1  ;;  %v751_v15 = vrot.slane %v749_v6, 1  ;;  %v790_v55 = vrot.slane %v788_v52, 2  ;;  %v904_v6 = vrot.slane %v2271_v18, 2 }
  0x34   : > { %1925 = vmatprep.subr.bf16.mxu0 %v2068_v1 }
  0x35   : > { %v755_v20 = vor.u32 %v754_v16, %v751_v15  ;;  %v2380_v16 = vld [vmem:[%s2126_s21 + $0x20] sm:$0xff]  }
  0x36   : > { %v1059_v18 = vrot.slane %v2380_v16, 2  ;;  %v1200_v51 = vshrl.u32 %v2380_v16, 16  ;;  %v1203_v52 = vshll.u32 %v2380_v16, 16 }
  0x37   : > { %v756_v25 = vsel %vm739_vm5, %v747_v19, %v755_v20  ;;  %v765_v35 = vsel %vm739_vm5, %v755_v20, %v764_v31  ;;  %v2393_v20 = vld [vmem:[%s2126_s21 + $0x28] sm:$0xff]  }
  0x38   : > { %v1060_v19 = vsel %vm900_vm6, %v1057_v13, %v1059_v18  ;;  %v1061_v22 = vrot.slane %v2393_v20, 2 }
  0x39   : > { %1826 = vmatmul.mubr.msk.bf16.gmra.mxu1 %vm282_vm3, %v2148_v12  ;;  %v1654_v12 = vld [vmem:[%s2567_s1 + $0x14] sm:$0xf] }
  0x3a   : > { %1844 = vmatmul.mubr.msk.bf16.gmra.mxu0 %vm282_vm3, %v472_v57  ;;  %1829 = vmatprep.mubr.msk.bf16.mxu1 %vm2069_vm1, %v2068_v1  ;;  %v791_v57 = vor.u32 %v790_v55, %v787_v54  ;;  %v1062_v27 = vsel %vm900_vm6, %v1059_v18, %v1061_v22  ;;  %v1202_v54 = vrot.slane %v1200_v51, 2  ;;  %v1205_v55 = vrot.slane %v1203_v52, 3 }
  0x3b   : > { %1847 = vmatprep.mubr.msk.bf16.mxu0 %vm2069_vm1, %v2068_v1 }
  0x3c   : > { %v792_v62 = vsel %vm739_vm5, %v782_v50, %v791_v57  ;;  %v1206_v57 = vor.u32 %v1205_v55, %v1202_v54 }
  0x41   : > { %1830 = vmatmul.mubr.msk.bf16.gmra.mxu1 %vm282_vm3, %v2142_v10  ;;  %v478_v10 = vsel %vm467_vm4, %v475_v60, %v477_v3  ;;  %v901_v60 = vrot.slane %v1655_v56, 2  ;;  %v1337_v56 = vrot.slane %v2366_v9, 3 }
  0x42   : > { %1848 = vmatmul.mubr.msk.bf16.gmra.mxu0 %vm282_vm3, %v474_v59  ;;  %1833 = vmatprep.mubr.msk.bf16.mxu1 %vm2069_vm1, %v2068_v1  ;;  %v2338_v59 = vld [vmem:[%s2126_s21 + $0xc] sm:$0xf] }
  0x43   : > { %1851 = vmatprep.mubr.msk.bf16.mxu0 %vm2069_vm1, %v2068_v1  ;;  %v1662_v0 = vcombine.low %v1013_v58, %v2338_v59  ;;  %v903_v3 = vsel %vm900_vm6, %v901_v60, %v902_v61  ;;  %v1209_v58 = vshrl.u32 %v2393_v20, 16 }
  0x45   : > { %v1054_v2 = vrot.slane %v1662_v0, 2  ;;  %v1177_v24 = vshll.u32 %v1662_v0, 16 }
  0x47   : > { %v1179_v31 = vrot.slane %v1177_v24, 3 }
  0x49   : > { %1834 = vmatmul.mubr.msk.bf16.gmra.mxu1 %vm282_vm3, %v2145_v11  ;;  %v928_v11 = vsel %vm298_vm0, %v1654_v12, 0  ;;  %v905_v12 = vsel %vm900_vm6, %v902_v61, %v904_v6 }
  0x4a   : > { %1852 = vmatmul.mubr.msk.bf16.gmra.mxu0 %vm282_vm3, %v476_v63  ;;  %1861 = vmatprep.mubr.msk.bf16.mxu1 %vm2069_vm1, %v2068_v1  ;;  %v1673_v63 = vld [vmem:[%s2567_s1 + $0x1c] sm:$0xf] }
  0x4b   : > { %1855 = vmatprep.mubr.msk.bf16.mxu0 %vm2069_vm1, %v2068_v1  ;;  %v1242_v4 = vsel %vm298_vm0, %v1673_v63, 0 }
  0x51   : > { %1862 = vmatmul.mubr.msk.bf16.vlgmr.msra.gmra.mxu1 %vm282_vm3, %v623_v17  ;;  %v907_v17 = vsel %vm900_vm6, %v904_v6, %v906_v14 }
  0x52   : > { %1856 = vmatmul.mubr.msk.bf16.gmra.mxu0 %vm282_vm3, %v478_v10  ;;  %1904 = vmatpush3.bf16.msra.mxu1 %v928_v11  ;;  %v1361_v10 = vsel %vm298_vm0, %v1680_v7, 0  ;;  %v908_v11 = vrot.slane %v2181_v39, 2  ;;  %v1174_v39 = vshrl.u32 %v1662_v0, 16  ;;  %v2043_v0 = vld [vmem:[%s2126_s21 + $0x30] ss:$0 sps:$4 sm:$0x77]  }
  0x53   : > { %1883 = vmatprep.mubr.msk.bf16.mxu0 %vm2069_vm1, %v2068_v1  ;;  %1865 = vmatprep.mubr.msk.bf16.mxu1 %vm2069_vm1, %v2068_v1 }
  0x54   : > { %1947 = vmatprep.subr.bf16.mxu1 %v2068_v1  ;;  %v909_v21 = vsel %vm900_vm6, %v906_v14, %v908_v11  ;;  %v1176_v30 = vrot.slane %v1174_v39, 2  ;;  %v1343_v14 = vrot.slane %v2043_v0, 3 }
  0x56   : > { %v1180_v36 = vor.u32 %v1179_v31, %v1176_v30 }
  0x59   : > { %1866 = vmatmul.mubr.msk.bf16.gmra.mxu1 %vm282_vm3, %v625_v29  ;;  %v911_v29 = vsel %vm900_vm6, %v908_v11, %v910_v23 }
  0x5a   : > { %1884 = vmatmul.mubr.msk.bf16.vlgmr.msra.gmra.mxu0 %vm282_vm3, %v756_v25  ;;  %1869 = vmatprep.mubr.msk.bf16.mxu1 %vm2069_vm1, %v2068_v1 }
  0x5b   : > { %1926 = vmatpush3.bf16.msra.mxu0 %v1081_v28  ;;  %1887 = vmatprep.mubr.msk.bf16.mxu0 %vm2069_vm1, %v2068_v1  ;;  %v2041_v28 = vld [vmem:[%s2126_s21 + $0x30] ss:$0 sps:$4 sm:$0x33]  }
  0x5c   : > { %1969 = vmatprep.subr.bf16.mxu0 %v2068_v1  ;;  %v1063_v34 = vrot.slane %v2041_v28, 2 }
  0x5e   : > { %v1064_v41 = vsel %vm900_vm6, %v1061_v22, %v1063_v34 }
  0x61   : > { %1870 = vmatmul.mubr.msk.bf16.gmra.mxu1 %vm282_vm3, %v627_v38  ;;  %v1191_v38 = vshrl.u32 %v2366_v9, 16  ;;  %v1341_v9 = vrot.slane %v2393_v20, 3 }
  0x62   : > { %1888 = vmatmul.mubr.msk.bf16.gmra.mxu0 %vm282_vm3, %v765_v35  ;;  %1873 = vmatprep.mubr.msk.bf16.mxu1 %vm2069_vm1, %v2068_v1  ;;  %v1327_v35 = vld [vmem:[%s2126_s21 + $0x8] sm:$0x8] }
  0x63   : > { %1891 = vmatprep.mubr.msk.bf16.mxu0 %vm2069_vm1, %v2068_v1  ;;  %v1681_v42 = vcombine.low %v1327_v35, %v2338_v59  ;;  %v1193_v45 = vrot.slane %v1191_v38, 2  ;;  %v1212_v59 = vshll.u32 %v2393_v20, 16 }
  0x65   : > { %v1334_v48 = vrot.slane %v1681_v42, 3  ;;  %v1197_v50 = vor.u32 %v1196_v47, %v1193_v45  ;;  %v1214_v63 = vrot.slane %v1212_v59, 3 }
  0x67   : > { %v1207_v61 = vsel %vm1172_vm7, %v1197_v50, %v1206_v57 }
  0x69   : > { %1874 = vmatmul.mubr.msk.bf16.gmra.mxu1 %vm282_vm3, %v629_v49 }
  0x6a   : > { %1892 = vmatmul.mubr.msk.bf16.gmra.mxu0 %vm282_vm3, %v774_v43  ;;  %1877 = vmatprep.mubr.msk.bf16.mxu1 %vm2069_vm1, %v2068_v1 }
  0x6b   : > { %1895 = vmatprep.mubr.msk.bf16.mxu0 %vm2069_vm1, %v2068_v1 }
  0x71   : > { %1878 = vmatmul.mubr.msk.bf16.gmra.mxu1 %vm282_vm3, %v2196_v46  ;;  %v2349_v46 = vld [vmem:[%s2126_s21 + $0x10] sm:$0xff]  }
  0x72   : > { %1896 = vmatmul.mubr.msk.bf16.gmra.mxu0 %vm282_vm3, %v783_v44  ;;  %1905 = vmatprep.mubr.msk.bf16.mxu1 %vm2069_vm1, %v2068_v1  ;;  %v1055_v5 = vrot.slane %v2349_v46, 2  ;;  %v1182_v25 = vshrl.u32 %v2349_v46, 16  ;;  %v1185_v26 = vshll.u32 %v2349_v46, 16  ;;  %v1335_v49 = vrot.slane %v2349_v46, 3 }
  0x73   : > { %1899 = vmatprep.mubr.msk.bf16.mxu0 %vm2069_vm1, %v2068_v1  ;;  %v1339_v46 = vrot.slane %v2380_v16, 3 }
  0x74   : > { %v1056_v8 = vsel %vm900_vm6, %v1054_v2, %v1055_v5  ;;  %v1058_v15 = vsel %vm900_vm6, %v1055_v5, %v1057_v13  ;;  %v1184_v32 = vrot.slane %v1182_v25, 2  ;;  %v1187_v33 = vrot.slane %v1185_v26, 3 }
  0x75   : > { %v1336_v53 = vsel %vm1333_vm8, %v1334_v48, %v1335_v49  ;;  %v1338_v60 = vsel %vm1333_vm8, %v1335_v49, %v1337_v56  ;;  %v1221_v2 = vshll.u32 %v2043_v0, 16  ;;  %v1340_v5 = vsel %vm1333_vm8, %v1337_v56, %v1339_v46 }
  0x76   : > { %v1188_v37 = vor.u32 %v1187_v33, %v1184_v32 }
  0x78   : > { %v1189_v43 = vsel %vm1172_vm7, %v1180_v36, %v1188_v37  ;;  %v1198_v44 = vsel %vm1172_vm7, %v1188_v37, %v1197_v50 }
  0x79   : > { %1906 = vmatmul.mubr.msk.bf16.vlgmr.msra.gmra.mxu1 %vm282_vm3, %v903_v3 }
  0x7a   : > { %1900 = vmatmul.mubr.msk.bf16.gmra.mxu0 %vm282_vm3, %v792_v62  ;;  %1948 = vmatpush3.bf16.msra.mxu1 %v1242_v4  ;;  %v1211_v62 = vrot.slane %v1209_v58, 2  ;;  %v1218_v4 = vshrl.u32 %v2043_v0, 16 }
  0x7b   : > { %1927 = vmatprep.mubr.msk.bf16.mxu0 %vm2069_vm1, %v2068_v1  ;;  %1909 = vmatprep.mubr.msk.bf16.mxu1 %vm2069_vm1, %v2068_v1 }
  0x7c   : > { %v1215_v3 = vor.u32 %v1214_v63, %v1211_v62  ;;  %v1220_v7 = vrot.slane %v1218_v4, 2 }
  0x7e   : > { %v1216_v6 = vsel %vm1172_vm7, %v1206_v57, %v1215_v3 }
  0x81   : > { %1910 = vmatmul.mubr.msk.bf16.gmra.mxu1 %vm282_vm3, %v905_v12  ;;  %v1342_v12 = vsel %vm1333_vm8, %v1339_v46, %v1341_v9 }
  0x82   : > { %1928 = vmatmul.mubr.msk.bf16.vlgmr.msra.gmra.mxu0 %vm282_vm3, %v1056_v8  ;;  %1913 = vmatprep.mubr.msk.bf16.mxu1 %vm2069_vm1, %v2068_v1  ;;  %v1223_v8 = vrot.slane %v1221_v2, 3 }
  0x83   : > { %1970 = vmatpush3.bf16.msra.mxu0 %v1361_v10  ;;  %1931 = vmatprep.mubr.msk.bf16.mxu0 %vm2069_vm1, %v2068_v1 }
  0x84   : > { %v1224_v10 = vor.u32 %v1223_v8, %v1220_v7 }
  0x86   : > { %v1225_v13 = vsel %vm1172_vm7, %v1215_v3, %v1224_v10 }
  0x89   : > { %1914 = vmatmul.mubr.msk.bf16.gmra.mxu1 %vm282_vm3, %v907_v17 }
  0x8a   : > { %1932 = vmatmul.mubr.msk.bf16.gmra.mxu0 %vm282_vm3, %v1058_v15  ;;  %1917 = vmatprep.mubr.msk.bf16.mxu1 %vm2069_vm1, %v2068_v1  ;;  %v1344_v15 = vsel %vm1333_vm8, %v1341_v9, %v1343_v14 }
  0x8b   : > { %1935 = vmatprep.mubr.msk.bf16.mxu0 %vm2069_vm1, %v2068_v1 }
  0x91   : > { %1918 = vmatmul.mubr.msk.bf16.gmra.mxu1 %vm282_vm3, %v909_v21 }
  0x92   : > { %1936 = vmatmul.mubr.msk.bf16.gmra.mxu0 %vm282_vm3, %v1060_v19  ;;  %1921 = vmatprep.mubr.msk.bf16.mxu1 %vm2069_vm1, %v2068_v1 }
  0x93   : > { %1939 = vmatprep.mubr.msk.bf16.mxu0 %vm2069_vm1, %v2068_v1 }
  0x99   : > { %1922 = vmatmul.mubr.msk.bf16.gmra.mxu1 %vm282_vm3, %v911_v29 }
  0x9a   : > { %1940 = vmatmul.mubr.msk.bf16.gmra.mxu0 %vm282_vm3, %v1062_v27  ;;  %1949 = vmatprep.mubr.msk.bf16.mxu1 %vm2069_vm1, %v2068_v1 }
  0x9b   : > { %1943 = vmatprep.mubr.msk.bf16.mxu0 %vm2069_vm1, %v2068_v1 }
  0xa1   : > { %1950 = vmatmul.mubr.msk.bf16.vlgmr.msra.gmra.mxu1 %vm282_vm3, %v1189_v43 }
  0xa2   : > { %1944 = vmatmul.mubr.msk.bf16.gmra.mxu0 %vm282_vm3, %v1064_v41  ;;  %1953 = vmatprep.mubr.msk.bf16.mxu1 %vm2069_vm1, %v2068_v1 }
  0xa3   : > { %1971 = vmatprep.mubr.msk.bf16.mxu0 %vm2069_vm1, %v2068_v1 }
  0xa9   : > { %1954 = vmatmul.mubr.msk.bf16.gmra.mxu1 %vm282_vm3, %v1198_v44 }
  0xaa   : > { %1972 = vmatmul.mubr.msk.bf16.vlgmr.msra.gmra.mxu0 %vm282_vm3, %v1336_v53  ;;  %1957 = vmatprep.mubr.msk.bf16.mxu1 %vm2069_vm1, %v2068_v1 }
  0xab   : > { %1975 = vmatprep.mubr.msk.bf16.mxu0 %vm2069_vm1, %v2068_v1 }
  0xb1   : > { %1958 = vmatmul.mubr.msk.bf16.gmra.mxu1 %vm282_vm3, %v1207_v61 }
  0xb2   : > { %1976 = vmatmul.mubr.msk.bf16.gmra.mxu0 %vm282_vm3, %v1338_v60  ;;  %1961 = vmatprep.mubr.msk.bf16.mxu1 %vm2069_vm1, %v2068_v1 }
  0xb3   : > { %1979 = vmatprep.mubr.msk.bf16.mxu0 %vm2069_vm1, %v2068_v1 }
  0xb9   : > { %1962 = vmatmul.mubr.msk.bf16.gmra.mxu1 %vm282_vm3, %v1216_v6 }
  0xba   : > { %1980 = vmatmul.mubr.msk.bf16.gmra.mxu0 %vm282_vm3, %v1340_v5  ;;  %1965 = vmatprep.mubr.msk.bf16.mxu1 %vm2069_vm1, %v2068_v1 }
  0xbb   : > { %1983 = vmatprep.mubr.msk.bf16.mxu0 %vm2069_vm1, %v2068_v1 }
  0xc1   : > { %1966 = vmatmul.mubr.msk.bf16.gmra.mxu1 %vm282_vm3, %v1225_v13 }
  0xc2   : > { %1984 = vmatmul.mubr.msk.bf16.gmra.mxu0 %vm282_vm3, %v1342_v12 }
  0xc3   : > { %1987 = vmatprep.mubr.msk.bf16.mxu0 %vm2069_vm1, %v2068_v1 }
  0xca   : > { %1988 = vmatmul.mubr.msk.bf16.gmra.mxu0 %vm282_vm3, %v1344_v15 }
  0xd9   : > { %v360_v17 = vpop.f32.mrf.mxu1 }
  0xda   : > { %v336_v16 = vpop.f32.mrf.mxu0 }
  0xdb   : > { %v1809_v11 = vpop.f32.mrf.mxu1 }
  0xdc   : > { %v1797_v18 = vpop.f32.mrf.mxu0 }
  0xdd   : > { %v363_v20 = vpop.f32.mrf.mxu1 }
  0xde   : > { %v339_v19 = vpop.f32.mrf.mxu0 }
  0xdf   : > { %v1810_v22 = vpop.f32.mrf.mxu1 }
  0xe0   : > { %v1798_v21 = vpop.f32.mrf.mxu0 }
  0xe1   : > { %v368_v39 = vpop.f32.mrf.mxu1 }
  0xe2   : > { %v344_v23 = vpop.f32.mrf.mxu0 }
  0xe3   : > { %v1813_v25 = vpop.f32.mrf.mxu1 }
  0xe4   : > { %v1801_v24 = vpop.f32.mrf.mxu0 }
  0xe5   : > { %v371_v26 = vpop.f32.mrf.mxu1 }
  0xe6   : > { %v347_v1 = vpop.f32.mrf.mxu0 }
  0xe7   : > { %v1814_v28 = vpop.f32.mrf.mxu1 }
  0xe8   : > { %v1802_v27 = vpop.f32.mrf.mxu0 }
  0xe9   : > { %v422_v30 = vpop.f32.mrf.mxu1 }
  0xea   : > { %v352_v29 = vpop.f32.mrf.mxu0  ;;  %v423_v32 = vadd.f32 %v422_v30, %v336_v16 }
  0xeb   : > { %v1819_v33 = vpop.f32.mrf.mxu1 }
  0xec   : > { %v1805_v31 = vpop.f32.mrf.mxu0 }
  0xed   : > { %v425_v35 = vpop.f32.mrf.mxu1 }
  0xee   : > { %v355_v34 = vpop.f32.mrf.mxu0  ;;  %v426_v37 = vadd.f32 %v425_v35, %v339_v19 }
  0xef   : > { %v1820_v38 = vpop.f32.mrf.mxu1 }
  0xf0   : > { %v1806_v36 = vpop.f32.mrf.mxu0 }
  0xf1   : > { %v430_v42 = vpop.f32.mrf.mxu1 }
  0xf2   : > { %v531_v40 = vpop.f32.mrf.mxu0  ;;  %v431_v45 = vadd.f32 %v430_v42, %v344_v23 }
  0xf3   : > { %v570_v41 = vadd.f32 %v531_v40, %v423_v32  ;;  %v1823_v47 = vpop.f32.mrf.mxu1 }
  0xf4   : > { %v1841_v43 = vpop.f32.mrf.mxu0 }
  0xf5   : > { %v433_v50 = vpop.f32.mrf.mxu1 }
  0xf6   : > { %v534_v48 = vpop.f32.mrf.mxu0  ;;  %v434_v52 = vadd.f32 %v433_v50, %v347_v1 }
  0xf7   : > { %v571_v49 = vadd.f32 %v534_v48, %v426_v37  ;;  %v1824_v53 = vpop.f32.mrf.mxu1 }
  0xf8   : > { %v1842_v51 = vpop.f32.mrf.mxu0 }
  0xf9   : > { %v438_v55 = vpop.f32.mrf.mxu1 }
  0xfa   : > { %v539_v44 = vpop.f32.mrf.mxu0  ;;  %v439_v57 = vadd.f32 %v438_v55, %v352_v29 }
  0xfb   : > { %v572_v54 = vadd.f32 %v539_v44, %v431_v45  ;;  %v1827_v58 = vpop.f32.mrf.mxu1 }
  0xfc   : > { %v1845_v56 = vpop.f32.mrf.mxu0 }
  0xfd   : > { %v441_v61 = vpop.f32.mrf.mxu1 }
  0xfe   : > { %v542_v59 = vpop.f32.mrf.mxu0  ;;  %v442_v63 = vadd.f32 %v441_v61, %v355_v34 }
  0xff   : > { %v573_v60 = vadd.f32 %v542_v59, %v434_v52  ;;  %v1828_v0 = vpop.f32.mrf.mxu1 }
 0x100   : > { %v1846_v62 = vpop.f32.mrf.mxu0 }
 0x101   : > { %v446_v4 = vpop.f32.mrf.mxu1 }
 0x102   : > { %v547_v46 = vpop.f32.mrf.mxu0  ;;  %v447_v5 = vadd.f32 %v446_v4, %v360_v17 }
 0x103   : > { %v574_v3 = vadd.f32 %v547_v46, %v439_v57  ;;  %v1831_v6 = vpop.f32.mrf.mxu1 }
 0x104   : > { %v1849_v2 = vpop.f32.mrf.mxu0 }
 0x105   : > { %v449_v9 = vpop.f32.mrf.mxu1 }
 0x106   : > { %v550_v7 = vpop.f32.mrf.mxu0  ;;  %v450_v12 = vadd.f32 %v449_v9, %v363_v20 }
 0x107   : > { %v575_v8 = vadd.f32 %v550_v7, %v442_v63  ;;  %v1832_v13 = vpop.f32.mrf.mxu1 }
 0x108   : > { %v1850_v10 = vpop.f32.mrf.mxu0 }
 0x109   : > { %v454_v16 = vpop.f32.mrf.mxu1 }
 0x10a   : > { %v555_v14 = vpop.f32.mrf.mxu0  ;;  %v455_v11 = vadd.f32 %v454_v16, %v368_v39 }
 0x10b   : > { %v576_v15 = vadd.f32 %v555_v14, %v447_v5  ;;  %v1835_v19 = vpop.f32.mrf.mxu1 }
 0x10c   : > { %v1853_v18 = vpop.f32.mrf.mxu0 }
 0x10d   : > { %v457_v23 = vpop.f32.mrf.mxu1 }
 0x10e   : > { %v558_v21 = vpop.f32.mrf.mxu0  ;;  %v458_v25 = vadd.f32 %v457_v23, %v371_v26 }
 0x10f   : > { %v577_v22 = vadd.f32 %v558_v21, %v450_v12  ;;  %v1836_v1 = vpop.f32.mrf.mxu1 }
 0x110   : > { %v1854_v24 = vpop.f32.mrf.mxu0 }
 0x111   : > { %v684_v28 = vpop.f32.mrf.mxu1 }
 0x112   : > { %v563_v17 = vpop.f32.mrf.mxu0  ;;  %v723_v30 = vadd.f32 %v684_v28, %v570_v41 }
 0x113   : > { %v578_v27 = vadd.f32 %v563_v17, %v455_v11  ;;  %v1863_v31 = vpop.f32.mrf.mxu1 }
 0x114   : > { %v1857_v29 = vpop.f32.mrf.mxu0 }
 0x115   : > { %v687_v33 = vpop.f32.mrf.mxu1 }
 0x116   : > { %v566_v20 = vpop.f32.mrf.mxu0  ;;  %v724_v35 = vadd.f32 %v687_v33, %v571_v49 }
 0x117   : > { %v579_v32 = vadd.f32 %v566_v20, %v458_v25  ;;  %v1864_v36 = vpop.f32.mrf.mxu1 }
 0x118   : > { %v1858_v34 = vpop.f32.mrf.mxu0 }
 0x119   : > { %v692_v38 = vpop.f32.mrf.mxu1 }
 0x11a   : > { %v845_v39 = vpop.f32.mrf.mxu0  ;;  %v725_v42 = vadd.f32 %v692_v38, %v572_v54 }
 0x11b   : > { %v2468_v37 = vadd.f32 %v845_v39, %v723_v30  ;;  %v1867_v26 = vpop.f32.mrf.mxu1 }
 0x11c   : > { %v1885_v40 = vpop.f32.mrf.mxu0 }
 0x11d   : > { %v695_v47 = vpop.f32.mrf.mxu1 }
 0x11e   : > { %v848_v43 = vpop.f32.mrf.mxu0  ;;  %v726_v41 = vadd.f32 %v695_v47, %v573_v60 }
 0x11f   : > { %v2470_v45 = vadd.f32 %v848_v43, %v724_v35  ;;  %v1868_v50 = vpop.f32.mrf.mxu1 }
 0x120   : > { %v1886_v48 = vpop.f32.mrf.mxu0 }
 0x121   : > { %v700_v53 = vpop.f32.mrf.mxu1 }
 0x122   : > { %v853_v51 = vpop.f32.mrf.mxu0  ;;  %v727_v44 = vadd.f32 %v700_v53, %v574_v3 }
 0x123   : > { %v2472_v52 = vadd.f32 %v853_v51, %v725_v42  ;;  %v1871_v55 = vpop.f32.mrf.mxu1 }
 0x124   : > { %v1889_v49 = vpop.f32.mrf.mxu0 }
 0x125   : > { %v703_v58 = vpop.f32.mrf.mxu1 }
 0x126   : > { %v856_v56 = vpop.f32.mrf.mxu0  ;;  %v728_v59 = vadd.f32 %v703_v58, %v575_v8 }
 0x127   : > { %v2474_v57 = vadd.f32 %v856_v56, %v726_v41  ;;  %v1872_v61 = vpop.f32.mrf.mxu1 }
 0x128   : > { %v1890_v54 = vpop.f32.mrf.mxu0 }
 0x129   : > { %v708_v0 = vpop.f32.mrf.mxu1 }
 0x12a   : > { %v861_v62 = vpop.f32.mrf.mxu0  ;;  %v729_v46 = vadd.f32 %v708_v0, %v576_v15 }
 0x12b   : > { %v2476_v63 = vadd.f32 %v861_v62, %v727_v44  ;;  %v1875_v4 = vpop.f32.mrf.mxu1 }
 0x12c   : > { %v1893_v60 = vpop.f32.mrf.mxu0 }
 0x12d   : > { %v711_v6 = vpop.f32.mrf.mxu1 }
 0x12e   : > { %v864_v2 = vpop.f32.mrf.mxu0  ;;  %v730_v7 = vadd.f32 %v711_v6, %v577_v22 }
 0x12f   : > { %v2478_v5 = vadd.f32 %v864_v2, %v728_v59  ;;  %v1876_v9 = vpop.f32.mrf.mxu1 }
 0x130   : > { %v1894_v3 = vpop.f32.mrf.mxu0 }
 0x131   : > { %v716_v13 = vpop.f32.mrf.mxu1 }
 0x132   : > { %v869_v10 = vpop.f32.mrf.mxu0  ;;  %v731_v14 = vadd.f32 %v716_v13, %v578_v27 }
 0x133   : > { %v2480_v12 = vadd.f32 %v869_v10, %v729_v46  ;;  %v1879_v16 = vpop.f32.mrf.mxu1 }
 0x134   : > { %v1897_v8 = vpop.f32.mrf.mxu0 }
 0x135   : > { %v719_v19 = vpop.f32.mrf.mxu1 }
 0x136   : > { %v872_v18 = vpop.f32.mrf.mxu0  ;;  %v732_v21 = vadd.f32 %v719_v19, %v579_v32 }
 0x137   : > { %v2482_v11 = vadd.f32 %v872_v18, %v730_v7  ;;  %v1880_v23 = vpop.f32.mrf.mxu1 }
 0x138   : > { %v1898_v15 = vpop.f32.mrf.mxu0 }
 0x139   : > { %v964_v1 = vpop.f32.mrf.mxu1 }
 0x13a   : > { %v877_v24 = vpop.f32.mrf.mxu0  ;;  %v1003_v9 = vadd.f32 %v964_v1, %v2468_v37 }
 0x13b   : > { %v2484_v25 = vadd.f32 %v877_v24, %v731_v14  ;;  %v1907_v17 = vpop.f32.mrf.mxu1 }
 0x13c   : > { %v1901_v22 = vpop.f32.mrf.mxu0  ;;  %v2515_v17 = vld [vmem:[%s2568_s2] ss:$0 sm:$0xff] }
 0x13d   : > { %v967_v30 = vpop.f32.mrf.mxu1 }
 0x13e   : > { %v880_v28 = vpop.f32.mrf.mxu0  ;;  %v1004_v18 = vadd.f32 %v967_v30, %v2470_v45 }
 0x13f   : > { %v2486_v29 = vadd.f32 %v880_v28, %v732_v21  ;;  %v1908_v27 = vpop.f32.mrf.mxu1 }
 0x140   : > { %v1902_v31 = vpop.f32.mrf.mxu0 }
 0x141   : > { %v972_v33 = vpop.f32.mrf.mxu1 }
 0x142   : > { %v1117_v20 = vpop.f32.mrf.mxu0  ;;  %v1005_v1 = vadd.f32 %v972_v33, %v2472_v52 }
 0x143   : > { %v1911_v35 = vpop.f32.mrf.mxu1  ;;  %v1156_v8 = vadd.f32 %v1117_v20, %v1003_v9 }
 0x144   : > { %v1929_v34 = vpop.f32.mrf.mxu0 }
 0x145   : > { %v975_v39 = vpop.f32.mrf.mxu1 }
 0x146   : > { %v1120_v36 = vpop.f32.mrf.mxu0 }
 0x147   : > { %v1912_v38 = vpop.f32.mrf.mxu1  ;;  %v1157_v23 = vadd.f32 %v1120_v36, %v1004_v18  ;;  %v1006_v36 = vadd.f32 %v975_v39, %v2474_v57 }
 0x148   : > { %v1930_v32 = vpop.f32.mrf.mxu0 }
 0x149   : > { %v2488_v42 = vpop.f32.mrf.mxu1 }
 0x14a   : > { %v1125_v40 = vpop.f32.mrf.mxu0  ;;  %v1007_v57 = vadd.f32 %v2488_v42, %v2476_v63 }
 0x14b   : > { %v1915_v43 = vpop.f32.mrf.mxu1  ;;  %v1158_v20 = vadd.f32 %v1125_v40, %v1005_v1 }
 0x14c   : > { %v1933_v26 = vpop.f32.mrf.mxu0 }
 0x14d   : > { %v2490_v48 = vpop.f32.mrf.mxu1 }
 0x14e   : > { %v1128_v47 = vpop.f32.mrf.mxu0 }
 0x14f   : > { %v1916_v50 = vpop.f32.mrf.mxu1 }
 0x150   : > { %v1934_v41 = vpop.f32.mrf.mxu0 }
 0x151   : > { %v2492_v53 = vpop.f32.mrf.mxu1  ;;  %v1159_v41 = vadd.f32 %v1128_v47, %v1006_v36 }
 0x152   : > { %v1133_v51 = vpop.f32.mrf.mxu0 }
 0x153   : > { %v1919_v44 = vpop.f32.mrf.mxu1 }
 0x154   : > { %v1937_v49 = vpop.f32.mrf.mxu0 }
 0x155   : > { %v2496_v56 = vpop.f32.mrf.mxu1 }
 0x156   : > { %v2494_v55 = vpop.f32.mrf.mxu0  ;;  %v1010_v1 = vadd.f32 %v2496_v56, %v2482_v11 }
 0x157   : > { %v1920_v54 = vpop.f32.mrf.mxu1 }
 0x158   : > { %v1938_v58 = vpop.f32.mrf.mxu0 }
 0x159   : > { %v2500_v61 = vpop.f32.mrf.mxu1 }
 0x15a   : > { %v2498_v59 = vpop.f32.mrf.mxu0 }
 0x15b   : > { %v1923_v0 = vpop.f32.mrf.mxu1 }
 0x15c   : > { %v1941_v62 = vpop.f32.mrf.mxu0 }
 0x15d   : > { %v2504_v46 = vpop.f32.mrf.mxu1  ;;  %v1160_v62 = vadd.f32 %v1133_v51, %v1007_v57 }
 0x15e   : > { %v2502_v60 = vpop.f32.mrf.mxu0 }
 0x15f   : > { %v1924_v2 = vpop.f32.mrf.mxu1 }
 0x160   : > { %v1942_v4 = vpop.f32.mrf.mxu0 }
 0x161   : > { %v1278_v3 = vpop.f32.mrf.mxu1 }
 0x162   : > { %v2506_v6 = vpop.f32.mrf.mxu0  ;;  %v1317_v19 = vadd.f32 %v1278_v3, %v1156_v8  ;;  %v1008_v3 = vadd.f32 %v2490_v48, %v2478_v5 }
 0x163   : > { %v1951_v10 = vpop.f32.mrf.mxu1 }
 0x164   : > { %v1945_v7 = vpop.f32.mrf.mxu0  ;;  %v1161_v42 = vadd.f32 %v2494_v55, %v1008_v3 }
 0x165   : > { %v1281_v14 = vpop.f32.mrf.mxu1 }
 0x166   : > { %v2509_v13 = vpop.f32.mrf.mxu0  ;;  %v1318_v28 = vadd.f32 %v1281_v14, %v1157_v23 }
 0x167   : > { %v1952_v15 = vpop.f32.mrf.mxu1 }
 0x168   : > { %v1946_v16 = vpop.f32.mrf.mxu0 }
 0x169   : > { %v1286_v22 = vpop.f32.mrf.mxu1 }
 0x16a   : > { %v1397_v21 = vpop.f32.mrf.mxu0  ;;  %v1319_v32 = vadd.f32 %v1286_v22, %v1158_v20 }
 0x16b   : > { %v1436_v24 = vadd.f32 %v1397_v21, %v1317_v19  ;;  %v1955_v31 = vpop.f32.mrf.mxu1  ;;  %v1009_v19 = vadd.f32 %v2492_v53, %v2480_v12 }
 0x16c   : > { %v1973_v37 = vpop.f32.mrf.mxu0 }
 0x16d   : > { %v1453_v45 = vadd.f32 %v2515_v17, %v1436_v24  ;;  %v1289_v34 = vpop.f32.mrf.mxu1  ;;  %v1162_v48 = vadd.f32 %v2498_v59, %v1009_v19 }
 0x16e   : > { %v1400_v27 = vpop.f32.mrf.mxu0  ;;  %v1320_v39 = vadd.f32 %v1289_v34, %v1159_v41 }
 0x16f   : > { %v1437_v30 = vadd.f32 %v1400_v27, %v1318_v28  ;;  %v1956_v26 = vpop.f32.mrf.mxu1  ;;  %v1463_v50 = vmax.f32 %v1453_v45, 0.0  ;;  %v1163_v27 = vadd.f32 %v2502_v60, %v1010_v1 }
 0x170   : > { %v1974_v35 = vpop.f32.mrf.mxu0 }
 0x171   : > { %v1454_v38 = vadd.f32 %v2515_v17, %v1437_v30  ;;  %v1294_v40 = vpop.f32.mrf.mxu1  ;;  %v1011_v35 = vadd.f32 %v2500_v61, %v2484_v25 }
 0x172   : > { %v1405_v43 = vpop.f32.mrf.mxu0  ;;  %v1321_v7 = vadd.f32 %v1294_v40, %v1160_v62 }
 0x173   : > { %v1464_v52 = vmax.f32 %v1454_v38, 0.0  ;;  %v1438_v33 = vadd.f32 %v1405_v43, %v1319_v32  ;;  %v1959_v58 = vpop.f32.mrf.mxu1  ;;  %v1164_v56 = vadd.f32 %v2506_v6, %v1011_v35 }
 0x174   : > { %v1977_v49 = vpop.f32.mrf.mxu0 }
 0x175   : > { %v1713_v44 = vpack.c.bf16 %v1464_v52, %v1463_v50  ;;  %v1455_v47 = vadd.f32 %v2515_v17, %v1438_v33  ;;  %v1297_v4 = vpop.f32.mrf.mxu1  ;;  %v1012_v50 = vadd.f32 %v2504_v46, %v2486_v29 }
 0x176   : > { %v1408_v54 = vpop.f32.mrf.mxu0  ;;  %v1322_v15 = vadd.f32 %v1297_v4, %v1161_v42 }
 0x177   : > { %1714 = vst [vmem:[%s2525_s20] sm:$0xff] %v1713_v44   ;;  %v1439_v0 = vadd.f32 %v1408_v54, %v1320_v39  ;;  %v1960_v10 = vpop.f32.mrf.mxu1  ;;  %v1465_v8 = vmax.f32 %v1455_v47, 0.0  ;;  %v1165_v40 = vadd.f32 %v2509_v13, %v1012_v50 }
 0x178   : > { %v1978_v2 = vpop.f32.mrf.mxu0 }
 0x179   : > { %v1456_v9 = vadd.f32 %v2515_v17, %v1439_v0  ;;  %v1302_v16 = vpop.f32.mrf.mxu1 }
 0x17a   : > { %v1413_v63 = vpop.f32.mrf.mxu0  ;;  %v1323_v28 = vadd.f32 %v1302_v16, %v1162_v48 }
 0x17b   : > { %v1466_v14 = vmax.f32 %v1456_v9, 0.0  ;;  %v1440_v51 = vadd.f32 %v1413_v63, %v1321_v7  ;;  %v1963_v23 = vpop.f32.mrf.mxu1 }
 0x17c   : > { %v1981_v18 = vpop.f32.mrf.mxu0 }
 0x17d   : > { %v1718_v21 = vpack.c.bf16 %v1466_v14, %v1465_v8  ;;  %v1457_v24 = vadd.f32 %v2515_v17, %v1440_v51  ;;  %v1305_v37 = vpop.f32.mrf.mxu1 }
 0x17e   : > { %v1416_v5 = vpop.f32.mrf.mxu0  ;;  %v1324_v36 = vadd.f32 %v1305_v37, %v1163_v27 }
 0x17f   : > { %1735 = vst [vmem:[%s2525_s20 + $0x8] sm:$0xff] %v1718_v21   ;;  %v1441_v22 = vadd.f32 %v1416_v5, %v1322_v15  ;;  %v1964_v12 = vpop.f32.mrf.mxu1  ;;  %v1467_v20 = vmax.f32 %v1457_v24, 0.0 }
 0x180   : > { %v1982_v55 = vpop.f32.mrf.mxu0 }
 0x181   : > { %v1458_v31 = vadd.f32 %v2515_v17, %v1441_v22  ;;  %v1310_v30 = vpop.f32.mrf.mxu1 }
 0x182   : > { %v1421_v53 = vpop.f32.mrf.mxu0  ;;  %v1325_v52 = vadd.f32 %v1310_v30, %v1164_v56 }
 0x183   : > { %v1468_v45 = vmax.f32 %v1458_v31, 0.0  ;;  %v1442_v59 = vadd.f32 %v1421_v53, %v1323_v28  ;;  %v1967_v38 = vpop.f32.mrf.mxu1 }
 0x184   : > { %v1985_v34 = vpop.f32.mrf.mxu0 }
 0x185   : > { %v1723_v32 = vpack.c.bf16 %v1468_v45, %v1467_v20  ;;  %v1459_v26 = vadd.f32 %v2515_v17, %v1442_v59  ;;  %v1313_v60 = vpop.f32.mrf.mxu1 }
 0x186   : > { %v1424_v11 = vpop.f32.mrf.mxu0  ;;  %v1326_v44 = vadd.f32 %v1313_v60, %v1165_v40 }
 0x187   : > { %1736 = vst [vmem:[%s2525_s20 + $0x10] sm:$0xff] %v1723_v32   ;;  %v1443_v43 = vadd.f32 %v1424_v11, %v1324_v36  ;;  %v1968_v25 = vpop.f32.mrf.mxu1  ;;  %v1469_v49 = vmax.f32 %v1459_v26, 0.0 }
 0x188   : > { %v1986_v41 = vpop.f32.mrf.mxu0 }
 0x189   : > { %v1460_v33 = vadd.f32 %v2515_v17, %v1443_v43 }
 0x18a   : > { %v1429_v61 = vpop.f32.mrf.mxu0 }
 0x18b   : > { %v1470_v6 = vmax.f32 %v1460_v33, 0.0  ;;  %v1444_v57 = vadd.f32 %v1429_v61, %v1325_v52 }
 0x18c   : > { %v1989_v39 = vpop.f32.mrf.mxu0 }
 0x18d   : > { %v1728_v58 = vpack.c.bf16 %v1470_v6, %v1469_v49  ;;  %v1461_v62 = vadd.f32 %v2515_v17, %v1444_v57 }
 0x18e   : > { %v1432_v54 = vpop.f32.mrf.mxu0 }
 0x18f   : > { %1737 = vst [vmem:[%s2525_s20 + $0x18] sm:$0xff] %v1728_v58   ;;  %v1445_v47 = vadd.f32 %v1432_v54, %v1326_v44  ;;  %v1471_v0 = vmax.f32 %v1461_v62, 0.0 }
 0x190   : > { %v1990_v29 = vpop.f32.mrf.mxu0 }
 0x191   : > { %v1462_v46 = vadd.f32 %v2515_v17, %v1445_v47 }
 0x193   : > { %v1472_v4 = vmax.f32 %v1462_v46, 0.0 }
 0x195   : > { %v1733_v2 = vpack.c.bf16 %v1472_v4, %v1471_v0 }
 0x197   : > { %1738 = vst [vmem:[%s2525_s20 + $0x20] sm:$0xff] %v1733_v2  }
 0x198 PF: > { %s13_s14 = sadd.s32 1, %s2066_s14   ;;  %s2570_s12 = smov %s2062_s13 }
 0x199   : > { %p10_p5 = scmp.ge.s32.totalorder %s13_s14, 4   ;;  %s2571_s13 = smov %s2573_s15 }
 0x19b   :  { %12 = sbr.rel (!%p10_p5) target bundleno = 2 (0x2), region = 70 }

</bundles_post_ra>
